<compile_context>
chip_gen: v5e
topology: v5e:2x2
jax: 0.10.0
libtpu: 0.0.40
codegen_flags: <defaults>
</compile_context>

<pallas_src>
import math
from functools import partial

import jax
import jax.numpy as jnp
from jax import lax
from jax.experimental import pallas as pl
from jax.experimental.pallas import tpu as pltpu

F32 = jnp.float32
BF16 = jnp.bfloat16

_P1 = pltpu.CompilerParams(dimension_semantics=("parallel",))
_P2 = pltpu.CompilerParams(dimension_semantics=("parallel", "parallel"))

ROW_TILE_CAP = 256  # VMEM-safe on v7x (64 MiB); matmul-bound kernels insensitive to 256 vs 512


# ----------------------------------------------------------------------------
# small helpers
# ----------------------------------------------------------------------------
def _layer_norm(x, g, b, eps=1e-5):
    # matches torch.nn.LayerNorm (biased variance, eps=1e-5); f32 math
    mu = jnp.mean(x, axis=-1, keepdims=True)
    var = jnp.mean((x - mu) ** 2, axis=-1, keepdims=True)
    return (x - mu) * lax.rsqrt(var + eps) * g + b


def _row_tile(M, cap=ROW_TILE_CAP):
    tm = M if M <= cap else cap
    return tm, pl.cdiv(M, tm)


def _round_up(n, m):
    return ((n + m - 1) // m) * m


# ----------------------------------------------------------------------------
# kernel: embed  (input bias/scale + Linear + LayerNorm + ReLU, fused)
# ----------------------------------------------------------------------------
def embed_kernel(x_ref, ib_ref, isc_ref, w_ref, b_ref, g_ref, bln_ref, o_ref):
    x = (x_ref[...] + ib_ref[...]) * isc_ref[...]
    y = jnp.dot(x.astype(BF16), w_ref[...], preferred_element_type=F32) + b_ref[...]
    y = _layer_norm(y, g_ref[...], bln_ref[...])
    o_ref[...] = jnp.maximum(y, 0.0)


def embed(x2d, ib, isc, w, b, g, bln):
    M, Fin = x2d.shape
    D = w.shape[1]
    tm, gm = _row_tile(M)
    return pl.pallas_call(
        embed_kernel,
        out_shape=jax.ShapeDtypeStruct((M, D), F32),
        grid=(gm,),
        in_specs=[
            pl.BlockSpec((tm, Fin), lambda i: (i, 0)),
            pl.BlockSpec((1, Fin), lambda i: (0, 0)),
            pl.BlockSpec((1, Fin), lambda i: (0, 0)),
            pl.BlockSpec((Fin, D), lambda i: (0, 0)),
            pl.BlockSpec((1, D), lambda i: (0, 0)),
            pl.BlockSpec((1, D), lambda i: (0, 0)),
            pl.BlockSpec((1, D), lambda i: (0, 0)),
        ],
        out_specs=pl.BlockSpec((tm, D), lambda i: (i, 0)),
        compiler_params=_P1,
    )(x2d, ib.reshape(1, Fin), isc.reshape(1, Fin),
      w, b.reshape(1, D), g.reshape(1, D), bln.reshape(1, D))


# ----------------------------------------------------------------------------
# kernel: linear (+ optional sigmoid), row tiled; weights already bf16
# ----------------------------------------------------------------------------
def linear_kernel(x_ref, w_ref, b_ref, o_ref, *, act):
    y = jnp.dot(x_ref[...].astype(BF16), w_ref[...],
                preferred_element_type=F32) + b_ref[...]
    if act == "sigmoid":
        y = jax.nn.sigmoid(y)
    o_ref[...] = y


def linear(x2d, w, b, act="none"):
    M, Din = x2d.shape
    Dout = w.shape[1]
    tm, gm = _row_tile(M)
    return pl.pallas_call(
        partial(linear_kernel, act=act),
        out_shape=jax.ShapeDtypeStruct((M, Dout), F32),
        grid=(gm,),
        in_specs=[
            pl.BlockSpec((tm, Din), lambda i: (i, 0)),
            pl.BlockSpec((Din, Dout), lambda i: (0, 0)),
            pl.BlockSpec((1, Dout), lambda i: (0, 0)),
        ],
        out_specs=pl.BlockSpec((tm, Dout), lambda i: (i, 0)),
        compiler_params=_P1,
    )(x2d, w, b.reshape(1, Dout))


# ----------------------------------------------------------------------------
# kernel: fused FeedForward   out = x + scale * (W2 @ relu(W1 @ LN(x)))  [+ final LN]
# ----------------------------------------------------------------------------
def ffn_kernel(x_ref, g_ref, b_ref, w1_ref, b1_ref, w2_ref, b2_ref,
               g2_ref, bl2_ref, o_ref, *, scale, final_ln):
    x = x_ref[...]
    xn = _layer_norm(x, g_ref[...], b_ref[...])
    h = jnp.dot(xn.astype(BF16), w1_ref[...], preferred_element_type=F32) + b1_ref[...]
    h = jnp.maximum(h, 0.0)
    y = jnp.dot(h.astype(BF16), w2_ref[...], preferred_element_type=F32) + b2_ref[...]
    y = x + scale * y
    if final_ln:
        y = _layer_norm(y, g2_ref[...], bl2_ref[...])
    o_ref[...] = y


def feed_forward(x, p, final_ln_g=None, final_ln_b=None, scale=0.5):
    B, T, D = x.shape
    M = B * T
    F = p["w1"].shape[1]
    final_ln = final_ln_g is not None
    if not final_ln:
        final_ln_g = jnp.ones((D,), F32)
        final_ln_b = jnp.zeros((D,), F32)
    tm, gm = _row_tile(M)
    out = pl.pallas_call(
        partial(ffn_kernel, scale=scale, final_ln=final_ln),
        out_shape=jax.ShapeDtypeStruct((M, D), F32),
        grid=(gm,),
        in_specs=[
            pl.BlockSpec((tm, D), lambda i: (i, 0)),
            pl.BlockSpec((1, D), lambda i: (0, 0)),
            pl.BlockSpec((1, D), lambda i: (0, 0)),
            pl.BlockSpec((D, F), lambda i: (0, 0)),
            pl.BlockSpec((1, F), lambda i: (0, 0)),
            pl.BlockSpec((F, D), lambda i: (0, 0)),
            pl.BlockSpec((1, D), lambda i: (0, 0)),
            pl.BlockSpec((1, D), lambda i: (0, 0)),
            pl.BlockSpec((1, D), lambda i: (0, 0)),
        ],
        out_specs=pl.BlockSpec((tm, D), lambda i: (i, 0)),
        compiler_params=_P1,
    )(x.reshape(M, D), p["ln_g"].reshape(1, D), p["ln_b"].reshape(1, D),
      p["w1"], p["b1"].reshape(1, F),
      p["w2"], p["b2"].reshape(1, D),
      final_ln_g.reshape(1, D), final_ln_b.reshape(1, D))
    return out.reshape(B, T, D)


# ----------------------------------------------------------------------------
# kernel: LN + fused QKV projection  (one (D, 3D) matmul), bf16 output
# ----------------------------------------------------------------------------
def ln_matmul_kernel(x_ref, g_ref, b_ref, w_ref, bias_ref, o_ref):
    xn = _layer_norm(x_ref[...], g_ref[...], b_ref[...])
    y = jnp.dot(xn.astype(BF16), w_ref[...], preferred_element_type=F32) + bias_ref[...]
    o_ref[...] = y.astype(o_ref.dtype)


def ln_matmul(x2d, g, b, w, bias):
    M, D = x2d.shape
    Dout = w.shape[1]
    tm, gm = _row_tile(M)
    return pl.pallas_call(
        ln_matmul_kernel,
        out_shape=jax.ShapeDtypeStruct((M, Dout), BF16),
        grid=(gm,),
        in_specs=[
            pl.BlockSpec((tm, D), lambda i: (i, 0)),
            pl.BlockSpec((1, D), lambda i: (0, 0)),
            pl.BlockSpec((1, D), lambda i: (0, 0)),
            pl.BlockSpec((D, Dout), lambda i: (0, 0)),
            pl.BlockSpec((1, Dout), lambda i: (0, 0)),
        ],
        out_specs=pl.BlockSpec((tm, Dout), lambda i: (i, 0)),
        compiler_params=_P1,
    )(x2d, g.reshape(1, D), b.reshape(1, D), w, bias.reshape(1, Dout))


# ----------------------------------------------------------------------------
# relative-position bias via the skew trick (plain-JAX glue; MXU einsum, no (T,T,dk) tensor)
#   bias[b,h,t,s] = q[b,h,t] . pe_k[(t - s) + maxlen]        (output streamed as bf16)
# TODO(synk): move the window matmul + skew fully inside attn_core_kernel.
# ----------------------------------------------------------------------------
def _rel_pos_bias(q_btd, pe_k, n_head, maxlen):
    B, T, D = q_btd.shape
    dk = D // n_head
    # TODO(synk): T > maxlen would additionally need edge-clamping of relative positions.
    assert T <= maxlen, "relative-position skew assumes T <= maxlen"
    q = q_btd.reshape(B, T, n_head, dk)
    win = pe_k[maxlen - (T - 1): maxlen + T]              # offsets -(T-1) .. (T-1)
    win = jnp.flip(win, axis=0).astype(BF16)              # offsets (T-1) .. -(T-1)
    r = jnp.einsum("bthd,jd->bhtj", q, win,
                   preferred_element_type=F32)            # (B, H, T, 2T-1)
    r = r.astype(BF16)
    # skew: out[..., t, s] = r[..., t, s - t + T - 1]
    r = jnp.pad(r, ((0, 0), (0, 0), (0, 0), (1, 0)))      # (B, H, T, 2T)
    r = r.reshape(B, n_head, 2 * T, T)[:, :, 1:, :]       # (B, H, 2T-1, T)
    r = r.reshape(B, n_head, T, 2 * T - 1)[..., :T]       # (B, H, T, T)
    return r


# ----------------------------------------------------------------------------
# kernel: attention core.  q/k/v are lane-dense (rows, D) bf16 slices of the fused QKV
# buffer; per-head scores/softmax/context with static lane slices; context written
# head-concatenated into a (tq, D) scratch so the output projection is one (tq,D)x(D,D)
# MXU matmul; residual folded into the epilogue.
#   scores = (q.k^T + rel_bias) / sqrt(dk)   (matches the PyTorch (A + B)/sqrt(d_k))
# TODO(synk): flash-style online-softmax KV tiling for very long T (v7x VMEM budget).
# ----------------------------------------------------------------------------
def attn_core_kernel(q_ref, k_ref, v_ref, bias_ref, x_ref, wo_ref, bo_ref, o_ref,
                     ctx_ref, *, n_head, sm_scale):
    q = q_ref[0]                       # (tq, D) bf16
    k = k_ref[0]                       # (T,  D) bf16
    v = v_ref[0]                       # (T,  D) bf16
    D = q.shape[-1]
    dk = D // n_head

    for h in range(n_head):
        qh = q[:, h * dk:(h + 1) * dk]
        kh = k[:, h * dk:(h + 1) * dk]
        vh = v[:, h * dk:(h + 1) * dk]
        s = lax.dot_general(qh, kh, (((1,), (1,)), ((), ())),
                            preferred_element_type=F32)          # (tq, T)
        s = (s + bias_ref[0, h].astype(F32)) * sm_scale
        s = s - jnp.max(s, axis=-1, keepdims=True)
        e = jnp.exp(s)
        p = e / jnp.sum(e, axis=-1, keepdims=True)               # exact reciprocal
        ctx_ref[:, h * dk:(h + 1) * dk] = jnp.dot(
            p.astype(BF16), vh, preferred_element_type=F32)      # (tq, dk)

    proj = jnp.dot(ctx_ref[...].astype(BF16), wo_ref[...],
                   preferred_element_type=F32)                   # (tq, D)
    o_ref[0] = x_ref[0] + proj + bo_ref[...]


def attention(x, pe_k, p, n_head, maxlen):
    B, T, D = x.shape
    M = B * T
    dk = D // n_head
    # Lane-dense column slicing of the (B, T, 3D) QKV buffer needs D % 128 == 0
    # (true for the reference config D=256).  TODO(synk): fallback path for small D.
    assert D % 128 == 0, "attention expects attention_dim to be a multiple of 128"

    # fused LN + (D, 3D) QKV projection, bf16 output; no reshape/transpose of QKV in XLA
    qkv = ln_matmul(x.reshape(M, D), p["ln_g"], p["ln_b"], p["wqkv"], p["bqkv"])
    qkv = qkv.reshape(B, T, 3 * D)

    bias = _rel_pos_bias(qkv[:, :, :D], pe_k, n_head, maxlen)    # (B, H, T, T) bf16

    tq = T if T <= 128 else 128
    nq = pl.cdiv(T, tq)

    return pl.pallas_call(
        partial(attn_core_kernel, n_head=n_head, sm_scale=1.0 / math.sqrt(dk)),
        out_shape=jax.ShapeDtypeStruct((B, T, D), F32),
        grid=(B, nq),
        in_specs=[
            pl.BlockSpec((1, tq, D), lambda b, qi: (b, qi, 0)),       # q columns
            pl.BlockSpec((1, T, D), lambda b, qi: (b, 0, 1)),         # k columns
            pl.BlockSpec((1, T, D), lambda b, qi: (b, 0, 2)),         # v columns
            pl.BlockSpec((1, n_head, tq, T), lambda b, qi: (b, 0, qi, 0)),
            pl.BlockSpec((1, tq, D), lambda b, qi: (b, qi, 0)),       # residual
            pl.BlockSpec((D, D), lambda b, qi: (0, 0)),
            pl.BlockSpec((1, D), lambda b, qi: (0, 0)),
        ],
        out_specs=pl.BlockSpec((1, tq, D), lambda b, qi: (b, qi, 0)),
        scratch_shapes=[pltpu.VMEM((tq, D), F32)],
        compiler_params=_P2,
    )(qkv, qkv, qkv, bias, x, p["wo"], p["bo"].reshape(1, D))


# ----------------------------------------------------------------------------
# kernel: fused Conformer ConvModule + residual
#   LN -> pw_conv_1 (Conv2d 1->2, 1x1 == two per-tensor scalars) + GLU
#   -> depthwise Conv1d over time (8-sublane-aligned padded VMEM scratch, K static slices,
#      only the 2*P halo rows are zeroed per step)
#   -> BatchNorm1d (eval, folded running stats) -> ReLU
#   -> pw_conv_2 (Conv2d 1->1, 1x1 == per-tensor scalar) ; out = x + conv(x)
#   scal (SMEM, f32[6]) = [pw1_w0, pw1_w1, pw1_b0, pw1_b1, pw2_w, pw2_b]
#   dw_w[j, d] corresponds to torch Conv1d weight[d, 0, j] (groups=D depthwise)
# TODO(synk): time-tiling with a (K-1) halo for very long sequences / small batch.
# ----------------------------------------------------------------------------
def conv_kernel(x_ref, lng_ref, lnb_ref, dww_ref, dwb_ref, bns_ref, bnsh_ref,
                scal_ref, o_ref, pad_ref, *, K, P, pad_top):
    x = x_ref[0]                                       # (T, D) f32
    T, D = x.shape
    w0 = scal_ref[0]
    w1 = scal_ref[1]
    b0 = scal_ref[2]
    b1 = scal_ref[3]
    pw2w = scal_ref[4]
    pw2b = scal_ref[5]

    xn = _layer_norm(x, lng_ref[...], lnb_ref[...])
    g = (xn * w0 + b0) * jax.nn.sigmoid(xn * w1 + b1)  # pw_conv_1 + GLU

    # zero only the halo rows (megacore-safe: done every step); aligned data store
    if P > 0:
        pad_ref[pad_top - P:pad_top, :] = jnp.zeros((P, D), F32)
        pad_ref[pad_top + T:pad_top + T + P, :] = jnp.zeros((P, D), F32)
    pad_ref[pad_top:pad_top + T, :] = g

    dw = dww_ref[...]                                  # (K, D)
    acc = jnp.zeros((T, D), F32)
    for j in range(K):                                 # static tap starts
        s0 = pad_top - P + j
        acc = acc + pad_ref[s0:s0 + T, :] * dw[j:j + 1, :]
    acc = acc + dwb_ref[...]

    y = acc * bns_ref[...] + bnsh_ref[...]             # BatchNorm1d (eval, folded)
    y = jnp.maximum(y, 0.0)
    o_ref[0] = x + (y * pw2w + pw2b)                   # pw_conv_2 + residual


def conv_module(x, p, kernel_size):
    B, T, D = x.shape
    K = kernel_size
    P = (K - 1) // 2
    pad_top = _round_up(P, 8)
    rows = _round_up(pad_top + T + P, 8)
    return pl.pallas_call(
        partial(conv_kernel, K=K, P=P, pad_top=pad_top),
        out_shape=jax.ShapeDtypeStruct((B, T, D), F32),
        grid=(B,),
        in_specs=[
            pl.BlockSpec((1, T, D), lambda b: (b, 0, 0)),
            pl.BlockSpec((1, D), lambda b: (0, 0)),
            pl.BlockSpec((1, D), lambda b: (0, 0)),
            pl.BlockSpec((K, D), lambda b: (0, 0)),
            pl.BlockSpec((1, D), lambda b: (0, 0)),
            pl.BlockSpec((1, D), lambda b: (0, 0)),
            pl.BlockSpec((1, D), lambda b: (0, 0)),
            pl.BlockSpec(memory_space=pltpu.MemorySpace.SMEM),
        ],
        out_specs=pl.BlockSpec((1, T, D), lambda b: (b, 0, 0)),
        scratch_shapes=[pltpu.VMEM((rows, D), F32)],
        compiler_params=_P1,
    )(x, p["ln_g"].reshape(1, D), p["ln_b"].reshape(1, D),
      p["dw_w"], p["dw_b"].reshape(1, D),
      p["bn_scale"].reshape(1, D), p["bn_shift"].reshape(1, D),
      p["scal"])


# ----------------------------------------------------------------------------
# Conformer encoder layer / full model (reshape glue in plain JAX)
# ----------------------------------------------------------------------------
def encoder_layer(x, pe_k, p, n_head, kernel_size, maxlen):
    x = feed_forward(x, p["ff_in"], scale=0.5)                     # x + 0.5 * FFN(x)
    x = attention(x, pe_k, p["attn"], n_head, maxlen)              # x + MHA(x)
    x = conv_module(x, p["conv"], kernel_size)                     # x + Conv(x)
    x = feed_forward(x, p["ff_out"], final_ln_g=p["ln_g"],         # LN(x + 0.5 * FFN(x))
                     final_ln_b=p["ln_b"], scale=0.5)
    return x


def conformer_css_forward(f, params, cfg):
    # f: (N, in_features, T)  ->  masks: tuple of (N, num_bins, T)
    N, Fin, T = f.shape
    D = cfg["attention_dim"]

    x2 = jnp.transpose(f, (0, 2, 1)).reshape(N * T, Fin)
    x2 = embed(x2, params["input_bias"], params["input_scale"],
               params["embed_w"], params["embed_b"],
               params["embed_ln_g"], params["embed_ln_b"])
    x = x2.reshape(N, T, D)

    for lp in params["layers"]:
        x = encoder_layer(x, params["pe_k"], lp, cfg["attention_heads"],
                          cfg["kernel_size"], cfg["maxlen"])

    nb = cfg["num_bins"]
    ns = cfg["num_spks"] + cfg["num_nois"]
    # lane-dense (128-padded) head output; drop the padding columns in XLA
    m = linear(x.reshape(N * T, D), params["out_w"], params["out_b"], act="sigmoid")
    m = m[:, :nb * ns]
    m = m.reshape(N, T, nb * ns).transpose(0, 2, 1)                # (N, nb*ns, T)
    return tuple(m[:, i * nb:(i + 1) * nb, :] for i in range(ns))  # torch.chunk


# ----------------------------------------------------------------------------
# deterministic synthetic parameters (matches module shapes; eval-mode BN / dropout)
# matmul weights are created in bf16 ONCE here (no per-call casts inside jit)
# ----------------------------------------------------------------------------
def init_params(key, cfg):
    D = cfg["attention_dim"]
    Fin = cfg["in_features"]
    dff = cfg["linear_units"]
    K = cfg["kernel_size"]
    nb = cfg["num_bins"]
    ns = cfg["num_spks"] + cfg["num_nois"]
    H = cfg["attention_heads"]
    dk = D // H
    maxlen = cfg["maxlen"]

    keys = [key]

    def w(shape, scale=0.1, dtype=F32):
        keys[0], sub = jax.random.split(keys[0])
        return (scale * jax.random.normal(sub, shape, F32)).astype(dtype)

    def ff_params():
        return dict(ln_g=jnp.ones((D,)), ln_b=jnp.zeros((D,)),
                    w1=w((D, dff), dtype=BF16), b1=w((dff,)),
                    w2=w((dff, D), dtype=BF16), b2=w((D,)))

    def attn_params():
        return dict(ln_g=jnp.ones((D,)), ln_b=jnp.zeros((D,)),
                    wqkv=w((D, 3 * D), dtype=BF16), bqkv=w((3 * D,)),
                    wo=w((D, D), dtype=BF16), bo=w((D,)))

    def conv_params():
        eps = 1e-5
        bn_gamma = 1.0 + w((D,))
        bn_beta = w((D,))
        bn_mean = jnp.zeros((D,))          # running stats (eval mode)
        bn_var = jnp.ones((D,))
        scale = bn_gamma / jnp.sqrt(bn_var + eps)
        shift = bn_beta - bn_mean * scale
        # [pw1_w0, pw1_w1, pw1_b0, pw1_b1, pw2_w, pw2_b]
        scal = jnp.array([1.0, 1.0, 0.0, 0.0, 1.0, 0.0], F32) + w((6,))
        return dict(ln_g=jnp.ones((D,)), ln_b=jnp.zeros((D,)), scal=scal,
                    dw_w=w((K, D)), dw_b=w((D,)), bn_scale=scale, bn_shift=shift)

    layers = [dict(ff_in=ff_params(), attn=attn_params(), conv=conv_params(),
                   ff_out=ff_params(), ln_g=jnp.ones((D,)), ln_b=jnp.zeros((D,)))
              for _ in range(cfg["num_blocks"])]

    # mask head, zero-padded to a lane-dense (multiple of 128) output width
    nsd = nb * ns
    dpad = _round_up(nsd, 128)
    out_w = jnp.zeros((D, dpad), F32).at[:, :nsd].set(w((D, nsd))).astype(BF16)
    out_b = jnp.zeros((dpad,), F32).at[:nsd].set(w((nsd,)))

    return dict(
        input_bias=jnp.zeros((1, 1, Fin)),
        input_scale=jnp.ones((1, 1, Fin)),
        embed_w=w((Fin, D), dtype=BF16), embed_b=w((D,)),
        embed_ln_g=jnp.ones((D,)), embed_ln_b=jnp.zeros((D,)),
        pe_k=w((2 * maxlen, dk)),
        layers=layers,
        out_w=out_w, out_b=out_b,
    )


# ----------------------------------------------------------------------------
if __name__ == "__main__":
    cfg = dict(in_features=80, num_bins=24, num_spks=2, num_nois=1,
               attention_dim=128, attention_heads=4, linear_units=256,
               num_blocks=2, kernel_size=5, maxlen=1000)
    key = jax.random.PRNGKey(0)
    pkey, dkey = jax.random.split(key)
    params = init_params(pkey, cfg)

    N, T = 2, 16
    f = jax.random.normal(dkey, (N, cfg["in_features"], T), F32)   # N x F x T

    fwd = jax.jit(partial(conformer_css_forward, cfg=cfg))
    masks = jax.block_until_ready(fwd(f, params))

    assert len(masks) == cfg["num_spks"] + cfg["num_nois"]
    for m in masks:
        assert m.shape == (N, cfg["num_bins"], T)
        assert bool(jnp.all(jnp.isfinite(m)))
    print("KERNEL_OK")
</pallas_src>

<mosaic_0001>
module attributes {stable_mosaic.version = 11 : i64} {
  func.func @embed_kernel(%arg0: i32, %arg1: memref<32x80xf32, #tpu.memory_space<vmem>>, %arg2: memref<1x80xf32, #tpu.memory_space<vmem>>, %arg3: memref<1x80xf32, #tpu.memory_space<vmem>>, %arg4: memref<80x128xbf16, #tpu.memory_space<vmem>>, %arg5: memref<1x128xf32, #tpu.memory_space<vmem>>, %arg6: memref<1x128xf32, #tpu.memory_space<vmem>>, %arg7: memref<1x128xf32, #tpu.memory_space<vmem>>, %arg8: memref<32x128xf32, #tpu.memory_space<vmem>>) attributes {dimension_semantics = [#tpu.dimension_semantics<parallel>], iteration_bounds = array<i64: 1>, scalar_prefetch = 0 : i64, scratch_operands = 0 : i64, tpu.core_type = #tpu.core_type<tc>, window_params = [{transform_indices = @transform_0, window_bounds = array<i64: 32, 80>}, {pipeline_mode = #tpu.pipeline_mode<synchronous>, transform_indices = @transform_1, window_bounds = array<i64: 1, 80>}, {pipeline_mode = #tpu.pipeline_mode<synchronous>, transform_indices = @transform_2, window_bounds = array<i64: 1, 80>}, {pipeline_mode = #tpu.pipeline_mode<synchronous>, transform_indices = @transform_3, window_bounds = array<i64: 80, 128>}, {pipeline_mode = #tpu.pipeline_mode<synchronous>, transform_indices = @transform_4, window_bounds = array<i64: 1, 128>}, {pipeline_mode = #tpu.pipeline_mode<synchronous>, transform_indices = @transform_5, window_bounds = array<i64: 1, 128>}, {pipeline_mode = #tpu.pipeline_mode<synchronous>, transform_indices = @transform_6, window_bounds = array<i64: 1, 128>}, {transform_indices = @transform_7, window_bounds = array<i64: 32, 128>}]} {
    %c0 = arith.constant 0 : index
    %c0_0 = arith.constant 0 : index
    %0 = vector.load %arg1[%c0, %c0_0] : memref<32x80xf32, #tpu.memory_space<vmem>>, vector<32x80xf32>
    %c0_1 = arith.constant 0 : index
    %c0_2 = arith.constant 0 : index
    %1 = vector.load %arg2[%c0_1, %c0_2] : memref<1x80xf32, #tpu.memory_space<vmem>>, vector<1x80xf32>
    %2 = vector.broadcast %1 : vector<1x80xf32> to vector<32x80xf32>
    %3 = arith.addf %0, %2 : vector<32x80xf32>
    %c0_3 = arith.constant 0 : index
    %c0_4 = arith.constant 0 : index
    %4 = vector.load %arg3[%c0_3, %c0_4] : memref<1x80xf32, #tpu.memory_space<vmem>>, vector<1x80xf32>
    %5 = vector.broadcast %4 : vector<1x80xf32> to vector<32x80xf32>
    %6 = arith.mulf %3, %5 : vector<32x80xf32>
    %7 = arith.truncf %6 : vector<32x80xf32> to vector<32x80xbf16>
    %c0_5 = arith.constant 0 : index
    %c0_6 = arith.constant 0 : index
    %8 = vector.load %arg4[%c0_5, %c0_6] : memref<80x128xbf16, #tpu.memory_space<vmem>>, vector<80x128xbf16>
    %cst = arith.constant dense<0.000000e+00> : vector<32x128xf32>
    %9 = tpu.matmul %7, %8, %cst {dimension_numbers = #tpu.dot_dimension_numbers<[1], [0], [0], [1], [0, 0, 1, 1], [], []>} : vector<32x80xbf16>, vector<80x128xbf16>, vector<32x128xf32> -> vector<32x128xf32>
    %c0_7 = arith.constant 0 : index
    %c0_8 = arith.constant 0 : index
    %10 = vector.load %arg5[%c0_7, %c0_8] : memref<1x128xf32, #tpu.memory_space<vmem>>, vector<1x128xf32>
    %11 = vector.broadcast %10 : vector<1x128xf32> to vector<32x128xf32>
    %12 = arith.addf %9, %11 : vector<32x128xf32>
    %c0_9 = arith.constant 0 : index
    %c0_10 = arith.constant 0 : index
    %13 = vector.load %arg6[%c0_9, %c0_10] : memref<1x128xf32, #tpu.memory_space<vmem>>, vector<1x128xf32>
    %c0_11 = arith.constant 0 : index
    %c0_12 = arith.constant 0 : index
    %14 = vector.load %arg7[%c0_11, %c0_12] : memref<1x128xf32, #tpu.memory_space<vmem>>, vector<1x128xf32>
    %cst_13 = arith.constant dense<0.000000e+00> : vector<32xf32>
    %15 = vector.multi_reduction <add>, %12, %cst_13 [1] : vector<32x128xf32> to vector<32xf32>
    %16 = vector.shape_cast %15 : vector<32xf32> to vector<32x1xf32>
    %cst_14 = arith.constant 1.280000e+02 : f32
    %17 = vector.broadcast %cst_14 : f32 to vector<32x1xf32>
    %18 = arith.divf %16, %17 : vector<32x1xf32>
    %19 = vector.broadcast %18 : vector<32x1xf32> to vector<32x128xf32>
    %20 = arith.subf %12, %19 : vector<32x128xf32>
    %21 = arith.mulf %20, %20 : vector<32x128xf32>
    %cst_15 = arith.constant dense<0.000000e+00> : vector<32xf32>
    %22 = vector.multi_reduction <add>, %21, %cst_15 [1] : vector<32x128xf32> to vector<32xf32>
    %23 = vector.shape_cast %22 : vector<32xf32> to vector<32x1xf32>
    %cst_16 = arith.constant 1.280000e+02 : f32
    %24 = vector.broadcast %cst_16 : f32 to vector<32x1xf32>
    %25 = arith.divf %23, %24 : vector<32x1xf32>
    %26 = vector.broadcast %18 : vector<32x1xf32> to vector<32x128xf32>
    %27 = arith.subf %12, %26 : vector<32x128xf32>
    %cst_17 = arith.constant 9.99999974E-6 : f32
    %28 = vector.broadcast %cst_17 : f32 to vector<32x1xf32>
    %29 = arith.addf %25, %28 : vector<32x1xf32>
    %30 = math.rsqrt %29 : vector<32x1xf32>
    %31 = vector.broadcast %30 : vector<32x1xf32> to vector<32x128xf32>
    %32 = arith.mulf %27, %31 : vector<32x128xf32>
    %33 = vector.broadcast %13 : vector<1x128xf32> to vector<32x128xf32>
    %34 = arith.mulf %32, %33 : vector<32x128xf32>
    %35 = vector.broadcast %14 : vector<1x128xf32> to vector<32x128xf32>
    %36 = arith.addf %34, %35 : vector<32x128xf32>
    %cst_18 = arith.constant 0.000000e+00 : f32
    %37 = vector.broadcast %cst_18 : f32 to vector<32x128xf32>
    %38 = arith.maximumf %36, %37 : vector<32x128xf32>
    %c0_19 = arith.constant 0 : index
    %c0_20 = arith.constant 0 : index
    %39 = vector.load %arg8[%c0_19, %c0_20] : memref<32x128xf32, #tpu.memory_space<vmem>>, vector<32x128xf32>
    tpu.vector_store %arg8[%c0_19, %c0_20], %38 {strides = array<i32>} : memref<32x128xf32, #tpu.memory_space<vmem>>, vector<32x128xf32>,
    return
  }
  func.func @transform_0(%arg0: i32) -> (i32, i32) {
    %c0_i32 = arith.constant 0 : i32
    %c0_i32_0 = arith.constant 0 : i32
    return %arg0, %c0_i32 : i32, i32
  }
  func.func @transform_1(%arg0: i32) -> (i32, i32) {
    %c0_i32 = arith.constant 0 : i32
    %c0_i32_0 = arith.constant 0 : i32
    %c0_i32_1 = arith.constant 0 : i32
    return %c0_i32, %c0_i32_0 : i32, i32
  }
  func.func @transform_2(%arg0: i32) -> (i32, i32) {
    %c0_i32 = arith.constant 0 : i32
    %c0_i32_0 = arith.constant 0 : i32
    %c0_i32_1 = arith.constant 0 : i32
    return %c0_i32, %c0_i32_0 : i32, i32
  }
  func.func @transform_3(%arg0: i32) -> (i32, i32) {
    %c0_i32 = arith.constant 0 : i32
    %c0_i32_0 = arith.constant 0 : i32
    %c0_i32_1 = arith.constant 0 : i32
    return %c0_i32, %c0_i32_0 : i32, i32
  }
  func.func @transform_4(%arg0: i32) -> (i32, i32) {
    %c0_i32 = arith.constant 0 : i32
    %c0_i32_0 = arith.constant 0 : i32
    %c0_i32_1 = arith.constant 0 : i32
    return %c0_i32, %c0_i32_0 : i32, i32
  }
  func.func @transform_5(%arg0: i32) -> (i32, i32) {
    %c0_i32 = arith.constant 0 : i32
    %c0_i32_0 = arith.constant 0 : i32
    %c0_i32_1 = arith.constant 0 : i32
    return %c0_i32, %c0_i32_0 : i32, i32
  }
  func.func @transform_6(%arg0: i32) -> (i32, i32) {
    %c0_i32 = arith.constant 0 : i32
    %c0_i32_0 = arith.constant 0 : i32
    %c0_i32_1 = arith.constant 0 : i32
    return %c0_i32, %c0_i32_0 : i32, i32
  }
  func.func @transform_7(%arg0: i32) -> (i32, i32) {
    %c0_i32 = arith.constant 0 : i32
    %c0_i32_0 = arith.constant 0 : i32
    return %arg0, %c0_i32 : i32, i32
  }
}

module attributes {stable_mosaic.version = 11 : i64} {
  func.func @ffn_kernel(%arg0: i32, %arg1: memref<32x128xf32, #tpu.memory_space<vmem>>, %arg2: memref<1x128xf32, #tpu.memory_space<vmem>>, %arg3: memref<1x128xf32, #tpu.memory_space<vmem>>, %arg4: memref<128x256xbf16, #tpu.memory_space<vmem>>, %arg5: memref<1x256xf32, #tpu.memory_space<vmem>>, %arg6: memref<256x128xbf16, #tpu.memory_space<vmem>>, %arg7: memref<1x128xf32, #tpu.memory_space<vmem>>, %arg8: memref<1x128xf32, #tpu.memory_space<vmem>>, %arg9: memref<1x128xf32, #tpu.memory_space<vmem>>, %arg10: memref<32x128xf32, #tpu.memory_space<vmem>>) attributes {dimension_semantics = [#tpu.dimension_semantics<parallel>], iteration_bounds = array<i64: 1>, scalar_prefetch = 0 : i64, scratch_operands = 0 : i64, tpu.core_type = #tpu.core_type<tc>, window_params = [{transform_indices = @transform_0, window_bounds = array<i64: 32, 128>}, {pipeline_mode = #tpu.pipeline_mode<synchronous>, transform_indices = @transform_1, window_bounds = array<i64: 1, 128>}, {pipeline_mode = #tpu.pipeline_mode<synchronous>, transform_indices = @transform_2, window_bounds = array<i64: 1, 128>}, {pipeline_mode = #tpu.pipeline_mode<synchronous>, transform_indices = @transform_3, window_bounds = array<i64: 128, 256>}, {pipeline_mode = #tpu.pipeline_mode<synchronous>, transform_indices = @transform_4, window_bounds = array<i64: 1, 256>}, {pipeline_mode = #tpu.pipeline_mode<synchronous>, transform_indices = @transform_5, window_bounds = array<i64: 256, 128>}, {pipeline_mode = #tpu.pipeline_mode<synchronous>, transform_indices = @transform_6, window_bounds = array<i64: 1, 128>}, {pipeline_mode = #tpu.pipeline_mode<synchronous>, transform_indices = @transform_7, window_bounds = array<i64: 1, 128>}, {pipeline_mode = #tpu.pipeline_mode<synchronous>, transform_indices = @transform_8, window_bounds = array<i64: 1, 128>}, {transform_indices = @transform_9, window_bounds = array<i64: 32, 128>}]} {
    %c0 = arith.constant 0 : index
    %c0_0 = arith.constant 0 : index
    %0 = vector.load %arg1[%c0, %c0_0] : memref<32x128xf32, #tpu.memory_space<vmem>>, vector<32x128xf32>
    %c0_1 = arith.constant 0 : index
    %c0_2 = arith.constant 0 : index
    %1 = vector.load %arg2[%c0_1, %c0_2] : memref<1x128xf32, #tpu.memory_space<vmem>>, vector<1x128xf32>
    %c0_3 = arith.constant 0 : index
    %c0_4 = arith.constant 0 : index
    %2 = vector.load %arg3[%c0_3, %c0_4] : memref<1x128xf32, #tpu.memory_space<vmem>>, vector<1x128xf32>
    %cst = arith.constant dense<0.000000e+00> : vector<32xf32>
    %3 = vector.multi_reduction <add>, %0, %cst [1] : vector<32x128xf32> to vector<32xf32>
    %4 = vector.shape_cast %3 : vector<32xf32> to vector<32x1xf32>
    %cst_5 = arith.constant 1.280000e+02 : f32
    %5 = vector.broadcast %cst_5 : f32 to vector<32x1xf32>
    %6 = arith.divf %4, %5 : vector<32x1xf32>
    %7 = vector.broadcast %6 : vector<32x1xf32> to vector<32x128xf32>
    %8 = arith.subf %0, %7 : vector<32x128xf32>
    %9 = arith.mulf %8, %8 : vector<32x128xf32>
    %cst_6 = arith.constant dense<0.000000e+00> : vector<32xf32>
    %10 = vector.multi_reduction <add>, %9, %cst_6 [1] : vector<32x128xf32> to vector<32xf32>
    %11 = vector.shape_cast %10 : vector<32xf32> to vector<32x1xf32>
    %cst_7 = arith.constant 1.280000e+02 : f32
    %12 = vector.broadcast %cst_7 : f32 to vector<32x1xf32>
    %13 = arith.divf %11, %12 : vector<32x1xf32>
    %14 = vector.broadcast %6 : vector<32x1xf32> to vector<32x128xf32>
    %15 = arith.subf %0, %14 : vector<32x128xf32>
    %cst_8 = arith.constant 9.99999974E-6 : f32
    %16 = vector.broadcast %cst_8 : f32 to vector<32x1xf32>
    %17 = arith.addf %13, %16 : vector<32x1xf32>
    %18 = math.rsqrt %17 : vector<32x1xf32>
    %19 = vector.broadcast %18 : vector<32x1xf32> to vector<32x128xf32>
    %20 = arith.mulf %15, %19 : vector<32x128xf32>
    %21 = vector.broadcast %1 : vector<1x128xf32> to vector<32x128xf32>
    %22 = arith.mulf %20, %21 : vector<32x128xf32>
    %23 = vector.broadcast %2 : vector<1x128xf32> to vector<32x128xf32>
    %24 = arith.addf %22, %23 : vector<32x128xf32>
    %25 = arith.truncf %24 : vector<32x128xf32> to vector<32x128xbf16>
    %c0_9 = arith.constant 0 : index
    %c0_10 = arith.constant 0 : index
    %26 = vector.load %arg4[%c0_9, %c0_10] : memref<128x256xbf16, #tpu.memory_space<vmem>>, vector<128x256xbf16>
    %cst_11 = arith.constant dense<0.000000e+00> : vector<32x256xf32>
    %27 = tpu.matmul %25, %26, %cst_11 {dimension_numbers = #tpu.dot_dimension_numbers<[1], [0], [0], [1], [0, 0, 1, 1], [], []>} : vector<32x128xbf16>, vector<128x256xbf16>, vector<32x256xf32> -> vector<32x256xf32>
    %c0_12 = arith.constant 0 : index
    %c0_13 = arith.constant 0 : index
    %28 = vector.load %arg5[%c0_12, %c0_13] : memref<1x256xf32, #tpu.memory_space<vmem>>, vector<1x256xf32>
    %29 = vector.broadcast %28 : vector<1x256xf32> to vector<32x256xf32>
    %30 = arith.addf %27, %29 : vector<32x256xf32>
    %cst_14 = arith.constant 0.000000e+00 : f32
    %31 = vector.broadcast %cst_14 : f32 to vector<32x256xf32>
    %32 = arith.maximumf %30, %31 : vector<32x256xf32>
    %33 = arith.truncf %32 : vector<32x256xf32> to vector<32x256xbf16>
    %c0_15 = arith.constant 0 : index
    %c0_16 = arith.constant 0 : index
    %34 = vector.load %arg6[%c0_15, %c0_16] : memref<256x128xbf16, #tpu.memory_space<vmem>>, vector<256x128xbf16>
    %cst_17 = arith.constant dense<0.000000e+00> : vector<32x128xf32>
    %35 = tpu.matmul %33, %34, %cst_17 {dimension_numbers = #tpu.dot_dimension_numbers<[1], [0], [0], [1], [0, 0, 1, 1], [], []>} : vector<32x256xbf16>, vector<256x128xbf16>, vector<32x128xf32> -> vector<32x128xf32>
    %c0_18 = arith.constant 0 : index
    %c0_19 = arith.constant 0 : index
    %36 = vector.load %arg7[%c0_18, %c0_19] : memref<1x128xf32, #tpu.memory_space<vmem>>, vector<1x128xf32>
    %37 = vector.broadcast %36 : vector<1x128xf32> to vector<32x128xf32>
    %38 = arith.addf %35, %37 : vector<32x128xf32>
    %cst_20 = arith.constant 5.000000e-01 : f32
    %39 = vector.broadcast %cst_20 : f32 to vector<32x128xf32>
    %40 = arith.mulf %39, %38 : vector<32x128xf32>
    %41 = arith.addf %0, %40 : vector<32x128xf32>
    %c0_21 = arith.constant 0 : index
    %c0_22 = arith.constant 0 : index
    %42 = vector.load %arg10[%c0_21, %c0_22] : memref<32x128xf32, #tpu.memory_space<vmem>>, vector<32x128xf32>
    tpu.vector_store %arg10[%c0_21, %c0_22], %41 {strides = array<i32>} : memref<32x128xf32, #tpu.memory_space<vmem>>, vector<32x128xf32>,
    return
  }
  func.func @transform_0(%arg0: i32) -> (i32, i32) {
    %c0_i32 = arith.constant 0 : i32
    %c0_i32_0 = arith.constant 0 : i32
    return %arg0, %c0_i32 : i32, i32
  }
  func.func @transform_1(%arg0: i32) -> (i32, i32) {
    %c0_i32 = arith.constant 0 : i32
    %c0_i32_0 = arith.constant 0 : i32
    %c0_i32_1 = arith.constant 0 : i32
    return %c0_i32, %c0_i32_0 : i32, i32
  }
  func.func @transform_2(%arg0: i32) -> (i32, i32) {
    %c0_i32 = arith.constant 0 : i32
    %c0_i32_0 = arith.constant 0 : i32
    %c0_i32_1 = arith.constant 0 : i32
    return %c0_i32, %c0_i32_0 : i32, i32
  }
  func.func @transform_3(%arg0: i32) -> (i32, i32) {
    %c0_i32 = arith.constant 0 : i32
    %c0_i32_0 = arith.constant 0 : i32
    %c0_i32_1 = arith.constant 0 : i32
    return %c0_i32, %c0_i32_0 : i32, i32
  }
  func.func @transform_4(%arg0: i32) -> (i32, i32) {
    %c0_i32 = arith.constant 0 : i32
    %c0_i32_0 = arith.constant 0 : i32
    %c0_i32_1 = arith.constant 0 : i32
    return %c0_i32, %c0_i32_0 : i32, i32
  }
  func.func @transform_5(%arg0: i32) -> (i32, i32) {
    %c0_i32 = arith.constant 0 : i32
    %c0_i32_0 = arith.constant 0 : i32
    %c0_i32_1 = arith.constant 0 : i32
    return %c0_i32, %c0_i32_0 : i32, i32
  }
  func.func @transform_6(%arg0: i32) -> (i32, i32) {
    %c0_i32 = arith.constant 0 : i32
    %c0_i32_0 = arith.constant 0 : i32
    %c0_i32_1 = arith.constant 0 : i32
    return %c0_i32, %c0_i32_0 : i32, i32
  }
  func.func @transform_7(%arg0: i32) -> (i32, i32) {
    %c0_i32 = arith.constant 0 : i32
    %c0_i32_0 = arith.constant 0 : i32
    %c0_i32_1 = arith.constant 0 : i32
    return %c0_i32, %c0_i32_0 : i32, i32
  }
  func.func @transform_8(%arg0: i32) -> (i32, i32) {
    %c0_i32 = arith.constant 0 : i32
    %c0_i32_0 = arith.constant 0 : i32
    %c0_i32_1 = arith.constant 0 : i32
    return %c0_i32, %c0_i32_0 : i32, i32
  }
  func.func @transform_9(%arg0: i32) -> (i32, i32) {
    %c0_i32 = arith.constant 0 : i32
    %c0_i32_0 = arith.constant 0 : i32
    return %arg0, %c0_i32 : i32, i32
  }
}

module attributes {stable_mosaic.version = 11 : i64} {
  func.func @ln_matmul_kernel(%arg0: i32, %arg1: memref<32x128xf32, #tpu.memory_space<vmem>>, %arg2: memref<1x128xf32, #tpu.memory_space<vmem>>, %arg3: memref<1x128xf32, #tpu.memory_space<vmem>>, %arg4: memref<128x384xbf16, #tpu.memory_space<vmem>>, %arg5: memref<1x384xf32, #tpu.memory_space<vmem>>, %arg6: memref<32x384xbf16, #tpu.memory_space<vmem>>) attributes {dimension_semantics = [#tpu.dimension_semantics<parallel>], iteration_bounds = array<i64: 1>, scalar_prefetch = 0 : i64, scratch_operands = 0 : i64, tpu.core_type = #tpu.core_type<tc>, window_params = [{transform_indices = @transform_0, window_bounds = array<i64: 32, 128>}, {pipeline_mode = #tpu.pipeline_mode<synchronous>, transform_indices = @transform_1, window_bounds = array<i64: 1, 128>}, {pipeline_mode = #tpu.pipeline_mode<synchronous>, transform_indices = @transform_2, window_bounds = array<i64: 1, 128>}, {pipeline_mode = #tpu.pipeline_mode<synchronous>, transform_indices = @transform_3, window_bounds = array<i64: 128, 384>}, {pipeline_mode = #tpu.pipeline_mode<synchronous>, transform_indices = @transform_4, window_bounds = array<i64: 1, 384>}, {transform_indices = @transform_5, window_bounds = array<i64: 32, 384>}]} {
    %c0 = arith.constant 0 : index
    %c0_0 = arith.constant 0 : index
    %0 = vector.load %arg1[%c0, %c0_0] : memref<32x128xf32, #tpu.memory_space<vmem>>, vector<32x128xf32>
    %c0_1 = arith.constant 0 : index
    %c0_2 = arith.constant 0 : index
    %1 = vector.load %arg2[%c0_1, %c0_2] : memref<1x128xf32, #tpu.memory_space<vmem>>, vector<1x128xf32>
    %c0_3 = arith.constant 0 : index
    %c0_4 = arith.constant 0 : index
    %2 = vector.load %arg3[%c0_3, %c0_4] : memref<1x128xf32, #tpu.memory_space<vmem>>, vector<1x128xf32>
    %cst = arith.constant dense<0.000000e+00> : vector<32xf32>
    %3 = vector.multi_reduction <add>, %0, %cst [1] : vector<32x128xf32> to vector<32xf32>
    %4 = vector.shape_cast %3 : vector<32xf32> to vector<32x1xf32>
    %cst_5 = arith.constant 1.280000e+02 : f32
    %5 = vector.broadcast %cst_5 : f32 to vector<32x1xf32>
    %6 = arith.divf %4, %5 : vector<32x1xf32>
    %7 = vector.broadcast %6 : vector<32x1xf32> to vector<32x128xf32>
    %8 = arith.subf %0, %7 : vector<32x128xf32>
    %9 = arith.mulf %8, %8 : vector<32x128xf32>
    %cst_6 = arith.constant dense<0.000000e+00> : vector<32xf32>
    %10 = vector.multi_reduction <add>, %9, %cst_6 [1] : vector<32x128xf32> to vector<32xf32>
    %11 = vector.shape_cast %10 : vector<32xf32> to vector<32x1xf32>
    %cst_7 = arith.constant 1.280000e+02 : f32
    %12 = vector.broadcast %cst_7 : f32 to vector<32x1xf32>
    %13 = arith.divf %11, %12 : vector<32x1xf32>
    %14 = vector.broadcast %6 : vector<32x1xf32> to vector<32x128xf32>
    %15 = arith.subf %0, %14 : vector<32x128xf32>
    %cst_8 = arith.constant 9.99999974E-6 : f32
    %16 = vector.broadcast %cst_8 : f32 to vector<32x1xf32>
    %17 = arith.addf %13, %16 : vector<32x1xf32>
    %18 = math.rsqrt %17 : vector<32x1xf32>
    %19 = vector.broadcast %18 : vector<32x1xf32> to vector<32x128xf32>
    %20 = arith.mulf %15, %19 : vector<32x128xf32>
    %21 = vector.broadcast %1 : vector<1x128xf32> to vector<32x128xf32>
    %22 = arith.mulf %20, %21 : vector<32x128xf32>
    %23 = vector.broadcast %2 : vector<1x128xf32> to vector<32x128xf32>
    %24 = arith.addf %22, %23 : vector<32x128xf32>
    %25 = arith.truncf %24 : vector<32x128xf32> to vector<32x128xbf16>
    %c0_9 = arith.constant 0 : index
    %c0_10 = arith.constant 0 : index
    %26 = vector.load %arg4[%c0_9, %c0_10] : memref<128x384xbf16, #tpu.memory_space<vmem>>, vector<128x384xbf16>
    %cst_11 = arith.constant dense<0.000000e+00> : vector<32x384xf32>
    %27 = tpu.matmul %25, %26, %cst_11 {dimension_numbers = #tpu.dot_dimension_numbers<[1], [0], [0], [1], [0, 0, 1, 1], [], []>} : vector<32x128xbf16>, vector<128x384xbf16>, vector<32x384xf32> -> vector<32x384xf32>
    %c0_12 = arith.constant 0 : index
    %c0_13 = arith.constant 0 : index
    %28 = vector.load %arg5[%c0_12, %c0_13] : memref<1x384xf32, #tpu.memory_space<vmem>>, vector<1x384xf32>
    %29 = vector.broadcast %28 : vector<1x384xf32> to vector<32x384xf32>
    %30 = arith.addf %27, %29 : vector<32x384xf32>
    %31 = arith.truncf %30 : vector<32x384xf32> to vector<32x384xbf16>
    %c0_14 = arith.constant 0 : index
    %c0_15 = arith.constant 0 : index
    %32 = vector.load %arg6[%c0_14, %c0_15] : memref<32x384xbf16, #tpu.memory_space<vmem>>, vector<32x384xbf16>
    tpu.vector_store %arg6[%c0_14, %c0_15], %31 {strides = array<i32>} : memref<32x384xbf16, #tpu.memory_space<vmem>>, vector<32x384xbf16>,
    return
  }
  func.func @transform_0(%arg0: i32) -> (i32, i32) {
    %c0_i32 = arith.constant 0 : i32
    %c0_i32_0 = arith.constant 0 : i32
    return %arg0, %c0_i32 : i32, i32
  }
  func.func @transform_1(%arg0: i32) -> (i32, i32) {
    %c0_i32 = arith.constant 0 : i32
    %c0_i32_0 = arith.constant 0 : i32
    %c0_i32_1 = arith.constant 0 : i32
    return %c0_i32, %c0_i32_0 : i32, i32
  }
  func.func @transform_2(%arg0: i32) -> (i32, i32) {
    %c0_i32 = arith.constant 0 : i32
    %c0_i32_0 = arith.constant 0 : i32
    %c0_i32_1 = arith.constant 0 : i32
    return %c0_i32, %c0_i32_0 : i32, i32
  }
  func.func @transform_3(%arg0: i32) -> (i32, i32) {
    %c0_i32 = arith.constant 0 : i32
    %c0_i32_0 = arith.constant 0 : i32
    %c0_i32_1 = arith.constant 0 : i32
    return %c0_i32, %c0_i32_0 : i32, i32
  }
  func.func @transform_4(%arg0: i32) -> (i32, i32) {
    %c0_i32 = arith.constant 0 : i32
    %c0_i32_0 = arith.constant 0 : i32
    %c0_i32_1 = arith.constant 0 : i32
    return %c0_i32, %c0_i32_0 : i32, i32
  }
  func.func @transform_5(%arg0: i32) -> (i32, i32) {
    %c0_i32 = arith.constant 0 : i32
    %c0_i32_0 = arith.constant 0 : i32
    return %arg0, %c0_i32 : i32, i32
  }
}

module attributes {stable_mosaic.version = 11 : i64} {
  func.func @ffn_kernel(%arg0: i32, %arg1: memref<32x128xf32, #tpu.memory_space<vmem>>, %arg2: memref<1x128xf32, #tpu.memory_space<vmem>>, %arg3: memref<1x128xf32, #tpu.memory_space<vmem>>, %arg4: memref<128x256xbf16, #tpu.memory_space<vmem>>, %arg5: memref<1x256xf32, #tpu.memory_space<vmem>>, %arg6: memref<256x128xbf16, #tpu.memory_space<vmem>>, %arg7: memref<1x128xf32, #tpu.memory_space<vmem>>, %arg8: memref<1x128xf32, #tpu.memory_space<vmem>>, %arg9: memref<1x128xf32, #tpu.memory_space<vmem>>, %arg10: memref<32x128xf32, #tpu.memory_space<vmem>>) attributes {dimension_semantics = [#tpu.dimension_semantics<parallel>], iteration_bounds = array<i64: 1>, scalar_prefetch = 0 : i64, scratch_operands = 0 : i64, tpu.core_type = #tpu.core_type<tc>, window_params = [{transform_indices = @transform_0, window_bounds = array<i64: 32, 128>}, {pipeline_mode = #tpu.pipeline_mode<synchronous>, transform_indices = @transform_1, window_bounds = array<i64: 1, 128>}, {pipeline_mode = #tpu.pipeline_mode<synchronous>, transform_indices = @transform_2, window_bounds = array<i64: 1, 128>}, {pipeline_mode = #tpu.pipeline_mode<synchronous>, transform_indices = @transform_3, window_bounds = array<i64: 128, 256>}, {pipeline_mode = #tpu.pipeline_mode<synchronous>, transform_indices = @transform_4, window_bounds = array<i64: 1, 256>}, {pipeline_mode = #tpu.pipeline_mode<synchronous>, transform_indices = @transform_5, window_bounds = array<i64: 256, 128>}, {pipeline_mode = #tpu.pipeline_mode<synchronous>, transform_indices = @transform_6, window_bounds = array<i64: 1, 128>}, {pipeline_mode = #tpu.pipeline_mode<synchronous>, transform_indices = @transform_7, window_bounds = array<i64: 1, 128>}, {pipeline_mode = #tpu.pipeline_mode<synchronous>, transform_indices = @transform_8, window_bounds = array<i64: 1, 128>}, {transform_indices = @transform_9, window_bounds = array<i64: 32, 128>}]} {
    %c0 = arith.constant 0 : index
    %c0_0 = arith.constant 0 : index
    %0 = vector.load %arg1[%c0, %c0_0] : memref<32x128xf32, #tpu.memory_space<vmem>>, vector<32x128xf32>
    %c0_1 = arith.constant 0 : index
    %c0_2 = arith.constant 0 : index
    %1 = vector.load %arg2[%c0_1, %c0_2] : memref<1x128xf32, #tpu.memory_space<vmem>>, vector<1x128xf32>
    %c0_3 = arith.constant 0 : index
    %c0_4 = arith.constant 0 : index
    %2 = vector.load %arg3[%c0_3, %c0_4] : memref<1x128xf32, #tpu.memory_space<vmem>>, vector<1x128xf32>
    %cst = arith.constant dense<0.000000e+00> : vector<32xf32>
    %3 = vector.multi_reduction <add>, %0, %cst [1] : vector<32x128xf32> to vector<32xf32>
    %4 = vector.shape_cast %3 : vector<32xf32> to vector<32x1xf32>
    %cst_5 = arith.constant 1.280000e+02 : f32
    %5 = vector.broadcast %cst_5 : f32 to vector<32x1xf32>
    %6 = arith.divf %4, %5 : vector<32x1xf32>
    %7 = vector.broadcast %6 : vector<32x1xf32> to vector<32x128xf32>
    %8 = arith.subf %0, %7 : vector<32x128xf32>
    %9 = arith.mulf %8, %8 : vector<32x128xf32>
    %cst_6 = arith.constant dense<0.000000e+00> : vector<32xf32>
    %10 = vector.multi_reduction <add>, %9, %cst_6 [1] : vector<32x128xf32> to vector<32xf32>
    %11 = vector.shape_cast %10 : vector<32xf32> to vector<32x1xf32>
    %cst_7 = arith.constant 1.280000e+02 : f32
    %12 = vector.broadcast %cst_7 : f32 to vector<32x1xf32>
    %13 = arith.divf %11, %12 : vector<32x1xf32>
    %14 = vector.broadcast %6 : vector<32x1xf32> to vector<32x128xf32>
    %15 = arith.subf %0, %14 : vector<32x128xf32>
    %cst_8 = arith.constant 9.99999974E-6 : f32
    %16 = vector.broadcast %cst_8 : f32 to vector<32x1xf32>
    %17 = arith.addf %13, %16 : vector<32x1xf32>
    %18 = math.rsqrt %17 : vector<32x1xf32>
    %19 = vector.broadcast %18 : vector<32x1xf32> to vector<32x128xf32>
    %20 = arith.mulf %15, %19 : vector<32x128xf32>
    %21 = vector.broadcast %1 : vector<1x128xf32> to vector<32x128xf32>
    %22 = arith.mulf %20, %21 : vector<32x128xf32>
    %23 = vector.broadcast %2 : vector<1x128xf32> to vector<32x128xf32>
    %24 = arith.addf %22, %23 : vector<32x128xf32>
    %25 = arith.truncf %24 : vector<32x128xf32> to vector<32x128xbf16>
    %c0_9 = arith.constant 0 : index
    %c0_10 = arith.constant 0 : index
    %26 = vector.load %arg4[%c0_9, %c0_10] : memref<128x256xbf16, #tpu.memory_space<vmem>>, vector<128x256xbf16>
    %cst_11 = arith.constant dense<0.000000e+00> : vector<32x256xf32>
    %27 = tpu.matmul %25, %26, %cst_11 {dimension_numbers = #tpu.dot_dimension_numbers<[1], [0], [0], [1], [0, 0, 1, 1], [], []>} : vector<32x128xbf16>, vector<128x256xbf16>, vector<32x256xf32> -> vector<32x256xf32>
    %c0_12 = arith.constant 0 : index
    %c0_13 = arith.constant 0 : index
    %28 = vector.load %arg5[%c0_12, %c0_13] : memref<1x256xf32, #tpu.memory_space<vmem>>, vector<1x256xf32>
    %29 = vector.broadcast %28 : vector<1x256xf32> to vector<32x256xf32>
    %30 = arith.addf %27, %29 : vector<32x256xf32>
    %cst_14 = arith.constant 0.000000e+00 : f32
    %31 = vector.broadcast %cst_14 : f32 to vector<32x256xf32>
    %32 = arith.maximumf %30, %31 : vector<32x256xf32>
    %33 = arith.truncf %32 : vector<32x256xf32> to vector<32x256xbf16>
    %c0_15 = arith.constant 0 : index
    %c0_16 = arith.constant 0 : index
    %34 = vector.load %arg6[%c0_15, %c0_16] : memref<256x128xbf16, #tpu.memory_space<vmem>>, vector<256x128xbf16>
    %cst_17 = arith.constant dense<0.000000e+00> : vector<32x128xf32>
    %35 = tpu.matmul %33, %34, %cst_17 {dimension_numbers = #tpu.dot_dimension_numbers<[1], [0], [0], [1], [0, 0, 1, 1], [], []>} : vector<32x256xbf16>, vector<256x128xbf16>, vector<32x128xf32> -> vector<32x128xf32>
    %c0_18 = arith.constant 0 : index
    %c0_19 = arith.constant 0 : index
    %36 = vector.load %arg7[%c0_18, %c0_19] : memref<1x128xf32, #tpu.memory_space<vmem>>, vector<1x128xf32>
    %37 = vector.broadcast %36 : vector<1x128xf32> to vector<32x128xf32>
    %38 = arith.addf %35, %37 : vector<32x128xf32>
    %cst_20 = arith.constant 5.000000e-01 : f32
    %39 = vector.broadcast %cst_20 : f32 to vector<32x128xf32>
    %40 = arith.mulf %39, %38 : vector<32x128xf32>
    %41 = arith.addf %0, %40 : vector<32x128xf32>
    %c0_21 = arith.constant 0 : index
    %c0_22 = arith.constant 0 : index
    %42 = vector.load %arg8[%c0_21, %c0_22] : memref<1x128xf32, #tpu.memory_space<vmem>>, vector<1x128xf32>
    %c0_23 = arith.constant 0 : index
    %c0_24 = arith.constant 0 : index
    %43 = vector.load %arg9[%c0_23, %c0_24] : memref<1x128xf32, #tpu.memory_space<vmem>>, vector<1x128xf32>
    %cst_25 = arith.constant dense<0.000000e+00> : vector<32xf32>
    %44 = vector.multi_reduction <add>, %41, %cst_25 [1] : vector<32x128xf32> to vector<32xf32>
    %45 = vector.shape_cast %44 : vector<32xf32> to vector<32x1xf32>
    %cst_26 = arith.constant 1.280000e+02 : f32
    %46 = vector.broadcast %cst_26 : f32 to vector<32x1xf32>
    %47 = arith.divf %45, %46 : vector<32x1xf32>
    %48 = vector.broadcast %47 : vector<32x1xf32> to vector<32x128xf32>
    %49 = arith.subf %41, %48 : vector<32x128xf32>
    %50 = arith.mulf %49, %49 : vector<32x128xf32>
    %cst_27 = arith.constant dense<0.000000e+00> : vector<32xf32>
    %51 = vector.multi_reduction <add>, %50, %cst_27 [1] : vector<32x128xf32> to vector<32xf32>
    %52 = vector.shape_cast %51 : vector<32xf32> to vector<32x1xf32>
    %cst_28 = arith.constant 1.280000e+02 : f32
    %53 = vector.broadcast %cst_28 : f32 to vector<32x1xf32>
    %54 = arith.divf %52, %53 : vector<32x1xf32>
    %55 = vector.broadcast %47 : vector<32x1xf32> to vector<32x128xf32>
    %56 = arith.subf %41, %55 : vector<32x128xf32>
    %cst_29 = arith.constant 9.99999974E-6 : f32
    %57 = vector.broadcast %cst_29 : f32 to vector<32x1xf32>
    %58 = arith.addf %54, %57 : vector<32x1xf32>
    %59 = math.rsqrt %58 : vector<32x1xf32>
    %60 = vector.broadcast %59 : vector<32x1xf32> to vector<32x128xf32>
    %61 = arith.mulf %56, %60 : vector<32x128xf32>
    %62 = vector.broadcast %42 : vector<1x128xf32> to vector<32x128xf32>
    %63 = arith.mulf %61, %62 : vector<32x128xf32>
    %64 = vector.broadcast %43 : vector<1x128xf32> to vector<32x128xf32>
    %65 = arith.addf %63, %64 : vector<32x128xf32>
    %c0_30 = arith.constant 0 : index
    %c0_31 = arith.constant 0 : index
    %66 = vector.load %arg10[%c0_30, %c0_31] : memref<32x128xf32, #tpu.memory_space<vmem>>, vector<32x128xf32>
    tpu.vector_store %arg10[%c0_30, %c0_31], %65 {strides = array<i32>} : memref<32x128xf32, #tpu.memory_space<vmem>>, vector<32x128xf32>,
    return
  }
  func.func @transform_0(%arg0: i32) -> (i32, i32) {
    %c0_i32 = arith.constant 0 : i32
    %c0_i32_0 = arith.constant 0 : i32
    return %arg0, %c0_i32 : i32, i32
  }
  func.func @transform_1(%arg0: i32) -> (i32, i32) {
    %c0_i32 = arith.constant 0 : i32
    %c0_i32_0 = arith.constant 0 : i32
    %c0_i32_1 = arith.constant 0 : i32
    return %c0_i32, %c0_i32_0 : i32, i32
  }
  func.func @transform_2(%arg0: i32) -> (i32, i32) {
    %c0_i32 = arith.constant 0 : i32
    %c0_i32_0 = arith.constant 0 : i32
    %c0_i32_1 = arith.constant 0 : i32
    return %c0_i32, %c0_i32_0 : i32, i32
  }
  func.func @transform_3(%arg0: i32) -> (i32, i32) {
    %c0_i32 = arith.constant 0 : i32
    %c0_i32_0 = arith.constant 0 : i32
    %c0_i32_1 = arith.constant 0 : i32
    return %c0_i32, %c0_i32_0 : i32, i32
  }
  func.func @transform_4(%arg0: i32) -> (i32, i32) {
    %c0_i32 = arith.constant 0 : i32
    %c0_i32_0 = arith.constant 0 : i32
    %c0_i32_1 = arith.constant 0 : i32
    return %c0_i32, %c0_i32_0 : i32, i32
  }
  func.func @transform_5(%arg0: i32) -> (i32, i32) {
    %c0_i32 = arith.constant 0 : i32
    %c0_i32_0 = arith.constant 0 : i32
    %c0_i32_1 = arith.constant 0 : i32
    return %c0_i32, %c0_i32_0 : i32, i32
  }
  func.func @transform_6(%arg0: i32) -> (i32, i32) {
    %c0_i32 = arith.constant 0 : i32
    %c0_i32_0 = arith.constant 0 : i32
    %c0_i32_1 = arith.constant 0 : i32
    return %c0_i32, %c0_i32_0 : i32, i32
  }
  func.func @transform_7(%arg0: i32) -> (i32, i32) {
    %c0_i32 = arith.constant 0 : i32
    %c0_i32_0 = arith.constant 0 : i32
    %c0_i32_1 = arith.constant 0 : i32
    return %c0_i32, %c0_i32_0 : i32, i32
  }
  func.func @transform_8(%arg0: i32) -> (i32, i32) {
    %c0_i32 = arith.constant 0 : i32
    %c0_i32_0 = arith.constant 0 : i32
    %c0_i32_1 = arith.constant 0 : i32
    return %c0_i32, %c0_i32_0 : i32, i32
  }
  func.func @transform_9(%arg0: i32) -> (i32, i32) {
    %c0_i32 = arith.constant 0 : i32
    %c0_i32_0 = arith.constant 0 : i32
    return %arg0, %c0_i32 : i32, i32
  }
}

module attributes {stable_mosaic.version = 11 : i64} {
  func.func @attn_core_kernel(%arg0: i32, %arg1: i32, %arg2: memref<1x16x128xbf16, #tpu.memory_space<vmem>>, %arg3: memref<1x16x128xbf16, #tpu.memory_space<vmem>>, %arg4: memref<1x16x128xbf16, #tpu.memory_space<vmem>>, %arg5: memref<1x4x16x16xbf16, #tpu.memory_space<vmem>>, %arg6: memref<1x16x128xf32, #tpu.memory_space<vmem>>, %arg7: memref<128x128xbf16, #tpu.memory_space<vmem>>, %arg8: memref<1x128xf32, #tpu.memory_space<vmem>>, %arg9: memref<1x16x128xf32, #tpu.memory_space<vmem>>, %arg10: memref<16x128xf32, #tpu.memory_space<vmem>>) attributes {dimension_semantics = [#tpu.dimension_semantics<parallel>, #tpu.dimension_semantics<parallel>], iteration_bounds = array<i64: 2, 1>, scalar_prefetch = 0 : i64, scratch_operands = 1 : i64, tpu.core_type = #tpu.core_type<tc>, window_params = [{transform_indices = @transform_0, window_bounds = array<i64: 1, 16, 128>}, {transform_indices = @transform_1, window_bounds = array<i64: 1, 16, 128>}, {transform_indices = @transform_2, window_bounds = array<i64: 1, 16, 128>}, {transform_indices = @transform_3, window_bounds = array<i64: 1, 4, 16, 16>}, {transform_indices = @transform_4, window_bounds = array<i64: 1, 16, 128>}, {pipeline_mode = #tpu.pipeline_mode<synchronous>, transform_indices = @transform_5, window_bounds = array<i64: 128, 128>}, {pipeline_mode = #tpu.pipeline_mode<synchronous>, transform_indices = @transform_6, window_bounds = array<i64: 1, 128>}, {transform_indices = @transform_7, window_bounds = array<i64: 1, 16, 128>}]} {
    %c0 = arith.constant 0 : index
    %c0_0 = arith.constant 0 : index
    %c0_1 = arith.constant 0 : index
    %0 = vector.load %arg2[%c0, %c0_0, %c0_1] : memref<1x16x128xbf16, #tpu.memory_space<vmem>>, vector<1x16x128xbf16>
    %1 = vector.shape_cast %0 : vector<1x16x128xbf16> to vector<16x128xbf16>
    %c0_2 = arith.constant 0 : index
    %c0_3 = arith.constant 0 : index
    %c0_4 = arith.constant 0 : index
    %2 = vector.load %arg3[%c0_2, %c0_3, %c0_4] : memref<1x16x128xbf16, #tpu.memory_space<vmem>>, vector<1x16x128xbf16>
    %3 = vector.shape_cast %2 : vector<1x16x128xbf16> to vector<16x128xbf16>
    %c0_5 = arith.constant 0 : index
    %c0_6 = arith.constant 0 : index
    %c0_7 = arith.constant 0 : index
    %4 = vector.load %arg4[%c0_5, %c0_6, %c0_7] : memref<1x16x128xbf16, #tpu.memory_space<vmem>>, vector<1x16x128xbf16>
    %5 = vector.shape_cast %4 : vector<1x16x128xbf16> to vector<16x128xbf16>
    %6 = vector.extract_strided_slice %1 {offsets = [0, 0], sizes = [16, 32], strides = [1, 1]} : vector<16x128xbf16> to vector<16x32xbf16>
    %7 = vector.extract_strided_slice %3 {offsets = [0, 0], sizes = [16, 32], strides = [1, 1]} : vector<16x128xbf16> to vector<16x32xbf16>
    %8 = vector.extract_strided_slice %5 {offsets = [0, 0], sizes = [16, 32], strides = [1, 1]} : vector<16x128xbf16> to vector<16x32xbf16>
    %cst = arith.constant dense<0.000000e+00> : vector<16x16xf32>
    %9 = tpu.matmul %6, %7, %cst {dimension_numbers = #tpu.dot_dimension_numbers<[1], [1], [0], [0], [0, 0, 1, 0], [], []>} : vector<16x32xbf16>, vector<16x32xbf16>, vector<16x16xf32> -> vector<16x16xf32>
    %c0_8 = arith.constant 0 : index
    %c0_9 = arith.constant 0 : index
    %c0_10 = arith.constant 0 : index
    %c0_11 = arith.constant 0 : index
    %10 = vector.load %arg5[%c0_8, %c0_9, %c0_10, %c0_11] : memref<1x4x16x16xbf16, #tpu.memory_space<vmem>>, vector<1x1x16x16xbf16>
    %11 = vector.shape_cast %10 : vector<1x1x16x16xbf16> to vector<16x16xbf16>
    %12 = arith.extf %11 : vector<16x16xbf16> to vector<16x16xf32>
    %13 = arith.addf %9, %12 : vector<16x16xf32>
    %cst_12 = arith.constant 0.176776692 : f32
    %14 = vector.broadcast %cst_12 : f32 to vector<16x16xf32>
    %15 = arith.mulf %13, %14 : vector<16x16xf32>
    %cst_13 = arith.constant dense<0xFF800000> : vector<16xf32>
    %16 = vector.multi_reduction <maximumf>, %15, %cst_13 [1] : vector<16x16xf32> to vector<16xf32>
    %17 = vector.shape_cast %16 : vector<16xf32> to vector<16x1xf32>
    %18 = vector.broadcast %17 : vector<16x1xf32> to vector<16x16xf32>
    %19 = arith.subf %15, %18 : vector<16x16xf32>
    %20 = math.exp %19 : vector<16x16xf32>
    %cst_14 = arith.constant dense<0.000000e+00> : vector<16xf32>
    %21 = vector.multi_reduction <add>, %20, %cst_14 [1] : vector<16x16xf32> to vector<16xf32>
    %22 = vector.shape_cast %21 : vector<16xf32> to vector<16x1xf32>
    %23 = vector.broadcast %22 : vector<16x1xf32> to vector<16x16xf32>
    %24 = arith.divf %20, %23 : vector<16x16xf32>
    %25 = arith.truncf %24 : vector<16x16xf32> to vector<16x16xbf16>
    %cst_15 = arith.constant dense<0.000000e+00> : vector<16x32xf32>
    %26 = tpu.matmul %25, %8, %cst_15 {dimension_numbers = #tpu.dot_dimension_numbers<[1], [0], [0], [1], [0, 0, 1, 1], [], []>} : vector<16x16xbf16>, vector<16x32xbf16>, vector<16x32xf32> -> vector<16x32xf32>
    %c0_16 = arith.constant 0 : index
    %c0_17 = arith.constant 0 : index
    %27 = vector.load %arg10[%c0_16, %c0_17] : memref<16x128xf32, #tpu.memory_space<vmem>>, vector<16x32xf32>
    tpu.vector_store %arg10[%c0_16, %c0_17], %26 {strides = array<i32>} : memref<16x128xf32, #tpu.memory_space<vmem>>, vector<16x32xf32>,
    %28 = vector.extract_strided_slice %1 {offsets = [0, 32], sizes = [16, 32], strides = [1, 1]} : vector<16x128xbf16> to vector<16x32xbf16>
    %29 = vector.extract_strided_slice %3 {offsets = [0, 32], sizes = [16, 32], strides = [1, 1]} : vector<16x128xbf16> to vector<16x32xbf16>
    %30 = vector.extract_strided_slice %5 {offsets = [0, 32], sizes = [16, 32], strides = [1, 1]} : vector<16x128xbf16> to vector<16x32xbf16>
    %cst_18 = arith.constant dense<0.000000e+00> : vector<16x16xf32>
    %31 = tpu.matmul %28, %29, %cst_18 {dimension_numbers = #tpu.dot_dimension_numbers<[1], [1], [0], [0], [0, 0, 1, 0], [], []>} : vector<16x32xbf16>, vector<16x32xbf16>, vector<16x16xf32> -> vector<16x16xf32>
    %c0_19 = arith.constant 0 : index
    %c1 = arith.constant 1 : index
    %c0_20 = arith.constant 0 : index
    %c0_21 = arith.constant 0 : index
    %32 = vector.load %arg5[%c0_19, %c1, %c0_20, %c0_21] : memref<1x4x16x16xbf16, #tpu.memory_space<vmem>>, vector<1x1x16x16xbf16>
    %33 = vector.shape_cast %32 : vector<1x1x16x16xbf16> to vector<16x16xbf16>
    %34 = arith.extf %33 : vector<16x16xbf16> to vector<16x16xf32>
    %35 = arith.addf %31, %34 : vector<16x16xf32>
    %cst_22 = arith.constant 0.176776692 : f32
    %36 = vector.broadcast %cst_22 : f32 to vector<16x16xf32>
    %37 = arith.mulf %35, %36 : vector<16x16xf32>
    %cst_23 = arith.constant dense<0xFF800000> : vector<16xf32>
    %38 = vector.multi_reduction <maximumf>, %37, %cst_23 [1] : vector<16x16xf32> to vector<16xf32>
    %39 = vector.shape_cast %38 : vector<16xf32> to vector<16x1xf32>
    %40 = vector.broadcast %39 : vector<16x1xf32> to vector<16x16xf32>
    %41 = arith.subf %37, %40 : vector<16x16xf32>
    %42 = math.exp %41 : vector<16x16xf32>
    %cst_24 = arith.constant dense<0.000000e+00> : vector<16xf32>
    %43 = vector.multi_reduction <add>, %42, %cst_24 [1] : vector<16x16xf32> to vector<16xf32>
    %44 = vector.shape_cast %43 : vector<16xf32> to vector<16x1xf32>
    %45 = vector.broadcast %44 : vector<16x1xf32> to vector<16x16xf32>
    %46 = arith.divf %42, %45 : vector<16x16xf32>
    %47 = arith.truncf %46 : vector<16x16xf32> to vector<16x16xbf16>
    %cst_25 = arith.constant dense<0.000000e+00> : vector<16x32xf32>
    %48 = tpu.matmul %47, %30, %cst_25 {dimension_numbers = #tpu.dot_dimension_numbers<[1], [0], [0], [1], [0, 0, 1, 1], [], []>} : vector<16x16xbf16>, vector<16x32xbf16>, vector<16x32xf32> -> vector<16x32xf32>
    %c0_26 = arith.constant 0 : index
    %c32 = arith.constant 32 : index
    %49 = vector.load %arg10[%c0_26, %c32] : memref<16x128xf32, #tpu.memory_space<vmem>>, vector<16x32xf32>
    tpu.vector_store %arg10[%c0_26, %c32], %48 {strides = array<i32>} : memref<16x128xf32, #tpu.memory_space<vmem>>, vector<16x32xf32>,
    %50 = vector.extract_strided_slice %1 {offsets = [0, 64], sizes = [16, 32], strides = [1, 1]} : vector<16x128xbf16> to vector<16x32xbf16>
    %51 = vector.extract_strided_slice %3 {offsets = [0, 64], sizes = [16, 32], strides = [1, 1]} : vector<16x128xbf16> to vector<16x32xbf16>
    %52 = vector.extract_strided_slice %5 {offsets = [0, 64], sizes = [16, 32], strides = [1, 1]} : vector<16x128xbf16> to vector<16x32xbf16>
    %cst_27 = arith.constant dense<0.000000e+00> : vector<16x16xf32>
    %53 = tpu.matmul %50, %51, %cst_27 {dimension_numbers = #tpu.dot_dimension_numbers<[1], [1], [0], [0], [0, 0, 1, 0], [], []>} : vector<16x32xbf16>, vector<16x32xbf16>, vector<16x16xf32> -> vector<16x16xf32>
    %c0_28 = arith.constant 0 : index
    %c2 = arith.constant 2 : index
    %c0_29 = arith.constant 0 : index
    %c0_30 = arith.constant 0 : index
    %54 = vector.load %arg5[%c0_28, %c2, %c0_29, %c0_30] : memref<1x4x16x16xbf16, #tpu.memory_space<vmem>>, vector<1x1x16x16xbf16>
    %55 = vector.shape_cast %54 : vector<1x1x16x16xbf16> to vector<16x16xbf16>
    %56 = arith.extf %55 : vector<16x16xbf16> to vector<16x16xf32>
    %57 = arith.addf %53, %56 : vector<16x16xf32>
    %cst_31 = arith.constant 0.176776692 : f32
    %58 = vector.broadcast %cst_31 : f32 to vector<16x16xf32>
    %59 = arith.mulf %57, %58 : vector<16x16xf32>
    %cst_32 = arith.constant dense<0xFF800000> : vector<16xf32>
    %60 = vector.multi_reduction <maximumf>, %59, %cst_32 [1] : vector<16x16xf32> to vector<16xf32>
    %61 = vector.shape_cast %60 : vector<16xf32> to vector<16x1xf32>
    %62 = vector.broadcast %61 : vector<16x1xf32> to vector<16x16xf32>
    %63 = arith.subf %59, %62 : vector<16x16xf32>
    %64 = math.exp %63 : vector<16x16xf32>
    %cst_33 = arith.constant dense<0.000000e+00> : vector<16xf32>
    %65 = vector.multi_reduction <add>, %64, %cst_33 [1] : vector<16x16xf32> to vector<16xf32>
    %66 = vector.shape_cast %65 : vector<16xf32> to vector<16x1xf32>
    %67 = vector.broadcast %66 : vector<16x1xf32> to vector<16x16xf32>
    %68 = arith.divf %64, %67 : vector<16x16xf32>
    %69 = arith.truncf %68 : vector<16x16xf32> to vector<16x16xbf16>
    %cst_34 = arith.constant dense<0.000000e+00> : vector<16x32xf32>
    %70 = tpu.matmul %69, %52, %cst_34 {dimension_numbers = #tpu.dot_dimension_numbers<[1], [0], [0], [1], [0, 0, 1, 1], [], []>} : vector<16x16xbf16>, vector<16x32xbf16>, vector<16x32xf32> -> vector<16x32xf32>
    %c0_35 = arith.constant 0 : index
    %c64 = arith.constant 64 : index
    %71 = vector.load %arg10[%c0_35, %c64] : memref<16x128xf32, #tpu.memory_space<vmem>>, vector<16x32xf32>
    tpu.vector_store %arg10[%c0_35, %c64], %70 {strides = array<i32>} : memref<16x128xf32, #tpu.memory_space<vmem>>, vector<16x32xf32>,
    %72 = vector.extract_strided_slice %1 {offsets = [0, 96], sizes = [16, 32], strides = [1, 1]} : vector<16x128xbf16> to vector<16x32xbf16>
    %73 = vector.extract_strided_slice %3 {offsets = [0, 96], sizes = [16, 32], strides = [1, 1]} : vector<16x128xbf16> to vector<16x32xbf16>
    %74 = vector.extract_strided_slice %5 {offsets = [0, 96], sizes = [16, 32], strides = [1, 1]} : vector<16x128xbf16> to vector<16x32xbf16>
    %cst_36 = arith.constant dense<0.000000e+00> : vector<16x16xf32>
    %75 = tpu.matmul %72, %73, %cst_36 {dimension_numbers = #tpu.dot_dimension_numbers<[1], [1], [0], [0], [0, 0, 1, 0], [], []>} : vector<16x32xbf16>, vector<16x32xbf16>, vector<16x16xf32> -> vector<16x16xf32>
    %c0_37 = arith.constant 0 : index
    %c3 = arith.constant 3 : index
    %c0_38 = arith.constant 0 : index
    %c0_39 = arith.constant 0 : index
    %76 = vector.load %arg5[%c0_37, %c3, %c0_38, %c0_39] : memref<1x4x16x16xbf16, #tpu.memory_space<vmem>>, vector<1x1x16x16xbf16>
    %77 = vector.shape_cast %76 : vector<1x1x16x16xbf16> to vector<16x16xbf16>
    %78 = arith.extf %77 : vector<16x16xbf16> to vector<16x16xf32>
    %79 = arith.addf %75, %78 : vector<16x16xf32>
    %cst_40 = arith.constant 0.176776692 : f32
    %80 = vector.broadcast %cst_40 : f32 to vector<16x16xf32>
    %81 = arith.mulf %79, %80 : vector<16x16xf32>
    %cst_41 = arith.constant dense<0xFF800000> : vector<16xf32>
    %82 = vector.multi_reduction <maximumf>, %81, %cst_41 [1] : vector<16x16xf32> to vector<16xf32>
    %83 = vector.shape_cast %82 : vector<16xf32> to vector<16x1xf32>
    %84 = vector.broadcast %83 : vector<16x1xf32> to vector<16x16xf32>
    %85 = arith.subf %81, %84 : vector<16x16xf32>
    %86 = math.exp %85 : vector<16x16xf32>
    %cst_42 = arith.constant dense<0.000000e+00> : vector<16xf32>
    %87 = vector.multi_reduction <add>, %86, %cst_42 [1] : vector<16x16xf32> to vector<16xf32>
    %88 = vector.shape_cast %87 : vector<16xf32> to vector<16x1xf32>
    %89 = vector.broadcast %88 : vector<16x1xf32> to vector<16x16xf32>
    %90 = arith.divf %86, %89 : vector<16x16xf32>
    %91 = arith.truncf %90 : vector<16x16xf32> to vector<16x16xbf16>
    %cst_43 = arith.constant dense<0.000000e+00> : vector<16x32xf32>
    %92 = tpu.matmul %91, %74, %cst_43 {dimension_numbers = #tpu.dot_dimension_numbers<[1], [0], [0], [1], [0, 0, 1, 1], [], []>} : vector<16x16xbf16>, vector<16x32xbf16>, vector<16x32xf32> -> vector<16x32xf32>
    %c0_44 = arith.constant 0 : index
    %c96 = arith.constant 96 : index
    %93 = vector.load %arg10[%c0_44, %c96] : memref<16x128xf32, #tpu.memory_space<vmem>>, vector<16x32xf32>
    tpu.vector_store %arg10[%c0_44, %c96], %92 {strides = array<i32>} : memref<16x128xf32, #tpu.memory_space<vmem>>, vector<16x32xf32>,
    %c0_45 = arith.constant 0 : index
    %c0_46 = arith.constant 0 : index
    %94 = vector.load %arg10[%c0_45, %c0_46] : memref<16x128xf32, #tpu.memory_space<vmem>>, vector<16x128xf32>
    %95 = arith.truncf %94 : vector<16x128xf32> to vector<16x128xbf16>
    %c0_47 = arith.constant 0 : index
    %c0_48 = arith.constant 0 : index
    %96 = vector.load %arg7[%c0_47, %c0_48] : memref<128x128xbf16, #tpu.memory_space<vmem>>, vector<128x128xbf16>
    %cst_49 = arith.constant dense<0.000000e+00> : vector<16x128xf32>
    %97 = tpu.matmul %95, %96, %cst_49 {dimension_numbers = #tpu.dot_dimension_numbers<[1], [0], [0], [1], [0, 0, 1, 1], [], []>} : vector<16x128xbf16>, vector<128x128xbf16>, vector<16x128xf32> -> vector<16x128xf32>
    %c0_50 = arith.constant 0 : index
    %c0_51 = arith.constant 0 : index
    %c0_52 = arith.constant 0 : index
    %98 = vector.load %arg6[%c0_50, %c0_51, %c0_52] : memref<1x16x128xf32, #tpu.memory_space<vmem>>, vector<1x16x128xf32>
    %99 = vector.shape_cast %98 : vector<1x16x128xf32> to vector<16x128xf32>
    %100 = arith.addf %99, %97 : vector<16x128xf32>
    %c0_53 = arith.constant 0 : index
    %c0_54 = arith.constant 0 : index
    %101 = vector.load %arg8[%c0_53, %c0_54] : memref<1x128xf32, #tpu.memory_space<vmem>>, vector<1x128xf32>
    %102 = vector.broadcast %101 : vector<1x128xf32> to vector<16x128xf32>
    %103 = arith.addf %100, %102 : vector<16x128xf32>
    %c0_55 = arith.constant 0 : index
    %c0_56 = arith.constant 0 : index
    %c0_57 = arith.constant 0 : index
    %104 = vector.load %arg9[%c0_55, %c0_56, %c0_57] : memref<1x16x128xf32, #tpu.memory_space<vmem>>, vector<1x16x128xf32>
    %105 = vector.shape_cast %104 : vector<1x16x128xf32> to vector<16x128xf32>
    %106 = vector.shape_cast %103 : vector<16x128xf32> to vector<1x16x128xf32>
    tpu.vector_store %arg9[%c0_55, %c0_56, %c0_57], %106 {strides = array<i32>} : memref<1x16x128xf32, #tpu.memory_space<vmem>>, vector<1x16x128xf32>,
    return
  }
  func.func @transform_0(%arg0: i32, %arg1: i32) -> (i32, i32, i32) {
    %c0_i32 = arith.constant 0 : i32
    %c0_i32_0 = arith.constant 0 : i32
    return %arg0, %arg1, %c0_i32 : i32, i32, i32
  }
  func.func @transform_1(%arg0: i32, %arg1: i32) -> (i32, i32, i32) {
    %c0_i32 = arith.constant 0 : i32
    %c1_i32 = arith.constant 1 : i32
    %c0_i32_0 = arith.constant 0 : i32
    return %arg0, %c0_i32, %c1_i32 : i32, i32, i32
  }
  func.func @transform_2(%arg0: i32, %arg1: i32) -> (i32, i32, i32) {
    %c0_i32 = arith.constant 0 : i32
    %c2_i32 = arith.constant 2 : i32
    %c0_i32_0 = arith.constant 0 : i32
    return %arg0, %c0_i32, %c2_i32 : i32, i32, i32
  }
  func.func @transform_3(%arg0: i32, %arg1: i32) -> (i32, i32, i32, i32) {
    %c0_i32 = arith.constant 0 : i32
    %c0_i32_0 = arith.constant 0 : i32
    %c0_i32_1 = arith.constant 0 : i32
    return %arg0, %c0_i32, %arg1, %c0_i32_0 : i32, i32, i32, i32
  }
  func.func @transform_4(%arg0: i32, %arg1: i32) -> (i32, i32, i32) {
    %c0_i32 = arith.constant 0 : i32
    %c0_i32_0 = arith.constant 0 : i32
    return %arg0, %arg1, %c0_i32 : i32, i32, i32
  }
  func.func @transform_5(%arg0: i32, %arg1: i32) -> (i32, i32) {
    %c0_i32 = arith.constant 0 : i32
    %c0_i32_0 = arith.constant 0 : i32
    %c0_i32_1 = arith.constant 0 : i32
    return %c0_i32, %c0_i32_0 : i32, i32
  }
  func.func @transform_6(%arg0: i32, %arg1: i32) -> (i32, i32) {
    %c0_i32 = arith.constant 0 : i32
    %c0_i32_0 = arith.constant 0 : i32
    %c0_i32_1 = arith.constant 0 : i32
    return %c0_i32, %c0_i32_0 : i32, i32
  }
  func.func @transform_7(%arg0: i32, %arg1: i32) -> (i32, i32, i32) {
    %c0_i32 = arith.constant 0 : i32
    %c0_i32_0 = arith.constant 0 : i32
    return %arg0, %arg1, %c0_i32 : i32, i32, i32
  }
}

module attributes {stable_mosaic.version = 11 : i64} {
  func.func @conv_kernel(%arg0: i32, %arg1: memref<1x16x128xf32, #tpu.memory_space<vmem>>, %arg2: memref<1x128xf32, #tpu.memory_space<vmem>>, %arg3: memref<1x128xf32, #tpu.memory_space<vmem>>, %arg4: memref<5x128xf32, #tpu.memory_space<vmem>>, %arg5: memref<1x128xf32, #tpu.memory_space<vmem>>, %arg6: memref<1x128xf32, #tpu.memory_space<vmem>>, %arg7: memref<1x128xf32, #tpu.memory_space<vmem>>, %arg8: memref<6xf32, #tpu.memory_space<smem>>, %arg9: memref<1x16x128xf32, #tpu.memory_space<vmem>>, %arg10: memref<32x128xf32, #tpu.memory_space<vmem>>) attributes {dimension_semantics = [#tpu.dimension_semantics<parallel>], iteration_bounds = array<i64: 2>, scalar_prefetch = 0 : i64, scratch_operands = 1 : i64, tpu.core_type = #tpu.core_type<tc>, window_params = [{transform_indices = @transform_0, window_bounds = array<i64: 1, 16, 128>}, {pipeline_mode = #tpu.pipeline_mode<synchronous>, transform_indices = @transform_1, window_bounds = array<i64: 1, 128>}, {pipeline_mode = #tpu.pipeline_mode<synchronous>, transform_indices = @transform_2, window_bounds = array<i64: 1, 128>}, {pipeline_mode = #tpu.pipeline_mode<synchronous>, transform_indices = @transform_3, window_bounds = array<i64: 5, 128>}, {pipeline_mode = #tpu.pipeline_mode<synchronous>, transform_indices = @transform_4, window_bounds = array<i64: 1, 128>}, {pipeline_mode = #tpu.pipeline_mode<synchronous>, transform_indices = @transform_5, window_bounds = array<i64: 1, 128>}, {pipeline_mode = #tpu.pipeline_mode<synchronous>, transform_indices = @transform_6, window_bounds = array<i64: 1, 128>}, {transform_indices = @transform_7, window_bounds = array<i64: 6>}, {transform_indices = @transform_8, window_bounds = array<i64: 1, 16, 128>}]} {
    %c0 = arith.constant 0 : index
    %c0_0 = arith.constant 0 : index
    %c0_1 = arith.constant 0 : index
    %0 = vector.load %arg1[%c0, %c0_0, %c0_1] : memref<1x16x128xf32, #tpu.memory_space<vmem>>, vector<1x16x128xf32>
    %1 = vector.shape_cast %0 : vector<1x16x128xf32> to vector<16x128xf32>
    %c0_2 = arith.constant 0 : index
    %2 = memref.load %arg8[%c0_2] : memref<6xf32, #tpu.memory_space<smem>>
    %c1 = arith.constant 1 : index
    %3 = memref.load %arg8[%c1] : memref<6xf32, #tpu.memory_space<smem>>
    %c2 = arith.constant 2 : index
    %4 = memref.load %arg8[%c2] : memref<6xf32, #tpu.memory_space<smem>>
    %c3 = arith.constant 3 : index
    %5 = memref.load %arg8[%c3] : memref<6xf32, #tpu.memory_space<smem>>
    %c4 = arith.constant 4 : index
    %6 = memref.load %arg8[%c4] : memref<6xf32, #tpu.memory_space<smem>>
    %c5 = arith.constant 5 : index
    %7 = memref.load %arg8[%c5] : memref<6xf32, #tpu.memory_space<smem>>
    %c0_3 = arith.constant 0 : index
    %c0_4 = arith.constant 0 : index
    %8 = vector.load %arg2[%c0_3, %c0_4] : memref<1x128xf32, #tpu.memory_space<vmem>>, vector<1x128xf32>
    %c0_5 = arith.constant 0 : index
    %c0_6 = arith.constant 0 : index
    %9 = vector.load %arg3[%c0_5, %c0_6] : memref<1x128xf32, #tpu.memory_space<vmem>>, vector<1x128xf32>
    %cst = arith.constant dense<0.000000e+00> : vector<16xf32>
    %10 = vector.multi_reduction <add>, %1, %cst [1] : vector<16x128xf32> to vector<16xf32>
    %11 = vector.shape_cast %10 : vector<16xf32> to vector<16x1xf32>
    %cst_7 = arith.constant 1.280000e+02 : f32
    %12 = vector.broadcast %cst_7 : f32 to vector<16x1xf32>
    %13 = arith.divf %11, %12 : vector<16x1xf32>
    %14 = vector.broadcast %13 : vector<16x1xf32> to vector<16x128xf32>
    %15 = arith.subf %1, %14 : vector<16x128xf32>
    %16 = arith.mulf %15, %15 : vector<16x128xf32>
    %cst_8 = arith.constant dense<0.000000e+00> : vector<16xf32>
    %17 = vector.multi_reduction <add>, %16, %cst_8 [1] : vector<16x128xf32> to vector<16xf32>
    %18 = vector.shape_cast %17 : vector<16xf32> to vector<16x1xf32>
    %cst_9 = arith.constant 1.280000e+02 : f32
    %19 = vector.broadcast %cst_9 : f32 to vector<16x1xf32>
    %20 = arith.divf %18, %19 : vector<16x1xf32>
    %21 = vector.broadcast %13 : vector<16x1xf32> to vector<16x128xf32>
    %22 = arith.subf %1, %21 : vector<16x128xf32>
    %cst_10 = arith.constant 9.99999974E-6 : f32
    %23 = vector.broadcast %cst_10 : f32 to vector<16x1xf32>
    %24 = arith.addf %20, %23 : vector<16x1xf32>
    %25 = math.rsqrt %24 : vector<16x1xf32>
    %26 = vector.broadcast %25 : vector<16x1xf32> to vector<16x128xf32>
    %27 = arith.mulf %22, %26 : vector<16x128xf32>
    %28 = vector.broadcast %8 : vector<1x128xf32> to vector<16x128xf32>
    %29 = arith.mulf %27, %28 : vector<16x128xf32>
    %30 = vector.broadcast %9 : vector<1x128xf32> to vector<16x128xf32>
    %31 = arith.addf %29, %30 : vector<16x128xf32>
    %32 = vector.broadcast %2 : f32 to vector<16x128xf32>
    %33 = arith.mulf %31, %32 : vector<16x128xf32>
    %34 = vector.broadcast %4 : f32 to vector<16x128xf32>
    %35 = arith.addf %33, %34 : vector<16x128xf32>
    %36 = vector.broadcast %3 : f32 to vector<16x128xf32>
    %37 = arith.mulf %31, %36 : vector<16x128xf32>
    %38 = vector.broadcast %5 : f32 to vector<16x128xf32>
    %39 = arith.addf %37, %38 : vector<16x128xf32>
    %40 = arith.negf %39 : vector<16x128xf32>
    %41 = math.exp %40 : vector<16x128xf32>
    %cst_11 = arith.constant 1.000000e+00 : f32
    %42 = vector.broadcast %cst_11 : f32 to vector<16x128xf32>
    %43 = arith.addf %42, %41 : vector<16x128xf32>
    %44 = arith.divf %42, %43 : vector<16x128xf32>
    %45 = arith.mulf %35, %44 : vector<16x128xf32>
    %cst_12 = arith.constant 0.000000e+00 : f32
    %46 = vector.broadcast %cst_12 : f32 to vector<2x128xf32>
    %c6 = arith.constant 6 : index
    %c0_13 = arith.constant 0 : index
    %47 = vector.load %arg10[%c6, %c0_13] : memref<32x128xf32, #tpu.memory_space<vmem>>, vector<2x128xf32>
    tpu.vector_store %arg10[%c6, %c0_13], %46 {strides = array<i32>} : memref<32x128xf32, #tpu.memory_space<vmem>>, vector<2x128xf32>,
    %cst_14 = arith.constant 0.000000e+00 : f32
    %48 = vector.broadcast %cst_14 : f32 to vector<2x128xf32>
    %c24 = arith.constant 24 : index
    %c0_15 = arith.constant 0 : index
    %49 = vector.load %arg10[%c24, %c0_15] : memref<32x128xf32, #tpu.memory_space<vmem>>, vector<2x128xf32>
    tpu.vector_store %arg10[%c24, %c0_15], %48 {strides = array<i32>} : memref<32x128xf32, #tpu.memory_space<vmem>>, vector<2x128xf32>,
    %c8 = arith.constant 8 : index
    %c0_16 = arith.constant 0 : index
    %50 = vector.load %arg10[%c8, %c0_16] : memref<32x128xf32, #tpu.memory_space<vmem>>, vector<16x128xf32>
    tpu.vector_store %arg10[%c8, %c0_16], %45 {strides = array<i32>} : memref<32x128xf32, #tpu.memory_space<vmem>>, vector<16x128xf32>,
    %c0_17 = arith.constant 0 : index
    %c0_18 = arith.constant 0 : index
    %51 = vector.load %arg4[%c0_17, %c0_18] : memref<5x128xf32, #tpu.memory_space<vmem>>, vector<5x128xf32>
    %cst_19 = arith.constant 0.000000e+00 : f32
    %52 = vector.broadcast %cst_19 : f32 to vector<16x128xf32>
    %c6_20 = arith.constant 6 : index
    %c0_21 = arith.constant 0 : index
    %53 = vector.load %arg10[%c6_20, %c0_21] : memref<32x128xf32, #tpu.memory_space<vmem>>, vector<16x128xf32>
    %54 = vector.extract_strided_slice %51 {offsets = [0, 0], sizes = [1, 128], strides = [1, 1]} : vector<5x128xf32> to vector<1x128xf32>
    %55 = vector.broadcast %54 : vector<1x128xf32> to vector<16x128xf32>
    %56 = arith.mulf %53, %55 : vector<16x128xf32>
    %57 = arith.addf %52, %56 : vector<16x128xf32>
    %c7 = arith.constant 7 : index
    %c0_22 = arith.constant 0 : index
    %58 = vector.load %arg10[%c7, %c0_22] : memref<32x128xf32, #tpu.memory_space<vmem>>, vector<16x128xf32>
    %59 = vector.extract_strided_slice %51 {offsets = [1, 0], sizes = [1, 128], strides = [1, 1]} : vector<5x128xf32> to vector<1x128xf32>
    %60 = vector.broadcast %59 : vector<1x128xf32> to vector<16x128xf32>
    %61 = arith.mulf %58, %60 : vector<16x128xf32>
    %62 = arith.addf %57, %61 : vector<16x128xf32>
    %c8_23 = arith.constant 8 : index
    %c0_24 = arith.constant 0 : index
    %63 = vector.load %arg10[%c8_23, %c0_24] : memref<32x128xf32, #tpu.memory_space<vmem>>, vector<16x128xf32>
    %64 = vector.extract_strided_slice %51 {offsets = [2, 0], sizes = [1, 128], strides = [1, 1]} : vector<5x128xf32> to vector<1x128xf32>
    %65 = vector.broadcast %64 : vector<1x128xf32> to vector<16x128xf32>
    %66 = arith.mulf %63, %65 : vector<16x128xf32>
    %67 = arith.addf %62, %66 : vector<16x128xf32>
    %c9 = arith.constant 9 : index
    %c0_25 = arith.constant 0 : index
    %68 = vector.load %arg10[%c9, %c0_25] : memref<32x128xf32, #tpu.memory_space<vmem>>, vector<16x128xf32>
    %69 = vector.extract_strided_slice %51 {offsets = [3, 0], sizes = [1, 128], strides = [1, 1]} : vector<5x128xf32> to vector<1x128xf32>
    %70 = vector.broadcast %69 : vector<1x128xf32> to vector<16x128xf32>
    %71 = arith.mulf %68, %70 : vector<16x128xf32>
    %72 = arith.addf %67, %71 : vector<16x128xf32>
    %c10 = arith.constant 10 : index
    %c0_26 = arith.constant 0 : index
    %73 = vector.load %arg10[%c10, %c0_26] : memref<32x128xf32, #tpu.memory_space<vmem>>, vector<16x128xf32>
    %74 = vector.extract_strided_slice %51 {offsets = [4, 0], sizes = [1, 128], strides = [1, 1]} : vector<5x128xf32> to vector<1x128xf32>
    %75 = vector.broadcast %74 : vector<1x128xf32> to vector<16x128xf32>
    %76 = arith.mulf %73, %75 : vector<16x128xf32>
    %77 = arith.addf %72, %76 : vector<16x128xf32>
    %c0_27 = arith.constant 0 : index
    %c0_28 = arith.constant 0 : index
    %78 = vector.load %arg5[%c0_27, %c0_28] : memref<1x128xf32, #tpu.memory_space<vmem>>, vector<1x128xf32>
    %79 = vector.broadcast %78 : vector<1x128xf32> to vector<16x128xf32>
    %80 = arith.addf %77, %79 : vector<16x128xf32>
    %c0_29 = arith.constant 0 : index
    %c0_30 = arith.constant 0 : index
    %81 = vector.load %arg6[%c0_29, %c0_30] : memref<1x128xf32, #tpu.memory_space<vmem>>, vector<1x128xf32>
    %82 = vector.broadcast %81 : vector<1x128xf32> to vector<16x128xf32>
    %83 = arith.mulf %80, %82 : vector<16x128xf32>
    %c0_31 = arith.constant 0 : index
    %c0_32 = arith.constant 0 : index
    %84 = vector.load %arg7[%c0_31, %c0_32] : memref<1x128xf32, #tpu.memory_space<vmem>>, vector<1x128xf32>
    %85 = vector.broadcast %84 : vector<1x128xf32> to vector<16x128xf32>
    %86 = arith.addf %83, %85 : vector<16x128xf32>
    %cst_33 = arith.constant 0.000000e+00 : f32
    %87 = vector.broadcast %cst_33 : f32 to vector<16x128xf32>
    %88 = arith.maximumf %86, %87 : vector<16x128xf32>
    %89 = vector.broadcast %6 : f32 to vector<16x128xf32>
    %90 = arith.mulf %88, %89 : vector<16x128xf32>
    %91 = vector.broadcast %7 : f32 to vector<16x128xf32>
    %92 = arith.addf %90, %91 : vector<16x128xf32>
    %93 = arith.addf %1, %92 : vector<16x128xf32>
    %c0_34 = arith.constant 0 : index
    %c0_35 = arith.constant 0 : index
    %c0_36 = arith.constant 0 : index
    %94 = vector.load %arg9[%c0_34, %c0_35, %c0_36] : memref<1x16x128xf32, #tpu.memory_space<vmem>>, vector<1x16x128xf32>
    %95 = vector.shape_cast %94 : vector<1x16x128xf32> to vector<16x128xf32>
    %96 = vector.shape_cast %93 : vector<16x128xf32> to vector<1x16x128xf32>
    tpu.vector_store %arg9[%c0_34, %c0_35, %c0_36], %96 {strides = array<i32>} : memref<1x16x128xf32, #tpu.memory_space<vmem>>, vector<1x16x128xf32>,
    return
  }
  func.func @transform_0(%arg0: i32) -> (i32, i32, i32) {
    %c0_i32 = arith.constant 0 : i32
    %c0_i32_0 = arith.constant 0 : i32
    %c0_i32_1 = arith.constant 0 : i32
    return %arg0, %c0_i32, %c0_i32_0 : i32, i32, i32
  }
  func.func @transform_1(%arg0: i32) -> (i32, i32) {
    %c0_i32 = arith.constant 0 : i32
    %c0_i32_0 = arith.constant 0 : i32
    %c0_i32_1 = arith.constant 0 : i32
    return %c0_i32, %c0_i32_0 : i32, i32
  }
  func.func @transform_2(%arg0: i32) -> (i32, i32) {
    %c0_i32 = arith.constant 0 : i32
    %c0_i32_0 = arith.constant 0 : i32
    %c0_i32_1 = arith.constant 0 : i32
    return %c0_i32, %c0_i32_0 : i32, i32
  }
  func.func @transform_3(%arg0: i32) -> (i32, i32) {
    %c0_i32 = arith.constant 0 : i32
    %c0_i32_0 = arith.constant 0 : i32
    %c0_i32_1 = arith.constant 0 : i32
    return %c0_i32, %c0_i32_0 : i32, i32
  }
  func.func @transform_4(%arg0: i32) -> (i32, i32) {
    %c0_i32 = arith.constant 0 : i32
    %c0_i32_0 = arith.constant 0 : i32
    %c0_i32_1 = arith.constant 0 : i32
    return %c0_i32, %c0_i32_0 : i32, i32
  }
  func.func @transform_5(%arg0: i32) -> (i32, i32) {
    %c0_i32 = arith.constant 0 : i32
    %c0_i32_0 = arith.constant 0 : i32
    %c0_i32_1 = arith.constant 0 : i32
    return %c0_i32, %c0_i32_0 : i32, i32
  }
  func.func @transform_6(%arg0: i32) -> (i32, i32) {
    %c0_i32 = arith.constant 0 : i32
    %c0_i32_0 = arith.constant 0 : i32
    %c0_i32_1 = arith.constant 0 : i32
    return %c0_i32, %c0_i32_0 : i32, i32
  }
  func.func @transform_7(%arg0: i32) -> i32 {
    %c0_i32 = arith.constant 0 : i32
    %c0_i32_0 = arith.constant 0 : i32
    return %c0_i32 : i32
  }
  func.func @transform_8(%arg0: i32) -> (i32, i32, i32) {
    %c0_i32 = arith.constant 0 : i32
    %c0_i32_0 = arith.constant 0 : i32
    %c0_i32_1 = arith.constant 0 : i32
    return %arg0, %c0_i32, %c0_i32_0 : i32, i32, i32
  }
}

module attributes {stable_mosaic.version = 11 : i64} {
  func.func @ffn_kernel(%arg0: i32, %arg1: memref<32x128xf32, #tpu.memory_space<vmem>>, %arg2: memref<1x128xf32, #tpu.memory_space<vmem>>, %arg3: memref<1x128xf32, #tpu.memory_space<vmem>>, %arg4: memref<128x256xbf16, #tpu.memory_space<vmem>>, %arg5: memref<1x256xf32, #tpu.memory_space<vmem>>, %arg6: memref<256x128xbf16, #tpu.memory_space<vmem>>, %arg7: memref<1x128xf32, #tpu.memory_space<vmem>>, %arg8: memref<1x128xf32, #tpu.memory_space<vmem>>, %arg9: memref<1x128xf32, #tpu.memory_space<vmem>>, %arg10: memref<32x128xf32, #tpu.memory_space<vmem>>) attributes {dimension_semantics = [#tpu.dimension_semantics<parallel>], iteration_bounds = array<i64: 1>, scalar_prefetch = 0 : i64, scratch_operands = 0 : i64, tpu.core_type = #tpu.core_type<tc>, window_params = [{transform_indices = @transform_0, window_bounds = array<i64: 32, 128>}, {pipeline_mode = #tpu.pipeline_mode<synchronous>, transform_indices = @transform_1, window_bounds = array<i64: 1, 128>}, {pipeline_mode = #tpu.pipeline_mode<synchronous>, transform_indices = @transform_2, window_bounds = array<i64: 1, 128>}, {pipeline_mode = #tpu.pipeline_mode<synchronous>, transform_indices = @transform_3, window_bounds = array<i64: 128, 256>}, {pipeline_mode = #tpu.pipeline_mode<synchronous>, transform_indices = @transform_4, window_bounds = array<i64: 1, 256>}, {pipeline_mode = #tpu.pipeline_mode<synchronous>, transform_indices = @transform_5, window_bounds = array<i64: 256, 128>}, {pipeline_mode = #tpu.pipeline_mode<synchronous>, transform_indices = @transform_6, window_bounds = array<i64: 1, 128>}, {pipeline_mode = #tpu.pipeline_mode<synchronous>, transform_indices = @transform_7, window_bounds = array<i64: 1, 128>}, {pipeline_mode = #tpu.pipeline_mode<synchronous>, transform_indices = @transform_8, window_bounds = array<i64: 1, 128>}, {transform_indices = @transform_9, window_bounds = array<i64: 32, 128>}]} {
    %c0 = arith.constant 0 : index
    %c0_0 = arith.constant 0 : index
    %0 = vector.load %arg1[%c0, %c0_0] : memref<32x128xf32, #tpu.memory_space<vmem>>, vector<32x128xf32>
    %c0_1 = arith.constant 0 : index
    %c0_2 = arith.constant 0 : index
    %1 = vector.load %arg2[%c0_1, %c0_2] : memref<1x128xf32, #tpu.memory_space<vmem>>, vector<1x128xf32>
    %c0_3 = arith.constant 0 : index
    %c0_4 = arith.constant 0 : index
    %2 = vector.load %arg3[%c0_3, %c0_4] : memref<1x128xf32, #tpu.memory_space<vmem>>, vector<1x128xf32>
    %cst = arith.constant dense<0.000000e+00> : vector<32xf32>
    %3 = vector.multi_reduction <add>, %0, %cst [1] : vector<32x128xf32> to vector<32xf32>
    %4 = vector.shape_cast %3 : vector<32xf32> to vector<32x1xf32>
    %cst_5 = arith.constant 1.280000e+02 : f32
    %5 = vector.broadcast %cst_5 : f32 to vector<32x1xf32>
    %6 = arith.divf %4, %5 : vector<32x1xf32>
    %7 = vector.broadcast %6 : vector<32x1xf32> to vector<32x128xf32>
    %8 = arith.subf %0, %7 : vector<32x128xf32>
    %9 = arith.mulf %8, %8 : vector<32x128xf32>
    %cst_6 = arith.constant dense<0.000000e+00> : vector<32xf32>
    %10 = vector.multi_reduction <add>, %9, %cst_6 [1] : vector<32x128xf32> to vector<32xf32>
    %11 = vector.shape_cast %10 : vector<32xf32> to vector<32x1xf32>
    %cst_7 = arith.constant 1.280000e+02 : f32
    %12 = vector.broadcast %cst_7 : f32 to vector<32x1xf32>
    %13 = arith.divf %11, %12 : vector<32x1xf32>
    %14 = vector.broadcast %6 : vector<32x1xf32> to vector<32x128xf32>
    %15 = arith.subf %0, %14 : vector<32x128xf32>
    %cst_8 = arith.constant 9.99999974E-6 : f32
    %16 = vector.broadcast %cst_8 : f32 to vector<32x1xf32>
    %17 = arith.addf %13, %16 : vector<32x1xf32>
    %18 = math.rsqrt %17 : vector<32x1xf32>
    %19 = vector.broadcast %18 : vector<32x1xf32> to vector<32x128xf32>
    %20 = arith.mulf %15, %19 : vector<32x128xf32>
    %21 = vector.broadcast %1 : vector<1x128xf32> to vector<32x128xf32>
    %22 = arith.mulf %20, %21 : vector<32x128xf32>
    %23 = vector.broadcast %2 : vector<1x128xf32> to vector<32x128xf32>
    %24 = arith.addf %22, %23 : vector<32x128xf32>
    %25 = arith.truncf %24 : vector<32x128xf32> to vector<32x128xbf16>
    %c0_9 = arith.constant 0 : index
    %c0_10 = arith.constant 0 : index
    %26 = vector.load %arg4[%c0_9, %c0_10] : memref<128x256xbf16, #tpu.memory_space<vmem>>, vector<128x256xbf16>
    %cst_11 = arith.constant dense<0.000000e+00> : vector<32x256xf32>
    %27 = tpu.matmul %25, %26, %cst_11 {dimension_numbers = #tpu.dot_dimension_numbers<[1], [0], [0], [1], [0, 0, 1, 1], [], []>} : vector<32x128xbf16>, vector<128x256xbf16>, vector<32x256xf32> -> vector<32x256xf32>
    %c0_12 = arith.constant 0 : index
    %c0_13 = arith.constant 0 : index
    %28 = vector.load %arg5[%c0_12, %c0_13] : memref<1x256xf32, #tpu.memory_space<vmem>>, vector<1x256xf32>
    %29 = vector.broadcast %28 : vector<1x256xf32> to vector<32x256xf32>
    %30 = arith.addf %27, %29 : vector<32x256xf32>
    %cst_14 = arith.constant 0.000000e+00 : f32
    %31 = vector.broadcast %cst_14 : f32 to vector<32x256xf32>
    %32 = arith.maximumf %30, %31 : vector<32x256xf32>
    %33 = arith.truncf %32 : vector<32x256xf32> to vector<32x256xbf16>
    %c0_15 = arith.constant 0 : index
    %c0_16 = arith.constant 0 : index
    %34 = vector.load %arg6[%c0_15, %c0_16] : memref<256x128xbf16, #tpu.memory_space<vmem>>, vector<256x128xbf16>
    %cst_17 = arith.constant dense<0.000000e+00> : vector<32x128xf32>
    %35 = tpu.matmul %33, %34, %cst_17 {dimension_numbers = #tpu.dot_dimension_numbers<[1], [0], [0], [1], [0, 0, 1, 1], [], []>} : vector<32x256xbf16>, vector<256x128xbf16>, vector<32x128xf32> -> vector<32x128xf32>
    %c0_18 = arith.constant 0 : index
    %c0_19 = arith.constant 0 : index
    %36 = vector.load %arg7[%c0_18, %c0_19] : memref<1x128xf32, #tpu.memory_space<vmem>>, vector<1x128xf32>
    %37 = vector.broadcast %36 : vector<1x128xf32> to vector<32x128xf32>
    %38 = arith.addf %35, %37 : vector<32x128xf32>
    %cst_20 = arith.constant 5.000000e-01 : f32
    %39 = vector.broadcast %cst_20 : f32 to vector<32x128xf32>
    %40 = arith.mulf %39, %38 : vector<32x128xf32>
    %41 = arith.addf %0, %40 : vector<32x128xf32>
    %c0_21 = arith.constant 0 : index
    %c0_22 = arith.constant 0 : index
    %42 = vector.load %arg10[%c0_21, %c0_22] : memref<32x128xf32, #tpu.memory_space<vmem>>, vector<32x128xf32>
    tpu.vector_store %arg10[%c0_21, %c0_22], %41 {strides = array<i32>} : memref<32x128xf32, #tpu.memory_space<vmem>>, vector<32x128xf32>,
    return
  }
  func.func @transform_0(%arg0: i32) -> (i32, i32) {
    %c0_i32 = arith.constant 0 : i32
    %c0_i32_0 = arith.constant 0 : i32
    return %arg0, %c0_i32 : i32, i32
  }
  func.func @transform_1(%arg0: i32) -> (i32, i32) {
    %c0_i32 = arith.constant 0 : i32
    %c0_i32_0 = arith.constant 0 : i32
    %c0_i32_1 = arith.constant 0 : i32
    return %c0_i32, %c0_i32_0 : i32, i32
  }
  func.func @transform_2(%arg0: i32) -> (i32, i32) {
    %c0_i32 = arith.constant 0 : i32
    %c0_i32_0 = arith.constant 0 : i32
    %c0_i32_1 = arith.constant 0 : i32
    return %c0_i32, %c0_i32_0 : i32, i32
  }
  func.func @transform_3(%arg0: i32) -> (i32, i32) {
    %c0_i32 = arith.constant 0 : i32
    %c0_i32_0 = arith.constant 0 : i32
    %c0_i32_1 = arith.constant 0 : i32
    return %c0_i32, %c0_i32_0 : i32, i32
  }
  func.func @transform_4(%arg0: i32) -> (i32, i32) {
    %c0_i32 = arith.constant 0 : i32
    %c0_i32_0 = arith.constant 0 : i32
    %c0_i32_1 = arith.constant 0 : i32
    return %c0_i32, %c0_i32_0 : i32, i32
  }
  func.func @transform_5(%arg0: i32) -> (i32, i32) {
    %c0_i32 = arith.constant 0 : i32
    %c0_i32_0 = arith.constant 0 : i32
    %c0_i32_1 = arith.constant 0 : i32
    return %c0_i32, %c0_i32_0 : i32, i32
  }
  func.func @transform_6(%arg0: i32) -> (i32, i32) {
    %c0_i32 = arith.constant 0 : i32
    %c0_i32_0 = arith.constant 0 : i32
    %c0_i32_1 = arith.constant 0 : i32
    return %c0_i32, %c0_i32_0 : i32, i32
  }
  func.func @transform_7(%arg0: i32) -> (i32, i32) {
    %c0_i32 = arith.constant 0 : i32
    %c0_i32_0 = arith.constant 0 : i32
    %c0_i32_1 = arith.constant 0 : i32
    return %c0_i32, %c0_i32_0 : i32, i32
  }
  func.func @transform_8(%arg0: i32) -> (i32, i32) {
    %c0_i32 = arith.constant 0 : i32
    %c0_i32_0 = arith.constant 0 : i32
    %c0_i32_1 = arith.constant 0 : i32
    return %c0_i32, %c0_i32_0 : i32, i32
  }
  func.func @transform_9(%arg0: i32) -> (i32, i32) {
    %c0_i32 = arith.constant 0 : i32
    %c0_i32_0 = arith.constant 0 : i32
    return %arg0, %c0_i32 : i32, i32
  }
}

module attributes {stable_mosaic.version = 11 : i64} {
  func.func @ln_matmul_kernel(%arg0: i32, %arg1: memref<32x128xf32, #tpu.memory_space<vmem>>, %arg2: memref<1x128xf32, #tpu.memory_space<vmem>>, %arg3: memref<1x128xf32, #tpu.memory_space<vmem>>, %arg4: memref<128x384xbf16, #tpu.memory_space<vmem>>, %arg5: memref<1x384xf32, #tpu.memory_space<vmem>>, %arg6: memref<32x384xbf16, #tpu.memory_space<vmem>>) attributes {dimension_semantics = [#tpu.dimension_semantics<parallel>], iteration_bounds = array<i64: 1>, scalar_prefetch = 0 : i64, scratch_operands = 0 : i64, tpu.core_type = #tpu.core_type<tc>, window_params = [{transform_indices = @transform_0, window_bounds = array<i64: 32, 128>}, {pipeline_mode = #tpu.pipeline_mode<synchronous>, transform_indices = @transform_1, window_bounds = array<i64: 1, 128>}, {pipeline_mode = #tpu.pipeline_mode<synchronous>, transform_indices = @transform_2, window_bounds = array<i64: 1, 128>}, {pipeline_mode = #tpu.pipeline_mode<synchronous>, transform_indices = @transform_3, window_bounds = array<i64: 128, 384>}, {pipeline_mode = #tpu.pipeline_mode<synchronous>, transform_indices = @transform_4, window_bounds = array<i64: 1, 384>}, {transform_indices = @transform_5, window_bounds = array<i64: 32, 384>}]} {
    %c0 = arith.constant 0 : index
    %c0_0 = arith.constant 0 : index
    %0 = vector.load %arg1[%c0, %c0_0] : memref<32x128xf32, #tpu.memory_space<vmem>>, vector<32x128xf32>
    %c0_1 = arith.constant 0 : index
    %c0_2 = arith.constant 0 : index
    %1 = vector.load %arg2[%c0_1, %c0_2] : memref<1x128xf32, #tpu.memory_space<vmem>>, vector<1x128xf32>
    %c0_3 = arith.constant 0 : index
    %c0_4 = arith.constant 0 : index
    %2 = vector.load %arg3[%c0_3, %c0_4] : memref<1x128xf32, #tpu.memory_space<vmem>>, vector<1x128xf32>
    %cst = arith.constant dense<0.000000e+00> : vector<32xf32>
    %3 = vector.multi_reduction <add>, %0, %cst [1] : vector<32x128xf32> to vector<32xf32>
    %4 = vector.shape_cast %3 : vector<32xf32> to vector<32x1xf32>
    %cst_5 = arith.constant 1.280000e+02 : f32
    %5 = vector.broadcast %cst_5 : f32 to vector<32x1xf32>
    %6 = arith.divf %4, %5 : vector<32x1xf32>
    %7 = vector.broadcast %6 : vector<32x1xf32> to vector<32x128xf32>
    %8 = arith.subf %0, %7 : vector<32x128xf32>
    %9 = arith.mulf %8, %8 : vector<32x128xf32>
    %cst_6 = arith.constant dense<0.000000e+00> : vector<32xf32>
    %10 = vector.multi_reduction <add>, %9, %cst_6 [1] : vector<32x128xf32> to vector<32xf32>
    %11 = vector.shape_cast %10 : vector<32xf32> to vector<32x1xf32>
    %cst_7 = arith.constant 1.280000e+02 : f32
    %12 = vector.broadcast %cst_7 : f32 to vector<32x1xf32>
    %13 = arith.divf %11, %12 : vector<32x1xf32>
    %14 = vector.broadcast %6 : vector<32x1xf32> to vector<32x128xf32>
    %15 = arith.subf %0, %14 : vector<32x128xf32>
    %cst_8 = arith.constant 9.99999974E-6 : f32
    %16 = vector.broadcast %cst_8 : f32 to vector<32x1xf32>
    %17 = arith.addf %13, %16 : vector<32x1xf32>
    %18 = math.rsqrt %17 : vector<32x1xf32>
    %19 = vector.broadcast %18 : vector<32x1xf32> to vector<32x128xf32>
    %20 = arith.mulf %15, %19 : vector<32x128xf32>
    %21 = vector.broadcast %1 : vector<1x128xf32> to vector<32x128xf32>
    %22 = arith.mulf %20, %21 : vector<32x128xf32>
    %23 = vector.broadcast %2 : vector<1x128xf32> to vector<32x128xf32>
    %24 = arith.addf %22, %23 : vector<32x128xf32>
    %25 = arith.truncf %24 : vector<32x128xf32> to vector<32x128xbf16>
    %c0_9 = arith.constant 0 : index
    %c0_10 = arith.constant 0 : index
    %26 = vector.load %arg4[%c0_9, %c0_10] : memref<128x384xbf16, #tpu.memory_space<vmem>>, vector<128x384xbf16>
    %cst_11 = arith.constant dense<0.000000e+00> : vector<32x384xf32>
    %27 = tpu.matmul %25, %26, %cst_11 {dimension_numbers = #tpu.dot_dimension_numbers<[1], [0], [0], [1], [0, 0, 1, 1], [], []>} : vector<32x128xbf16>, vector<128x384xbf16>, vector<32x384xf32> -> vector<32x384xf32>
    %c0_12 = arith.constant 0 : index
    %c0_13 = arith.constant 0 : index
    %28 = vector.load %arg5[%c0_12, %c0_13] : memref<1x384xf32, #tpu.memory_space<vmem>>, vector<1x384xf32>
    %29 = vector.broadcast %28 : vector<1x384xf32> to vector<32x384xf32>
    %30 = arith.addf %27, %29 : vector<32x384xf32>
    %31 = arith.truncf %30 : vector<32x384xf32> to vector<32x384xbf16>
    %c0_14 = arith.constant 0 : index
    %c0_15 = arith.constant 0 : index
    %32 = vector.load %arg6[%c0_14, %c0_15] : memref<32x384xbf16, #tpu.memory_space<vmem>>, vector<32x384xbf16>
    tpu.vector_store %arg6[%c0_14, %c0_15], %31 {strides = array<i32>} : memref<32x384xbf16, #tpu.memory_space<vmem>>, vector<32x384xbf16>,
    return
  }
  func.func @transform_0(%arg0: i32) -> (i32, i32) {
    %c0_i32 = arith.constant 0 : i32
    %c0_i32_0 = arith.constant 0 : i32
    return %arg0, %c0_i32 : i32, i32
  }
  func.func @transform_1(%arg0: i32) -> (i32, i32) {
    %c0_i32 = arith.constant 0 : i32
    %c0_i32_0 = arith.constant 0 : i32
    %c0_i32_1 = arith.constant 0 : i32
    return %c0_i32, %c0_i32_0 : i32, i32
  }
  func.func @transform_2(%arg0: i32) -> (i32, i32) {
    %c0_i32 = arith.constant 0 : i32
    %c0_i32_0 = arith.constant 0 : i32
    %c0_i32_1 = arith.constant 0 : i32
    return %c0_i32, %c0_i32_0 : i32, i32
  }
  func.func @transform_3(%arg0: i32) -> (i32, i32) {
    %c0_i32 = arith.constant 0 : i32
    %c0_i32_0 = arith.constant 0 : i32
    %c0_i32_1 = arith.constant 0 : i32
    return %c0_i32, %c0_i32_0 : i32, i32
  }
  func.func @transform_4(%arg0: i32) -> (i32, i32) {
    %c0_i32 = arith.constant 0 : i32
    %c0_i32_0 = arith.constant 0 : i32
    %c0_i32_1 = arith.constant 0 : i32
    return %c0_i32, %c0_i32_0 : i32, i32
  }
  func.func @transform_5(%arg0: i32) -> (i32, i32) {
    %c0_i32 = arith.constant 0 : i32
    %c0_i32_0 = arith.constant 0 : i32
    return %arg0, %c0_i32 : i32, i32
  }
}

module attributes {stable_mosaic.version = 11 : i64} {
  func.func @linear_kernel(%arg0: i32, %arg1: memref<32x128xf32, #tpu.memory_space<vmem>>, %arg2: memref<128x128xbf16, #tpu.memory_space<vmem>>, %arg3: memref<1x128xf32, #tpu.memory_space<vmem>>, %arg4: memref<32x128xf32, #tpu.memory_space<vmem>>) attributes {dimension_semantics = [#tpu.dimension_semantics<parallel>], iteration_bounds = array<i64: 1>, scalar_prefetch = 0 : i64, scratch_operands = 0 : i64, tpu.core_type = #tpu.core_type<tc>, window_params = [{transform_indices = @transform_0, window_bounds = array<i64: 32, 128>}, {pipeline_mode = #tpu.pipeline_mode<synchronous>, transform_indices = @transform_1, window_bounds = array<i64: 128, 128>}, {pipeline_mode = #tpu.pipeline_mode<synchronous>, transform_indices = @transform_2, window_bounds = array<i64: 1, 128>}, {transform_indices = @transform_3, window_bounds = array<i64: 32, 128>}]} {
    %c0 = arith.constant 0 : index
    %c0_0 = arith.constant 0 : index
    %0 = vector.load %arg1[%c0, %c0_0] : memref<32x128xf32, #tpu.memory_space<vmem>>, vector<32x128xf32>
    %1 = arith.truncf %0 : vector<32x128xf32> to vector<32x128xbf16>
    %c0_1 = arith.constant 0 : index
    %c0_2 = arith.constant 0 : index
    %2 = vector.load %arg2[%c0_1, %c0_2] : memref<128x128xbf16, #tpu.memory_space<vmem>>, vector<128x128xbf16>
    %cst = arith.constant dense<0.000000e+00> : vector<32x128xf32>
    %3 = tpu.matmul %1, %2, %cst {dimension_numbers = #tpu.dot_dimension_numbers<[1], [0], [0], [1], [0, 0, 1, 1], [], []>} : vector<32x128xbf16>, vector<128x128xbf16>, vector<32x128xf32> -> vector<32x128xf32>
    %c0_3 = arith.constant 0 : index
    %c0_4 = arith.constant 0 : index
    %4 = vector.load %arg3[%c0_3, %c0_4] : memref<1x128xf32, #tpu.memory_space<vmem>>, vector<1x128xf32>
    %5 = vector.broadcast %4 : vector<1x128xf32> to vector<32x128xf32>
    %6 = arith.addf %3, %5 : vector<32x128xf32>
    %7 = arith.negf %6 : vector<32x128xf32>
    %8 = math.exp %7 : vector<32x128xf32>
    %cst_5 = arith.constant 1.000000e+00 : f32
    %9 = vector.broadcast %cst_5 : f32 to vector<32x128xf32>
    %10 = arith.addf %9, %8 : vector<32x128xf32>
    %11 = arith.divf %9, %10 : vector<32x128xf32>
    %c0_6 = arith.constant 0 : index
    %c0_7 = arith.constant 0 : index
    %12 = vector.load %arg4[%c0_6, %c0_7] : memref<32x128xf32, #tpu.memory_space<vmem>>, vector<32x128xf32>
    tpu.vector_store %arg4[%c0_6, %c0_7], %11 {strides = array<i32>} : memref<32x128xf32, #tpu.memory_space<vmem>>, vector<32x128xf32>,
    return
  }
  func.func @transform_0(%arg0: i32) -> (i32, i32) {
    %c0_i32 = arith.constant 0 : i32
    %c0_i32_0 = arith.constant 0 : i32
    return %arg0, %c0_i32 : i32, i32
  }
  func.func @transform_1(%arg0: i32) -> (i32, i32) {
    %c0_i32 = arith.constant 0 : i32
    %c0_i32_0 = arith.constant 0 : i32
    %c0_i32_1 = arith.constant 0 : i32
    return %c0_i32, %c0_i32_0 : i32, i32
  }
  func.func @transform_2(%arg0: i32) -> (i32, i32) {
    %c0_i32 = arith.constant 0 : i32
    %c0_i32_0 = arith.constant 0 : i32
    %c0_i32_1 = arith.constant 0 : i32
    return %c0_i32, %c0_i32_0 : i32, i32
  }
  func.func @transform_3(%arg0: i32) -> (i32, i32) {
    %c0_i32 = arith.constant 0 : i32
    %c0_i32_0 = arith.constant 0 : i32
    return %arg0, %c0_i32 : i32, i32
  }
}

</mosaic_0001>

<bundles_post_ra>
// kernel: conformer_css_forward.12
= control target key start
LH: loop header
LB: loop body
LE: loop exit
PB: predicated region body
PF: predicated region fallthrough
CT: control target
= control target key end

     0   :  { %12 = vsyncpa [#allocation3], 0  ;;  %s328_s27 = smov [#allocation2]   ;;  %s329_s29 = smov 128   ;;  %s427_s0 = inlined_call_operand.hbm [shape: f32[32,80], index: 0, kind: input, shape index: {}]   ;;  %s428_s1 = inlined_call_operand.vmem [shape: f32[1,80], index: 1, kind: input, shape index: {}]   ;;  %s429_s2 = inlined_call_operand.vmem [shape: f32[1,80], index: 2, kind: input, shape index: {}]   ;;  %s430_s3 = inlined_call_operand.vmem [shape: bf16[80,128], index: 3, kind: input, shape index: {}]   ;;  %s431_s4 = inlined_call_operand.vmem [shape: f32[1,128], index: 4, kind: input, shape index: {}]   ;;  %s432_s5 = inlined_call_operand.vmem [shape: f32[1,128], index: 5, kind: input, shape index: {}]   ;;  %s433_s6 = inlined_call_operand.vmem [shape: f32[1,128], index: 6, kind: input, shape index: {}]   ;;  %s434_s7 = inlined_call_operand.vmem [shape: f32[32,128], index: 7, kind: output, shape index: {}]  }
   0x1   :  { %s17_s26 = sshll.u32 %s427_s0, 4  ;;  %s19_s28 = sshll.u32 %s328_s27, 4  ;;  %s18_s26 = int_to_ptr.hbm [resolvable:$true] %s17_s26  ;;  %s20_s28 = int_to_ptr.vmem [resolvable:$true] %s19_s28 }
   0x2   :  { %s330_s30 = smov 8  }
   0x3   :  { %25 = dma.hbm_to_vmem [thread:$0]  %s18_s26, 512, %s20_s28, [#allocation3], %s329_s29, %s329_s29, %s330_s30  }
   0x4   :  { %326 = dma.done.wait [#allocation3], 512  }
   0x5   :  { %327 = vsyncadd [#allocation3], 4294966784  ;;  %v277_v0 = vld [vmem:[%s430_s3 + $0x20] sm:$0xff]  ;;  %v276_v1 = vld [vmem:[%s430_s3 + $0x18] sm:$0xff]  ;;  %vm109_vm0 = vcmask 654336   ;;  %v331_v30 = vmov 128.0  }
   0x6   :  { %119 = vmatpush.bf16.msra.mxu0 %v277_v0  ;;  %278 = vmatpush.bf16.msra.mxu1 %v277_v0  ;;  %v275_v2 = vld [vmem:[%s430_s3 + $0x10] sm:$0xff]  ;;  %v43_v3 = vld [vmem:[#allocation2] sm:$0xff]  ;;  %v44_v5 = vld [vmem:[#allocation2 + $0x8] sm:$0xff]  ;;  %292 = vrcp.f32 %v331_v30 }
   0x7   :  { %v287_v4 = vld [vmem:[%s428_s1] ss:$0 sm:$0xff]  ;;  %v45_v6 = vld [vmem:[#allocation2 + $0x10] sm:$0xff]  ;;  %v46_v7 = vld [vmem:[#allocation2 + $0x18] sm:$0xff] }
   0x8   :  { %v51_v8 = vadd.f32 %v287_v4, %v43_v3  ;;  %v52_v9 = vadd.f32 %v287_v4, %v44_v5  ;;  %v288_v10 = vld [vmem:[%s429_s2] ss:$0 sm:$0xff]  ;;  %v53_v11 = vadd.f32 %v287_v4, %v45_v6  ;;  %v54_v12 = vadd.f32 %v287_v4, %v46_v7  ;;  %v274_v13 = vld [vmem:[%s430_s3 + $0x8] sm:$0xff] }
   0x9   :  { %v273_v18 = vld [vmem:[%s430_s3] sm:$0xff] }
   0xa   :  { %120 = vmatpush.bf16.msra.mxu0 %v276_v1  ;;  %279 = vmatpush.bf16.msra.mxu1 %v276_v1  ;;  %v59_v14 = vmul.f32 %v288_v10, %v51_v8  ;;  %v60_v15 = vmul.f32 %v288_v10, %v52_v9  ;;  %v61_v16 = vmul.f32 %v288_v10, %v53_v11  ;;  %v289_v21 = vld [vmem:[%s431_s4] ss:$0 sm:$0xff] }
   0xb   :  { %v62_v17 = vmul.f32 %v288_v10, %v54_v12 }
   0xc   :  { %v63_v19 = vpack.c.bf16 %v60_v15, %v59_v14  ;;  %v293_v31 = vpop.eup %292  ;;  %v290_v15 = vld [vmem:[%s432_s5] ss:$0 sm:$0xff] }
   0xd   :  { %v64_v20 = vpack.c.bf16 %v62_v17, %v61_v16  ;;  %v146_v32 = vmul.f32 128.0, %v293_v31  ;;  %vm150_vm1 = vweird.f32 %v293_v31 }
   0xe   :  { %121 = vmatpush.bf16.msra.mxu0 %v275_v2  ;;  %280 = vmatpush.bf16.msra.mxu1 %v275_v2 }
   0xf   :  { %v147_v33 = vsub.f32 1.0, %v146_v32 }
  0x11   :  { %v148_v34 = vmul.f32 %v293_v31, %v147_v33 }
  0x12   :  { %122 = vmatpush.bf16.msra.mxu0 %v274_v13  ;;  %281 = vmatpush.bf16.msra.mxu1 %v274_v13 }
  0x13   :  { %v149_v35 = vadd.f32 %v293_v31, %v148_v34 }
  0x15   :  { %v151_v36 = vsel %vm150_vm1, %v293_v31, %v149_v35 }
  0x16   :  { %123 = vmatpush.bf16.msra.mxu0 %v273_v18  ;;  %282 = vmatpush.bf16.msra.mxu1 %v273_v18 }
  0x19   :  { %271 = vmatmul.msk.bf16.vlgmr.msra.gmra.mxu0 %vm109_vm0, %v63_v19  ;;  %272 = vmatmul.msk.bf16.vlgmr.msra.gmra.mxu1 %vm109_vm0, %v64_v20  ;;  %v291_v20 = vld [vmem:[%s433_s6] ss:$0 sm:$0xff] }
  0x96   :  { %v125_v22 = vpop.f32.mrf.mxu0  ;;  %v130_v23 = vpop.f32.mrf.mxu1 }
  0x97   :  { %v126_v24 = vadd.f32 %v289_v21, %v125_v22  ;;  %v131_v25 = vadd.f32 %v289_v21, %v130_v23 }
  0x99   :  { %141 = vadd.xlane.f32.xlu1 %v131_v25  ;;  %137 = vadd.xlane.f32.xlu0 %v126_v24 }
  0x9e   :  { %v127_v26 = vpop.f32.mrf.mxu0  ;;  %v132_v27 = vpop.f32.mrf.mxu1 }
  0x9f   :  { %v128_v28 = vadd.f32 %v289_v21, %v127_v26  ;;  %v133_v29 = vadd.f32 %v289_v21, %v132_v27 }
  0xa1   :  { %143 = vadd.xlane.f32.xlu1 %v133_v29  ;;  %139 = vadd.xlane.f32.xlu0 %v128_v28 }
 0x10c   :  { %v142_v37 = vpop.xlane.xlu1 %141  ;;  %v138_v38 = vpop.xlane.xlu0 %137 }
 0x10d   :  { %v154_v39 = vmul.f32 %v151_v36, %v142_v37  ;;  %v152_v40 = vmul.f32 %v151_v36, %v138_v38 }
 0x10f   :  { %v158_v41 = vsub.f32 %v131_v25, %v154_v39  ;;  %v156_v42 = vsub.f32 %v126_v24, %v152_v40 }
 0x111   :  { %v162_v43 = vmul.f32 %v158_v41, %v158_v41  ;;  %v160_v44 = vmul.f32 %v156_v42, %v156_v42 }
 0x113   :  { %168 = vadd.xlane.f32.xlu0 %v162_v43  ;;  %164 = vadd.xlane.f32.xlu2 %v160_v44 }
 0x114   :  { %v144_v45 = vpop.xlane.xlu1 %143  ;;  %v140_v46 = vpop.xlane.xlu0 %139 }
 0x115   :  { %v155_v47 = vmul.f32 %v151_v36, %v144_v45  ;;  %v153_v48 = vmul.f32 %v151_v36, %v140_v46 }
 0x117   :  { %v399_v49 = vsub.f32 %v133_v29, %v155_v47  ;;  %v401_v50 = vsub.f32 %v128_v28, %v153_v48 }
 0x119   :  { %v163_v51 = vmul.f32 %v399_v49, %v399_v49  ;;  %v161_v52 = vmul.f32 %v401_v50, %v401_v50 }
 0x11b   :  { %170 = vadd.xlane.f32.xlu1 %v163_v51  ;;  %166 = vadd.xlane.f32.xlu2 %v161_v52 }
 0x186   :  { %v165_v53 = vpop.xlane.xlu2 %164  ;;  %v169_v54 = vpop.xlane.xlu0 %168 }
 0x187   :  { %v172_v55 = vmul.f32 %v165_v53, %v151_v36  ;;  %v174_v56 = vmul.f32 %v169_v54, %v151_v36 }
 0x189   :  { %v176_v57 = vadd.f32 1e-05, %v172_v55  ;;  %v178_v58 = vadd.f32 1e-05, %v174_v56 }
 0x18b   :  { %294 = vrsqrt.f32 %v176_v57  ;;  %vm186_vm4 = vweird.f32 %v176_v57  ;;  %vm206_vm6 = vweird.f32 %v178_v58 }
 0x18c   :  { %296 = vrsqrt.f32 %v178_v58 }
 0x18e   :  { %v171_v59 = vpop.xlane.xlu1 %170  ;;  %v167_v60 = vpop.xlane.xlu2 %166 }
 0x18f   :  { %v175_v61 = vmul.f32 %v171_v59, %v151_v36  ;;  %v173_v62 = vmul.f32 %v167_v60, %v151_v36 }
 0x191   :  { %v295_v63 = vpop.eup %294  ;;  %v179_v0 = vadd.f32 1e-05, %v175_v61  ;;  %v177_v1 = vadd.f32 1e-05, %v173_v62 }
 0x192   :  { %v297_v2 = vpop.eup %296  ;;  %v181_v3 = vmul.f32 %v295_v63, %v176_v57  ;;  %vm187_vm2 = vweird.f32 %v295_v63 }
 0x193   :  { %v201_v4 = vmul.f32 %v297_v2, %v178_v58  ;;  %298 = vrsqrt.f32 %v179_v0  ;;  %vm207_vm3 = vweird.f32 %v297_v2  ;;  %vm188_vm5 = vmor %vm186_vm4, %vm187_vm2  ;;  %vm216_vm10 = vweird.f32 %v179_v0 }
 0x194   :  { %v182_v5 = vmul.f32 %v295_v63, %v181_v3  ;;  %300 = vrsqrt.f32 %v177_v1  ;;  %vm208_vm7 = vmor %vm206_vm6, %vm207_vm3  ;;  %vm196_vm12 = vweird.f32 %v177_v1 }
 0x195   :  { %v202_v6 = vmul.f32 %v297_v2, %v201_v4 }
 0x196   :  { %v183_v7 = vmul.f32 0.5, %v182_v5 }
 0x197   :  { %v203_v8 = vmul.f32 0.5, %v202_v6 }
 0x198   :  { %v184_v9 = vsub.f32 1.5, %v183_v7 }
 0x199   :  { %v299_v10 = vpop.eup %298  ;;  %v204_v11 = vsub.f32 1.5, %v203_v8 }
 0x19a   :  { %v301_v12 = vpop.eup %300  ;;  %v185_v13 = vmul.f32 %v295_v63, %v184_v9  ;;  %v211_v14 = vmul.f32 %v299_v10, %v179_v0  ;;  %vm217_vm8 = vweird.f32 %v299_v10 }
 0x19b   :  { %v205_v16 = vmul.f32 %v297_v2, %v204_v11  ;;  %v191_v17 = vmul.f32 %v301_v12, %v177_v1  ;;  %vm197_vm9 = vweird.f32 %v301_v12  ;;  %vm218_vm11 = vmor %vm216_vm10, %vm217_vm8 }
 0x19c   :  { %v189_v18 = vsel %vm188_vm5, %v295_v63, %v185_v13  ;;  %v212_v19 = vmul.f32 %v299_v10, %v211_v14  ;;  %vm198_vm13 = vmor %vm196_vm12, %vm197_vm9 }
 0x19d   :  { %v220_v21 = vmul.f32 %v189_v18, %v156_v42  ;;  %v209_v22 = vsel %vm208_vm7, %v297_v2, %v205_v16  ;;  %v192_v23 = vmul.f32 %v301_v12, %v191_v17 }
 0x19e   :  { %v222_v24 = vmul.f32 %v209_v22, %v158_v41  ;;  %v213_v25 = vmul.f32 0.5, %v212_v19 }
 0x19f   :  { %v227_v26 = vmul.f32 %v290_v15, %v220_v21  ;;  %v193_v27 = vmul.f32 0.5, %v192_v23 }
 0x1a0   :  { %v229_v28 = vmul.f32 %v290_v15, %v222_v24  ;;  %v214_v29 = vsub.f32 1.5, %v213_v25 }
 0x1a1   :  { %v234_v30 = vadd.f32 %v291_v20, %v227_v26  ;;  %v194_v31 = vsub.f32 1.5, %v193_v27 }
 0x1a2   :  { %v236_v32 = vadd.f32 %v291_v20, %v229_v28  ;;  %v215_v33 = vmul.f32 %v299_v10, %v214_v29 }
 0x1a3   :  { %v238_v34 = vmax.f32 %v234_v30, 0.0  ;;  %v195_v35 = vmul.f32 %v301_v12, %v194_v31 }
 0x1a4   :  { %v240_v36 = vmax.f32 %v236_v32, 0.0  ;;  %v219_v37 = vsel %vm218_vm11, %v299_v10, %v215_v33 }
 0x1a5   :  { %242 = vst [vmem:[%s434_s7] sm:$0xff] %v238_v34  ;;  %v223_v38 = vmul.f32 %v219_v37, %v399_v49  ;;  %v199_v39 = vsel %vm198_vm13, %v301_v12, %v195_v35 }
 0x1a6   :  { %244 = vst [vmem:[%s434_s7 + $0x10] sm:$0xff] %v240_v36  ;;  %v221_v40 = vmul.f32 %v199_v39, %v401_v50 }
 0x1a7   :  { %v230_v41 = vmul.f32 %v290_v15, %v223_v38 }
 0x1a8   :  { %v228_v42 = vmul.f32 %v290_v15, %v221_v40 }
 0x1a9   :  { %v237_v43 = vadd.f32 %v291_v20, %v230_v41 }
 0x1aa   :  { %v235_v44 = vadd.f32 %v291_v20, %v228_v42 }
 0x1ab   :  { %v241_v45 = vmax.f32 %v237_v43, 0.0 }
 0x1ac   :  { %v239_v46 = vmax.f32 %v235_v44, 0.0 }
 0x1ad   :  { %245 = vst [vmem:[%s434_s7 + $0x18] sm:$0xff] %v241_v45 }
 0x1ae   :  { %243 = vst [vmem:[%s434_s7 + $0x8] sm:$0xff] %v239_v46 }
 0x1af   :  { %250 = vsyncpa [#allocation3], 1 }

// kernel: conformer_css_forward.13
= control target key start
LH: loop header
LB: loop body
LE: loop exit
PB: predicated region body
PF: predicated region fallthrough
CT: control target
= control target key end

     0   :  { %14 = vsyncpa [#allocation3], 0  ;;  %s906_s0 = inlined_call_operand.vmem [shape: f32[32,128], index: 0, kind: input, shape index: {}]   ;;  %s907_s1 = inlined_call_operand.vmem [shape: f32[1,128], index: 1, kind: input, shape index: {}]   ;;  %s908_s2 = inlined_call_operand.vmem [shape: f32[1,128], index: 2, kind: input, shape index: {}]   ;;  %s909_s3 = inlined_call_operand.hbm [shape: bf16[128,256], index: 3, kind: input, shape index: {}]   ;;  %s910_s4 = inlined_call_operand.vmem [shape: f32[1,256], index: 4, kind: input, shape index: {}]   ;;  %s911_s5 = inlined_call_operand.hbm [shape: bf16[256,128], index: 5, kind: input, shape index: {}]   ;;  %s912_s6 = inlined_call_operand.vmem [shape: f32[1,128], index: 6, kind: input, shape index: {}]   ;;  %s913_s7 = inlined_call_operand.vmem [shape: f32[1,128], index: 7, kind: input, shape index: {}]   ;;  %s914_s8 = inlined_call_operand.vmem [shape: f32[1,128], index: 8, kind: input, shape index: {}]   ;;  %s915_s9 = inlined_call_operand.vmem [shape: f32[32,128], index: 9, kind: output, shape index: {}]  }
   0x1   :  { %s26_s11 = sshll.u32 %s909_s3, 4  ;;  %s27_s11 = int_to_ptr.hbm [resolvable:$true] %s26_s11 }
   0x2   :  { %15 = vsyncpa [#allocation5], 0  ;;  %s745_s12 = smov [#allocation2]   ;;  %s41_s7 = sshll.u32 %s911_s5, 4  ;;  %s42_s7 = int_to_ptr.hbm [resolvable:$true] %s41_s7 }
   0x3   :  { %s28_s13 = sshll.u32 %s745_s12, 4  ;;  %s746_s16 = smov 128   ;;  %s29_s13 = int_to_ptr.vmem [resolvable:$true] %s28_s13 }
   0x4   :  { %s747_s17 = smov 8   ;;  %s748_s8 = smov [#allocation4]  }
   0x5   :  { %34 = dma.hbm_to_vmem [thread:$0]  %s27_s11, 2048, %s29_s13, [#allocation3], %s746_s16, %s746_s16, %s747_s17  }
   0x6   :  { %s43_s18 = sshll.u32 %s748_s8, 4  ;;  %s749_s19 = smov 64   ;;  %s44_s18 = int_to_ptr.vmem [resolvable:$true] %s43_s18 }
   0x7   :  { %s750_s20 = smov 4  }
   0x8   :  { %49 = dma.hbm_to_vmem [thread:$0]  %s42_s7, 2048, %s44_s18, [#allocation5], %s749_s19, %s749_s19, %s750_s20  }
   0x9   :  { %741 = dma.done.wait [#allocation3], 2048  }
   0xa   :  { %742 = vsyncadd [#allocation3], 4294965248 }
   0xb   :  { %743 = dma.done.wait [#allocation5], 2048  }
   0xc   :  { %744 = vsyncadd [#allocation5], 4294965248  ;;  %v811_v0 = vld [vmem:[%s906_s0 + $0x10] sm:$0xff]  ;;  %v816_v1 = vld [vmem:[%s906_s0] sm:$0xff]  ;;  %v751_v4 = vmov 128.0  }
   0xd   :  { %74 = vadd.xlane.f32.xlu1 %v811_v0  ;;  %70 = vadd.xlane.f32.xlu0 %v816_v1  ;;  %v823_v2 = vld [vmem:[%s906_s0 + $0x18] sm:$0xff]  ;;  %v828_v3 = vld [vmem:[%s906_s0 + $0x8] sm:$0xff]  ;;  %683 = vrcp.f32 %v751_v4  ;;  %v571_v27 = vld [vmem:[#allocation2 + $0x70] sm:$0xf] }
   0xe   :  { %v656_v28 = vld [vmem:[#allocation2 + $0x74] sm:$0xf0]  ;;  %v655_v29 = vld [vmem:[#allocation2 + $0x74] sm:$0xf]  ;;  %v573_v31 = vld [vmem:[#allocation2 + $0x78] sm:$0xf0] }
   0xf   :  { %v572_v30 = vor.u32 %v656_v28, %v571_v27  ;;  %v576_v32 = vor.u32 %v655_v29, %v573_v31  ;;  %v563_v33 = vld [vmem:[#allocation2 + $0x60] sm:$0xf]  ;;  %v654_v34 = vld [vmem:[#allocation2 + $0x64] sm:$0xf0]  ;;  %v653_v35 = vld [vmem:[#allocation2 + $0x64] sm:$0xf] }
  0x10   :  { %v564_v36 = vor.u32 %v654_v34, %v563_v33  ;;  %v565_v37 = vld [vmem:[#allocation2 + $0x68] sm:$0xf0]  ;;  %v555_v39 = vld [vmem:[#allocation2 + $0x50] sm:$0xf]  ;;  %v652_v40 = vld [vmem:[#allocation2 + $0x54] sm:$0xf0] }
  0x11   :  { %275 = vmatpush.bf16.msra.mxu0 %v572_v30  ;;  %294 = vmatpush.bf16.msra.mxu1 %v576_v32  ;;  %v568_v38 = vor.u32 %v653_v35, %v565_v37  ;;  %v651_v41 = vld [vmem:[#allocation2 + $0x54] sm:$0xf]  ;;  %v556_v42 = vor.u32 %v652_v40, %v555_v39  ;;  %v557_v43 = vld [vmem:[#allocation2 + $0x58] sm:$0xf0]  ;;  %v547_v45 = vld [vmem:[#allocation2 + $0x40] sm:$0xf] }
  0x12   :  { %v560_v44 = vor.u32 %v651_v41, %v557_v43  ;;  %v650_v46 = vld [vmem:[#allocation2 + $0x44] sm:$0xf0]  ;;  %v649_v47 = vld [vmem:[#allocation2 + $0x44] sm:$0xf]  ;;  %v549_v49 = vld [vmem:[#allocation2 + $0x48] sm:$0xf0] }
  0x13   :  { %v684_v5 = vpop.eup %683  ;;  %v548_v48 = vor.u32 %v650_v46, %v547_v45  ;;  %v552_v50 = vor.u32 %v649_v47, %v549_v49  ;;  %v539_v51 = vld [vmem:[#allocation2 + $0x30] sm:$0xf]  ;;  %v648_v52 = vld [vmem:[#allocation2 + $0x34] sm:$0xf0]  ;;  %v647_v53 = vld [vmem:[#allocation2 + $0x34] sm:$0xf] }
  0x14   :  { %v79_v6 = vmul.f32 128.0, %v684_v5  ;;  %vm83_vm0 = vweird.f32 %v684_v5  ;;  %v540_v54 = vor.u32 %v648_v52, %v539_v51  ;;  %v541_v55 = vld [vmem:[#allocation2 + $0x38] sm:$0xf0]  ;;  %v531_v57 = vld [vmem:[#allocation2 + $0x20] sm:$0xf]  ;;  %v671_v51 = vld [vmem:[#allocation4 + $0x70] sm:$0xff] }
  0x15   :  { %76 = vadd.xlane.f32.xlu1 %v823_v2  ;;  %72 = vadd.xlane.f32.xlu0 %v828_v3  ;;  %v544_v56 = vor.u32 %v647_v53, %v541_v55  ;;  %v646_v58 = vld [vmem:[#allocation2 + $0x24] sm:$0xf0]  ;;  %v645_v59 = vld [vmem:[#allocation2 + $0x24] sm:$0xf]  ;;  %v533_v61 = vld [vmem:[#allocation2 + $0x28] sm:$0xf0] }
  0x16   :  { %v80_v7 = vsub.f32 1.0, %v79_v6  ;;  %276 = vmatpush.bf16.msra.mxu0 %v564_v36  ;;  %295 = vmatpush.bf16.msra.mxu1 %v568_v38  ;;  %v532_v60 = vor.u32 %v646_v58, %v531_v57  ;;  %v536_v62 = vor.u32 %v645_v59, %v533_v61  ;;  %v523_v63 = vld [vmem:[#allocation2 + $0x10] sm:$0xf]  ;;  %v644_v4 = vld [vmem:[#allocation2 + $0x14] sm:$0xf0]  ;;  %v662_v58 = vld [vmem:[#allocation4 + $0x28] sm:$0xff] }
  0x17   :  { %v524_v6 = vor.u32 %v644_v4, %v523_v63  ;;  %v664_v45 = vld [vmem:[#allocation4 + $0x38] sm:$0xff]  ;;  %v680_v55 = vld [vmem:[%s907_s1] ss:$0 sm:$0xff]  ;;  %v670_v59 = vld [vmem:[#allocation4 + $0x68] sm:$0xff] }
  0x18   :  { %v81_v8 = vmul.f32 %v684_v5, %v80_v7  ;;  %v525_v7 = vld [vmem:[#allocation2 + $0x18] sm:$0xf0]  ;;  %457 = vmatpush.bf16.msra.mxu2 %v664_v45 }
  0x19   :  { %v672_v46 = vld [vmem:[#allocation4 + $0x78] sm:$0xff] }
  0x1a   :  { %v82_v9 = vadd.f32 %v684_v5, %v81_v8  ;;  %277 = vmatpush.bf16.msra.mxu0 %v556_v42  ;;  %296 = vmatpush.bf16.msra.mxu1 %v560_v44  ;;  %v515_v8 = vld [vmem:[#allocation2] sm:$0xf] }
  0x1b   :  { %476 = vmatpush.bf16.msra.mxu3 %v672_v46 }
  0x1c   :  { %v832_v10 = vsel %vm83_vm0, %v684_v5, %v82_v9  ;;  %v643_v5 = vld [vmem:[#allocation2 + $0x14] sm:$0xf]  ;;  %v642_v9 = vld [vmem:[#allocation2 + $0x4] sm:$0xf0] }
  0x1e   :  { %278 = vmatpush.bf16.msra.mxu0 %v548_v48  ;;  %297 = vmatpush.bf16.msra.mxu1 %v552_v50  ;;  %v663_v50 = vld [vmem:[#allocation4 + $0x30] sm:$0xff] }
  0x1f   :  { %458 = vmatpush.bf16.msra.mxu2 %v663_v50  ;;  %477 = vmatpush.bf16.msra.mxu3 %v671_v51 }
  0x22   :  { %279 = vmatpush.bf16.msra.mxu0 %v540_v54  ;;  %298 = vmatpush.bf16.msra.mxu1 %v544_v56 }
  0x23   :  { %459 = vmatpush.bf16.msra.mxu2 %v662_v58  ;;  %478 = vmatpush.bf16.msra.mxu3 %v670_v59 }
  0x26   :  { %280 = vmatpush.bf16.msra.mxu0 %v532_v60  ;;  %299 = vmatpush.bf16.msra.mxu1 %v536_v62 }
  0x2a   :  { %281 = vmatpush.bf16.msra.mxu0 %v524_v6  ;;  %v661_v6 = vld [vmem:[#allocation4 + $0x20] sm:$0xff] }
  0x2b   :  { %460 = vmatpush.bf16.msra.mxu2 %v661_v6 }
  0x80   :  { %v75_v11 = vpop.xlane.xlu1 %74  ;;  %v71_v12 = vpop.xlane.xlu0 %70 }
  0x81   :  { %v87_v13 = vmul.f32 %v832_v10, %v75_v11  ;;  %v85_v14 = vmul.f32 %v832_v10, %v71_v12  ;;  %v528_v11 = vor.u32 %v643_v5, %v525_v7  ;;  %v641_v12 = vld [vmem:[#allocation2 + $0x4] sm:$0xf] }
  0x82   :  { %v669_v7 = vld [vmem:[#allocation4 + $0x60] sm:$0xff] }
  0x83   :  { %v837_v15 = vsub.f32 %v811_v0, %v87_v13  ;;  %v840_v16 = vsub.f32 %v816_v1, %v85_v14  ;;  %v517_v13 = vld [vmem:[#allocation2 + $0x8] sm:$0xf0]  ;;  %300 = vmatpush.bf16.msra.mxu1 %v528_v11  ;;  %479 = vmatpush.bf16.msra.mxu3 %v669_v7 }
  0x85   :  { %v95_v17 = vmul.f32 %v837_v15, %v837_v15  ;;  %v93_v18 = vmul.f32 %v840_v16, %v840_v16 }
  0x87   :  { %101 = vadd.xlane.f32.xlu0 %v95_v17  ;;  %97 = vadd.xlane.f32.xlu2 %v93_v18 }
  0x88   :  { %v77_v19 = vpop.xlane.xlu1 %76  ;;  %v73_v20 = vpop.xlane.xlu0 %72 }
  0x89   :  { %v88_v21 = vmul.f32 %v832_v10, %v77_v19  ;;  %v86_v22 = vmul.f32 %v832_v10, %v73_v20  ;;  %v516_v19 = vor.u32 %v642_v9, %v515_v8  ;;  %v520_v20 = vor.u32 %v641_v12, %v517_v13 }
  0x8b   :  { %v849_v23 = vsub.f32 %v823_v2, %v88_v21  ;;  %v852_v24 = vsub.f32 %v828_v3, %v86_v22  ;;  %282 = vmatpush.bf16.msra.mxu0 %v516_v19  ;;  %301 = vmatpush.bf16.msra.mxu1 %v520_v20 }
  0x8d   :  { %v96_v25 = vmul.f32 %v849_v23, %v849_v23  ;;  %v94_v26 = vmul.f32 %v852_v24, %v852_v24 }
  0x8f   :  { %103 = vadd.xlane.f32.xlu1 %v96_v25  ;;  %99 = vadd.xlane.f32.xlu2 %v94_v26 }
  0xfa   :  { %v98_v14 = vpop.xlane.xlu2 %97  ;;  %v102_v18 = vpop.xlane.xlu0 %101 }
  0xfb   :  { %v105_v17 = vmul.f32 %v98_v14, %v832_v10  ;;  %v107_v22 = vmul.f32 %v102_v18, %v832_v10 }
  0xfd   :  { %v109_v21 = vadd.f32 1e-05, %v105_v17  ;;  %v860_v25 = vadd.f32 1e-05, %v107_v22 }
  0xff   :  { %685 = vrsqrt.f32 %v109_v21  ;;  %vm119_vm2 = vweird.f32 %v109_v21  ;;  %vm139_vm9 = vweird.f32 %v860_v25 }
 0x100   :  { %687 = vrsqrt.f32 %v860_v25 }
 0x102   :  { %v104_v26 = vpop.xlane.xlu1 %103  ;;  %v100_v27 = vpop.xlane.xlu2 %99 }
 0x103   :  { %v108_v28 = vmul.f32 %v104_v26, %v832_v10  ;;  %v106_v29 = vmul.f32 %v100_v27, %v832_v10  ;;  %v660_v26 = vld [vmem:[#allocation4 + $0x18] sm:$0xff] }
 0x104   :  { %v668_v27 = vld [vmem:[#allocation4 + $0x58] sm:$0xff]  ;;  %461 = vmatpush.bf16.msra.mxu2 %v660_v26 }
 0x105   :  { %v686_v30 = vpop.eup %685  ;;  %v112_v31 = vadd.f32 1e-05, %v108_v28  ;;  %v110_v32 = vadd.f32 1e-05, %v106_v29  ;;  %480 = vmatpush.bf16.msra.mxu3 %v668_v27  ;;  %v659_v28 = vld [vmem:[#allocation4 + $0x10] sm:$0xff] }
 0x106   :  { %v114_v33 = vmul.f32 %v686_v30, %v109_v21  ;;  %v865_v36 = vpop.eup %687  ;;  %vm120_vm1 = vweird.f32 %v686_v30  ;;  %v667_v29 = vld [vmem:[#allocation4 + $0x50] sm:$0xff] }
 0x107   :  { %689 = vrsqrt.f32 %v112_v31  ;;  %v134_v10 = vmul.f32 %v865_v36, %v860_v25  ;;  %vm121_vm3 = vmor %vm119_vm2, %vm120_vm1  ;;  %vm129_vm5 = vweird.f32 %v110_v32  ;;  %vm149_vm7 = vweird.f32 %v112_v31 }
 0x108   :  { %v115_v34 = vmul.f32 %v686_v30, %v114_v33  ;;  %691 = vrsqrt.f32 %v110_v32  ;;  %vm140_vm10 = vweird.f32 %v865_v36  ;;  %462 = vmatpush.bf16.msra.mxu2 %v659_v28 }
 0x109   :  { %v135_v47 = vmul.f32 %v865_v36, %v134_v10  ;;  %vm141_vm12 = vmor %vm139_vm9, %vm140_vm10  ;;  %481 = vmatpush.bf16.msra.mxu3 %v667_v29 }
 0x10a   :  { %v116_v35 = vmul.f32 0.5, %v115_v34 }
 0x10b   :  { %v136_v56 = vmul.f32 0.5, %v135_v47 }
 0x10c   :  { %v117_v37 = vsub.f32 1.5, %v116_v35 }
 0x10d   :  { %v690_v38 = vpop.eup %689  ;;  %v137_v4 = vsub.f32 1.5, %v136_v56 }
 0x10e   :  { %v692_v39 = vpop.eup %691  ;;  %v144_v40 = vmul.f32 %v690_v38, %v112_v31  ;;  %v118_v41 = vmul.f32 %v686_v30, %v117_v37  ;;  %vm150_vm8 = vweird.f32 %v690_v38  ;;  %v666_v31 = vld [vmem:[#allocation4 + $0x48] sm:$0xff] }
 0x10f   :  { %v124_v42 = vmul.f32 %v692_v39, %v110_v32  ;;  %vm130_vm4 = vweird.f32 %v692_v39  ;;  %vm151_vm11 = vmor %vm149_vm7, %vm150_vm8  ;;  %v138_v11 = vmul.f32 %v865_v36, %v137_v4  ;;  %482 = vmatpush.bf16.msra.mxu3 %v666_v31  ;;  %v189_v32 = vld [vmem:[%s910_s4] sm:$0x3] }
 0x110   :  { %v145_v43 = vmul.f32 %v690_v38, %v144_v40  ;;  %v122_v49 = vsel %vm121_vm3, %v686_v30, %v118_v41  ;;  %vm131_vm6 = vmor %vm129_vm5, %vm130_vm4  ;;  %v658_v30 = vld [vmem:[#allocation4 + $0x8] sm:$0xff]  ;;  %v191_v35 = vperm.slane %v189_v32, 0 }
 0x111   :  { %v125_v44 = vmul.f32 %v692_v39, %v124_v42  ;;  %v153_v54 = vmul.f32 %v122_v49, %v840_v16  ;;  %v681_v16 = vld [vmem:[%s908_s2] ss:$0 sm:$0xff]  ;;  %v142_v14 = vsel %vm141_vm12, %v865_v36, %v138_v11  ;;  %463 = vmatpush.bf16.msra.mxu2 %v658_v30  ;;  %v192_v36 = vperm.slane %v189_v32, 1 }
 0x112   :  { %v146_v52 = vmul.f32 0.5, %v145_v43  ;;  %v155_v18 = vmul.f32 %v142_v14, %v837_v15  ;;  %v657_v15 = vld [vmem:[#allocation4] sm:$0xff] }
 0x113   :  { %v126_v48 = vmul.f32 0.5, %v125_v44  ;;  %v160_v63 = vmul.f32 %v680_v55, %v153_v54 }
 0x114   :  { %v147_v60 = vsub.f32 1.5, %v146_v52  ;;  %v162_v20 = vmul.f32 %v680_v55, %v155_v18 }
 0x115   :  { %v127_v53 = vsub.f32 1.5, %v126_v48  ;;  %464 = vmatpush.bf16.msra.mxu2 %v657_v15 }
 0x116   :  { %v148_v8 = vmul.f32 %v690_v38, %v147_v60  ;;  %v169_v22 = vadd.f32 %v681_v16, %v162_v20 }
 0x117   :  { %v128_v57 = vmul.f32 %v692_v39, %v127_v53 }
 0x118   :  { %v152_v13 = vsel %vm151_vm11, %v690_v38, %v148_v8 }
 0x119   :  { %v132_v61 = vsel %vm131_vm6, %v692_v39, %v128_v57  ;;  %v156_v17 = vmul.f32 %v152_v13, %v849_v23  ;;  %v665_v23 = vld [vmem:[#allocation4 + $0x40] sm:$0xff] }
 0x11a   :  { %v154_v62 = vmul.f32 %v132_v61, %v852_v24  ;;  %v167_v24 = vadd.f32 %v681_v16, %v160_v63  ;;  %483 = vmatpush.bf16.msra.mxu3 %v665_v23 }
 0x11b   :  { %v163_v19 = vmul.f32 %v680_v55, %v156_v17 }
 0x11c   :  { %v161_v5 = vmul.f32 %v680_v55, %v154_v62  ;;  %v682_v62 = vld [vmem:[%s912_s6] ss:$0 sm:$0xff] }
 0x11d   :  { %v170_v21 = vadd.f32 %v681_v16, %v163_v19 }
 0x11e   :  { %v168_v9 = vadd.f32 %v681_v16, %v161_v5 }
 0x11f   :  { %v172_v25 = vpack.c.bf16 %v170_v21, %v169_v22 }
 0x120   :  { %v171_v12 = vpack.c.bf16 %v168_v9, %v167_v24 }
 0x122   :  { %283 = vmatmul.bf16.vlgmr.msra.gmra.mxu0 %v171_v12  ;;  %302 = vmatmul.bf16.vlgmr.msra.gmra.mxu1 %v171_v12 }
 0x132   :  { %288 = vmatmul.bf16.gmra.mxu0 %v172_v25  ;;  %307 = vmatmul.bf16.gmra.mxu1 %v172_v25 }
 0x19f   :  { %v284_v33 = vpop.f32.mrf.mxu0  ;;  %v303_v34 = vpop.f32.mrf.mxu1 }
 0x1a0   :  { %v285_v37 = vadd.f32 %v284_v33, %v191_v35  ;;  %v304_v38 = vadd.f32 %v303_v34, %v192_v36 }
 0x1a2   :  { %v313_v42 = vmax.f32 %v285_v37, 0.0  ;;  %v314_v43 = vmax.f32 %v304_v38, 0.0 }
 0x1a7   :  { %v286_v39 = vpop.f32.mrf.mxu0  ;;  %v305_v40 = vpop.f32.mrf.mxu1 }
 0x1a8   :  { %v287_v41 = vadd.f32 %v286_v39, %v191_v35  ;;  %v306_v10 = vadd.f32 %v305_v40, %v192_v36 }
 0x1aa   :  { %v315_v44 = vmax.f32 %v287_v41, 0.0  ;;  %v316_v45 = vmax.f32 %v306_v10, 0.0 }
 0x1ac   :  { %v321_v46 = vpack.c.bf16 %v315_v44, %v313_v42  ;;  %v322_v47 = vpack.c.bf16 %v316_v45, %v314_v43 }
 0x1ae   :  { %465 = vmatmul.bf16.vlgmr.msra.gmra.mxu2 %v321_v46  ;;  %484 = vmatmul.bf16.vlgmr.msra.gmra.mxu3 %v322_v47 }
 0x1af   :  { %v289_v48 = vpop.f32.mrf.mxu0  ;;  %v308_v49 = vpop.f32.mrf.mxu1 }
 0x1b0   :  { %v290_v50 = vadd.f32 %v289_v48, %v191_v35  ;;  %v309_v51 = vadd.f32 %v308_v49, %v192_v36 }
 0x1b2   :  { %v317_v56 = vmax.f32 %v290_v50, 0.0  ;;  %v318_v57 = vmax.f32 %v309_v51, 0.0 }
 0x1b7   :  { %v291_v52 = vpop.f32.mrf.mxu0  ;;  %v310_v53 = vpop.f32.mrf.mxu1 }
 0x1b8   :  { %v292_v54 = vadd.f32 %v291_v52, %v191_v35  ;;  %v311_v55 = vadd.f32 %v310_v53, %v192_v36 }
 0x1ba   :  { %v319_v58 = vmax.f32 %v292_v54, 0.0  ;;  %v320_v59 = vmax.f32 %v311_v55, 0.0 }
 0x1bc   :  { %v323_v60 = vpack.c.bf16 %v319_v58, %v317_v56  ;;  %v324_v61 = vpack.c.bf16 %v320_v59, %v318_v57 }
 0x1be   :  { %470 = vmatmul.bf16.gmra.mxu2 %v323_v60  ;;  %489 = vmatmul.bf16.gmra.mxu3 %v324_v61 }
 0x231   :  { %v466_v63 = vpop.f32.mrf.mxu2  ;;  %v485_v16 = vpop.f32.mrf.mxu3 }
 0x232   :  { %v467_v4 = vadd.f32 %v682_v62, %v466_v63 }
 0x234   :  { %v486_v5 = vadd.f32 %v485_v16, %v467_v4 }
 0x236   :  { %v495_v6 = vmul.f32 0.5, %v486_v5 }
 0x238   :  { %v499_v7 = vadd.f32 %v495_v6, %v816_v1 }
 0x239   :  { %v468_v8 = vpop.f32.mrf.mxu2  ;;  %v487_v24 = vpop.f32.mrf.mxu3 }
 0x23a   :  { %503 = vst [vmem:[%s915_s9] sm:$0xff] %v499_v7  ;;  %v469_v9 = vadd.f32 %v682_v62, %v468_v8 }
 0x23c   :  { %v488_v11 = vadd.f32 %v487_v24, %v469_v9 }
 0x23e   :  { %v496_v12 = vmul.f32 0.5, %v488_v11 }
 0x240   :  { %v500_v13 = vadd.f32 %v496_v12, %v828_v3 }
 0x241   :  { %v471_v14 = vpop.f32.mrf.mxu2  ;;  %v490_v17 = vpop.f32.mrf.mxu3 }
 0x242   :  { %504 = vst [vmem:[%s915_s9 + $0x8] sm:$0xff] %v500_v13  ;;  %v472_v18 = vadd.f32 %v682_v62, %v471_v14 }
 0x244   :  { %v491_v19 = vadd.f32 %v490_v17, %v472_v18 }
 0x246   :  { %v497_v1 = vmul.f32 0.5, %v491_v19 }
 0x248   :  { %v501_v20 = vadd.f32 %v497_v1, %v811_v0 }
 0x249   :  { %v473_v21 = vpop.f32.mrf.mxu2  ;;  %v492_v25 = vpop.f32.mrf.mxu3 }
 0x24a   :  { %505 = vst [vmem:[%s915_s9 + $0x10] sm:$0xff] %v501_v20  ;;  %v474_v22 = vadd.f32 %v682_v62, %v473_v21 }
 0x24c   :  { %v493_v26 = vadd.f32 %v492_v25, %v474_v22 }
 0x24e   :  { %v498_v3 = vmul.f32 0.5, %v493_v26 }
 0x250   :  { %v502_v27 = vadd.f32 %v498_v3, %v823_v2 }
 0x252   :  { %506 = vst [vmem:[%s915_s9 + $0x18] sm:$0xff] %v502_v27 }
 0x253   :  { %511 = vsyncpa [#allocation3], 1 }
 0x254   :  { %512 = vsyncpa [#allocation5], 1 }

// kernel: conformer_css_forward.14
= control target key start
LH: loop header
LB: loop body
LE: loop exit
PB: predicated region body
PF: predicated region fallthrough
CT: control target
= control target key end

     0   :  { %10 = vsyncpa [#allocation3], 0  ;;  %s561_s21 = smov [#allocation2]   ;;  %s562_s23 = smov 192   ;;  %s673_s0 = inlined_call_operand.vmem [shape: f32[32,128], index: 0, kind: input, shape index: {}]   ;;  %s674_s1 = inlined_call_operand.vmem [shape: f32[1,128], index: 1, kind: input, shape index: {}]   ;;  %s675_s2 = inlined_call_operand.vmem [shape: f32[1,128], index: 2, kind: input, shape index: {}]   ;;  %s676_s3 = inlined_call_operand.hbm [shape: bf16[128,384], index: 3, kind: input, shape index: {}]   ;;  %s677_s4 = inlined_call_operand.vmem [shape: f32[1,384], index: 4, kind: input, shape index: {}]   ;;  %s678_s5 = inlined_call_operand.vmem [shape: bf16[32,384], index: 5, kind: output, shape index: {}]  }
   0x1   :  { %s21_s20 = sshll.u32 %s676_s3, 4  ;;  %s23_s22 = sshll.u32 %s561_s21, 4  ;;  %s22_s20 = int_to_ptr.hbm [resolvable:$true] %s21_s20  ;;  %s24_s22 = int_to_ptr.vmem [resolvable:$true] %s23_s22 }
   0x2   :  { %s563_s24 = smov 12  }
   0x3   :  { %29 = dma.hbm_to_vmem [thread:$0]  %s22_s20, 3072, %s24_s22, [#allocation3], %s562_s23, %s562_s23, %s563_s24  }
   0x4   :  { %559 = dma.done.wait [#allocation3], 3072  }
   0x5   :  { %560 = vsyncadd [#allocation3], 4294964224  ;;  %v38_v0 = vld [vmem:[%s673_s0 + $0x10] sm:$0xff]  ;;  %v36_v1 = vld [vmem:[%s673_s0] sm:$0xff]  ;;  %v564_v4 = vmov 128.0  }
   0x6   :  { %46 = vadd.xlane.f32.xlu1 %v38_v0  ;;  %42 = vadd.xlane.f32.xlu0 %v36_v1  ;;  %v39_v2 = vld [vmem:[%s673_s0 + $0x18] sm:$0xff]  ;;  %v37_v3 = vld [vmem:[%s673_s0 + $0x8] sm:$0xff]  ;;  %525 = vrcp.f32 %v564_v4  ;;  %v509_v28 = vld [vmem:[#allocation2 + $0xb0] sm:$0xf0] }
   0x7   :  { %v477_v27 = vld [vmem:[#allocation2 + $0xa8] sm:$0xf]  ;;  %v508_v29 = vld [vmem:[#allocation2 + $0xac] sm:$0xf]  ;;  %v479_v31 = vld [vmem:[#allocation2 + $0xb4] sm:$0xf0] }
   0x8   :  { %v478_v30 = vor.u32 %v509_v28, %v477_v27  ;;  %v485_v32 = vld [vmem:[#allocation2 + $0xb0] sm:$0xf]  ;;  %v510_v33 = vld [vmem:[#allocation2 + $0xb8] sm:$0xf0]  ;;  %v482_v34 = vor.u32 %v508_v29, %v479_v31  ;;  %v505_v38 = vld [vmem:[#allocation2 + $0x94] sm:$0xf] }
   0x9   :  { %v486_v35 = vor.u32 %v510_v33, %v485_v32  ;;  %v465_v36 = vld [vmem:[#allocation2 + $0x90] sm:$0xf]  ;;  %v506_v37 = vld [vmem:[#allocation2 + $0x98] sm:$0xf0]  ;;  %v467_v40 = vld [vmem:[#allocation2 + $0x9c] sm:$0xf0] }
   0xa   :  { %313 = vmatpush.bf16.msra.mxu0 %v478_v30  ;;  %511 = vmatpush.bf16.msra.mxu3 %v478_v30  ;;  %v466_v39 = vor.u32 %v506_v37, %v465_v36  ;;  %v473_v41 = vld [vmem:[#allocation2 + $0x98] sm:$0xf]  ;;  %v507_v42 = vld [vmem:[#allocation2 + $0xa0] sm:$0xf0]  ;;  %v470_v43 = vor.u32 %v505_v38, %v467_v40  ;;  %v502_v47 = vld [vmem:[#allocation2 + $0x7c] sm:$0xf] }
   0xb   :  { %332 = vmatpush.bf16.msra.mxu1 %v482_v34  ;;  %351 = vmatpush.bf16.msra.mxu2 %v486_v35  ;;  %v474_v44 = vor.u32 %v507_v42, %v473_v41  ;;  %v453_v45 = vld [vmem:[#allocation2 + $0x78] sm:$0xf]  ;;  %v503_v46 = vld [vmem:[#allocation2 + $0x80] sm:$0xf0]  ;;  %v455_v49 = vld [vmem:[#allocation2 + $0x84] sm:$0xf0] }
   0xc   :  { %v526_v5 = vpop.eup %525  ;;  %v454_v48 = vor.u32 %v503_v46, %v453_v45  ;;  %v461_v50 = vld [vmem:[#allocation2 + $0x80] sm:$0xf]  ;;  %v504_v51 = vld [vmem:[#allocation2 + $0x88] sm:$0xf0]  ;;  %v458_v52 = vor.u32 %v502_v47, %v455_v49  ;;  %v499_v56 = vld [vmem:[#allocation2 + $0x64] sm:$0xf] }
   0xd   :  { %v51_v6 = vmul.f32 128.0, %v526_v5  ;;  %vm55_vm0 = vweird.f32 %v526_v5  ;;  %v462_v53 = vor.u32 %v504_v51, %v461_v50  ;;  %v441_v54 = vld [vmem:[#allocation2 + $0x60] sm:$0xf]  ;;  %v500_v55 = vld [vmem:[#allocation2 + $0x68] sm:$0xf0] }
   0xe   :  { %48 = vadd.xlane.f32.xlu1 %v39_v2  ;;  %44 = vadd.xlane.f32.xlu0 %v37_v3  ;;  %v442_v57 = vor.u32 %v500_v55, %v441_v54  ;;  %v443_v58 = vld [vmem:[#allocation2 + $0x6c] sm:$0xf0]  ;;  %v449_v59 = vld [vmem:[#allocation2 + $0x68] sm:$0xf]  ;;  %v501_v60 = vld [vmem:[#allocation2 + $0x70] sm:$0xf0] }
   0xf   :  { %v52_v7 = vsub.f32 1.0, %v51_v6  ;;  %314 = vmatpush.bf16.msra.mxu0 %v466_v39  ;;  %512 = vmatpush.bf16.msra.mxu3 %v466_v39  ;;  %v446_v61 = vor.u32 %v499_v56, %v443_v58  ;;  %v450_v62 = vor.u32 %v501_v60, %v449_v59  ;;  %v429_v63 = vld [vmem:[#allocation2 + $0x48] sm:$0xf]  ;;  %v437_v4 = vld [vmem:[#allocation2 + $0x50] sm:$0xf] }
  0x10   :  { %333 = vmatpush.bf16.msra.mxu1 %v470_v43  ;;  %352 = vmatpush.bf16.msra.mxu2 %v474_v44  ;;  %v413_v27 = vld [vmem:[#allocation2 + $0x20] sm:$0xf]  ;;  %v492_v28 = vld [vmem:[#allocation2 + $0x28] sm:$0xf0]  ;;  %v487_v35 = vld [vmem:[#allocation2 + $0x4] sm:$0xf] }
  0x11   :  { %v53_v8 = vmul.f32 %v526_v5, %v52_v7  ;;  %v414_v32 = vor.u32 %v492_v28, %v413_v27  ;;  %v393_v33 = vld [vmem:[#allocation2] sm:$0xf]  ;;  %v488_v34 = vld [vmem:[#allocation2 + $0x8] sm:$0xf0]  ;;  %v395_v39 = vld [vmem:[#allocation2 + $0xc] sm:$0xf0] }
  0x12   :  { %v394_v38 = vor.u32 %v488_v34, %v393_v33  ;;  %v401_v40 = vld [vmem:[#allocation2 + $0x8] sm:$0xf]  ;;  %v489_v41 = vld [vmem:[#allocation2 + $0x10] sm:$0xf0]  ;;  %v398_v42 = vor.u32 %v487_v35, %v395_v39 }
  0x13   :  { %v54_v9 = vadd.f32 %v526_v5, %v53_v8  ;;  %315 = vmatpush.bf16.msra.mxu0 %v454_v48  ;;  %513 = vmatpush.bf16.msra.mxu3 %v454_v48  ;;  %v417_v8 = vld [vmem:[#allocation2 + $0x30] sm:$0xf]  ;;  %v402_v43 = vor.u32 %v489_v41, %v401_v40 }
  0x14   :  { %334 = vmatpush.bf16.msra.mxu1 %v458_v52  ;;  %353 = vmatpush.bf16.msra.mxu2 %v462_v53 }
  0x15   :  { %v610_v10 = vsel %vm55_vm0, %v526_v5, %v54_v9  ;;  %v498_v5 = vld [vmem:[#allocation2 + $0x58] sm:$0xf0] }
  0x16   :  { %v438_v7 = vor.u32 %v498_v5, %v437_v4  ;;  %v494_v9 = vld [vmem:[#allocation2 + $0x38] sm:$0xf0] }
  0x17   :  { %316 = vmatpush.bf16.msra.mxu0 %v442_v57  ;;  %514 = vmatpush.bf16.msra.mxu3 %v442_v57 }
  0x18   :  { %335 = vmatpush.bf16.msra.mxu1 %v446_v61  ;;  %354 = vmatpush.bf16.msra.mxu2 %v450_v62 }
  0x1c   :  { %355 = vmatpush.bf16.msra.mxu2 %v438_v7 }
  0x79   :  { %v47_v11 = vpop.xlane.xlu1 %46  ;;  %v43_v12 = vpop.xlane.xlu0 %42 }
  0x7a   :  { %v59_v13 = vmul.f32 %v610_v10, %v47_v11  ;;  %v57_v14 = vmul.f32 %v610_v10, %v43_v12  ;;  %v493_v11 = vld [vmem:[#allocation2 + $0x34] sm:$0xf]  ;;  %v418_v12 = vor.u32 %v494_v9, %v417_v8 }
  0x7c   :  { %v614_v15 = vsub.f32 %v38_v0, %v59_v13  ;;  %v616_v16 = vsub.f32 %v36_v1, %v57_v14  ;;  %v497_v0 = vld [vmem:[#allocation2 + $0x50] sm:$0xf0]  ;;  %v496_v1 = vld [vmem:[#allocation2 + $0x4c] sm:$0xf]  ;;  %v419_v13 = vld [vmem:[#allocation2 + $0x3c] sm:$0xf0] }
  0x7d   :  { %v425_v14 = vld [vmem:[#allocation2 + $0x38] sm:$0xf] }
  0x7e   :  { %v67_v17 = vmul.f32 %v614_v15, %v614_v15  ;;  %v65_v18 = vmul.f32 %v616_v16, %v616_v16 }
  0x80   :  { %73 = vadd.xlane.f32.xlu0 %v67_v17  ;;  %69 = vadd.xlane.f32.xlu2 %v65_v18  ;;  %v495_v17 = vld [vmem:[#allocation2 + $0x40] sm:$0xf0]  ;;  %v422_v18 = vor.u32 %v493_v11, %v419_v13  ;;  %v523_v13 = vld [vmem:[%s674_s1] ss:$0 sm:$0xff] }
  0x81   :  { %v49_v19 = vpop.xlane.xlu1 %48  ;;  %v45_v20 = vpop.xlane.xlu0 %44 }
  0x82   :  { %v60_v21 = vmul.f32 %v610_v10, %v49_v19  ;;  %v58_v22 = vmul.f32 %v610_v10, %v45_v20  ;;  %v426_v19 = vor.u32 %v495_v17, %v425_v14  ;;  %v405_v20 = vld [vmem:[#allocation2 + $0x18] sm:$0xf] }
  0x84   :  { %v624_v23 = vsub.f32 %v39_v2, %v60_v21  ;;  %v626_v24 = vsub.f32 %v37_v3, %v58_v22  ;;  %v430_v2 = vor.u32 %v497_v0, %v429_v63  ;;  %v431_v3 = vld [vmem:[#allocation2 + $0x54] sm:$0xf0]  ;;  %356 = vmatpush.bf16.msra.mxu2 %v426_v19  ;;  %v491_v21 = vld [vmem:[#allocation2 + $0x20] sm:$0xf0]  ;;  %v490_v22 = vld [vmem:[#allocation2 + $0x1c] sm:$0xf] }
  0x85   :  { %v434_v6 = vor.u32 %v496_v1, %v431_v3 }
  0x86   :  { %v68_v25 = vmul.f32 %v624_v23, %v624_v23  ;;  %v66_v26 = vmul.f32 %v626_v24, %v626_v24  ;;  %317 = vmatpush.bf16.msra.mxu0 %v430_v2  ;;  %515 = vmatpush.bf16.msra.mxu3 %v430_v2 }
  0x87   :  { %336 = vmatpush.bf16.msra.mxu1 %v434_v6 }
  0x88   :  { %75 = vadd.xlane.f32.xlu1 %v68_v25  ;;  %71 = vadd.xlane.f32.xlu2 %v66_v26  ;;  %v406_v25 = vor.u32 %v491_v21, %v405_v20  ;;  %v407_v26 = vld [vmem:[#allocation2 + $0x24] sm:$0xf0] }
  0x89   :  { %v410_v31 = vor.u32 %v490_v22, %v407_v26  ;;  %357 = vmatpush.bf16.msra.mxu2 %v414_v32 }
  0x8a   :  { %318 = vmatpush.bf16.msra.mxu0 %v418_v12  ;;  %516 = vmatpush.bf16.msra.mxu3 %v418_v12 }
  0x8b   :  { %337 = vmatpush.bf16.msra.mxu1 %v422_v18 }
  0x8d   :  { %358 = vmatpush.bf16.msra.mxu2 %v402_v43 }
  0x8e   :  { %319 = vmatpush.bf16.msra.mxu0 %v406_v25  ;;  %517 = vmatpush.bf16.msra.mxu3 %v406_v25 }
  0x8f   :  { %338 = vmatpush.bf16.msra.mxu1 %v410_v31 }
  0x92   :  { %320 = vmatpush.bf16.msra.mxu0 %v394_v38  ;;  %518 = vmatpush.bf16.msra.mxu3 %v394_v38 }
  0x93   :  { %339 = vmatpush.bf16.msra.mxu1 %v398_v42 }
  0xf3   :  { %v70_v29 = vpop.xlane.xlu2 %69  ;;  %v74_v30 = vpop.xlane.xlu0 %73 }
  0xf4   :  { %v77_v36 = vmul.f32 %v70_v29, %v610_v10  ;;  %v79_v37 = vmul.f32 %v74_v30, %v610_v10 }
  0xf6   :  { %v81_v44 = vadd.f32 1e-05, %v77_v36  ;;  %v83_v45 = vadd.f32 1e-05, %v79_v37 }
  0xf8   :  { %527 = vrsqrt.f32 %v81_v44  ;;  %vm111_vm1 = vweird.f32 %v83_v45  ;;  %vm91_vm5 = vweird.f32 %v81_v44 }
  0xf9   :  { %529 = vrsqrt.f32 %v83_v45 }
  0xfb   :  { %v76_v46 = vpop.xlane.xlu1 %75  ;;  %v72_v47 = vpop.xlane.xlu2 %71 }
  0xfc   :  { %v80_v48 = vmul.f32 %v76_v46, %v610_v10  ;;  %v78_v49 = vmul.f32 %v72_v47, %v610_v10 }
  0xfe   :  { %v528_v50 = vpop.eup %527  ;;  %v84_v51 = vadd.f32 1e-05, %v80_v48  ;;  %v82_v52 = vadd.f32 1e-05, %v78_v49 }
  0xff   :  { %v530_v53 = vpop.eup %529  ;;  %v86_v54 = vmul.f32 %v528_v50, %v81_v44  ;;  %vm92_vm3 = vweird.f32 %v528_v50 }
 0x100   :  { %v106_v55 = vmul.f32 %v530_v53, %v83_v45  ;;  %531 = vrsqrt.f32 %v84_v51  ;;  %vm112_vm2 = vweird.f32 %v530_v53  ;;  %vm93_vm6 = vmor %vm91_vm5, %vm92_vm3  ;;  %vm121_vm7 = vweird.f32 %v84_v51 }
 0x101   :  { %v87_v56 = vmul.f32 %v528_v50, %v86_v54  ;;  %533 = vrsqrt.f32 %v82_v52  ;;  %vm113_vm4 = vmor %vm111_vm1, %vm112_vm2  ;;  %vm101_vm11 = vweird.f32 %v82_v52 }
 0x102   :  { %v107_v57 = vmul.f32 %v530_v53, %v106_v55 }
 0x103   :  { %v88_v58 = vmul.f32 0.5, %v87_v56 }
 0x104   :  { %v108_v59 = vmul.f32 0.5, %v107_v57 }
 0x105   :  { %v89_v60 = vsub.f32 1.5, %v88_v58 }
 0x106   :  { %v532_v61 = vpop.eup %531  ;;  %v109_v62 = vsub.f32 1.5, %v108_v59 }
 0x107   :  { %v534_v63 = vpop.eup %533  ;;  %v116_v0 = vmul.f32 %v532_v61, %v84_v51  ;;  %v90_v10 = vmul.f32 %v528_v50, %v89_v60  ;;  %vm122_vm8 = vweird.f32 %v532_v61 }
 0x108   :  { %v110_v1 = vmul.f32 %v530_v53, %v109_v62  ;;  %v96_v2 = vmul.f32 %v534_v63, %v82_v52  ;;  %vm123_vm9 = vmor %vm121_vm7, %vm122_vm8  ;;  %vm102_vm10 = vweird.f32 %v534_v63 }
 0x109   :  { %v117_v3 = vmul.f32 %v532_v61, %v116_v0  ;;  %v94_v7 = vsel %vm93_vm6, %v528_v50, %v90_v10  ;;  %vm103_vm12 = vmor %vm101_vm11, %vm102_vm10 }
 0x10a   :  { %v97_v4 = vmul.f32 %v534_v63, %v96_v2  ;;  %v114_v5 = vsel %vm113_vm4, %v530_v53, %v110_v1  ;;  %v125_v14 = vmul.f32 %v94_v7, %v616_v16 }
 0x10b   :  { %v118_v6 = vmul.f32 0.5, %v117_v3  ;;  %v127_v11 = vmul.f32 %v114_v5, %v614_v15  ;;  %v524_v15 = vld [vmem:[%s675_s2] ss:$0 sm:$0xff] }
 0x10c   :  { %v98_v8 = vmul.f32 0.5, %v97_v4  ;;  %v132_v26 = vmul.f32 %v523_v13, %v125_v14 }
 0x10d   :  { %v119_v9 = vsub.f32 1.5, %v118_v6  ;;  %v134_v22 = vmul.f32 %v523_v13, %v127_v11 }
 0x10e   :  { %v99_v12 = vsub.f32 1.5, %v98_v8  ;;  %v139_v30 = vadd.f32 %v524_v15, %v132_v26 }
 0x10f   :  { %v120_v17 = vmul.f32 %v532_v61, %v119_v9  ;;  %v141_v29 = vadd.f32 %v524_v15, %v134_v22 }
 0x110   :  { %v100_v18 = vmul.f32 %v534_v63, %v99_v12 }
 0x111   :  { %v124_v19 = vsel %vm123_vm9, %v532_v61, %v120_v17 }
 0x112   :  { %v128_v20 = vmul.f32 %v124_v19, %v624_v23  ;;  %v104_v21 = vsel %vm103_vm12, %v534_v63, %v100_v18  ;;  %v177_v23 = vld [vmem:[%s677_s4] sm:$0x7] }
 0x113   :  { %v126_v25 = vmul.f32 %v104_v21, %v626_v24  ;;  %v179_v24 = vperm.slane %v177_v23, 0  ;;  %v180_v34 = vperm.slane %v177_v23, 1  ;;  %v181_v40 = vperm.slane %v177_v23, 2 }
 0x114   :  { %v135_v27 = vmul.f32 %v523_v13, %v128_v20 }
 0x115   :  { %v133_v28 = vmul.f32 %v523_v13, %v126_v25 }
 0x116   :  { %v142_v16 = vadd.f32 %v524_v15, %v135_v27 }
 0x117   :  { %v140_v31 = vadd.f32 %v524_v15, %v133_v28 }
 0x118   :  { %v144_v32 = vpack.c.bf16 %v142_v16, %v141_v29 }
 0x119   :  { %v143_v33 = vpack.c.bf16 %v140_v31, %v139_v30 }
 0x11a   :  { %326 = vmatmul.bf16.vlgmr.msra.gmra.mxu3 %v144_v32 }
 0x11b   :  { %321 = vmatmul.bf16.vlgmr.msra.gmra.mxu0 %v143_v33  ;;  %340 = vmatmul.bf16.vlgmr.msra.gmra.mxu1 %v143_v33 }
 0x11c   :  { %359 = vmatmul.bf16.vlgmr.msra.gmra.mxu2 %v143_v33 }
 0x12b   :  { %345 = vmatmul.bf16.gmra.mxu1 %v144_v32 }
 0x12c   :  { %364 = vmatmul.bf16.gmra.mxu2 %v144_v32 }
 0x198   :  { %v322_v35 = vpop.f32.mrf.mxu0  ;;  %v341_v36 = vpop.f32.mrf.mxu1 }
 0x199   :  { %v323_v37 = vadd.f32 %v322_v35, %v179_v24  ;;  %v342_v38 = vadd.f32 %v341_v36, %v180_v34 }
 0x19b   :  { %v370_v39 = vpack.c.bf16 %v342_v38, %v323_v37 }
 0x19d   :  { %378 = vst [vmem:[%s678_s5] sm:$0xff] %v370_v39  ;;  %v327_v49 = vpop.f32.mrf.mxu3 }
 0x19e   :  { %v328_v53 = vadd.f32 %v327_v49, %v179_v24 }
 0x19f   :  { %v360_v41 = vpop.f32.mrf.mxu2 }
 0x1a0   :  { %v361_v42 = vadd.f32 %v360_v41, %v181_v40  ;;  %v324_v43 = vpop.f32.mrf.mxu0  ;;  %v343_v44 = vpop.f32.mrf.mxu1 }
 0x1a1   :  { %v325_v45 = vadd.f32 %v324_v43, %v179_v24  ;;  %v344_v46 = vadd.f32 %v343_v44, %v180_v34 }
 0x1a2   :  { %v371_v47 = vpack.c.bf16 %v361_v42, %v361_v42 }
 0x1a3   :  { %v372_v48 = vpack.c.bf16 %v344_v46, %v325_v45 }
 0x1a4   :  { %379 = vst [vmem:[%s678_s5 + $0x8] sm:$0xf] %v371_v47 }
 0x1a5   :  { %380 = vst [vmem:[%s678_s5 + $0xc] sm:$0xff] %v372_v48  ;;  %v329_v57 = vpop.f32.mrf.mxu3 }
 0x1a6   :  { %v330_v61 = vadd.f32 %v329_v57, %v179_v24 }
 0x1a7   :  { %v362_v50 = vpop.f32.mrf.mxu2 }
 0x1a8   :  { %v363_v51 = vadd.f32 %v362_v50, %v181_v40  ;;  %v346_v52 = vpop.f32.mrf.mxu1 }
 0x1a9   :  { %v347_v54 = vadd.f32 %v346_v52, %v180_v34 }
 0x1aa   :  { %v373_v55 = vpack.c.bf16 %v363_v51, %v363_v51 }
 0x1ab   :  { %v374_v56 = vpack.c.bf16 %v347_v54, %v328_v53 }
 0x1ac   :  { %381 = vst [vmem:[%s678_s5 + $0x14] sm:$0xf] %v373_v55 }
 0x1ad   :  { %382 = vst [vmem:[%s678_s5 + $0x18] sm:$0xff] %v374_v56 }
 0x1af   :  { %v365_v58 = vpop.f32.mrf.mxu2 }
 0x1b0   :  { %v366_v59 = vadd.f32 %v365_v58, %v181_v40  ;;  %v348_v60 = vpop.f32.mrf.mxu1 }
 0x1b1   :  { %v349_v62 = vadd.f32 %v348_v60, %v180_v34 }
 0x1b2   :  { %v375_v63 = vpack.c.bf16 %v366_v59, %v366_v59 }
 0x1b3   :  { %v376_v0 = vpack.c.bf16 %v349_v62, %v330_v61 }
 0x1b4   :  { %383 = vst [vmem:[%s678_s5 + $0x20] sm:$0xf] %v375_v63 }
 0x1b5   :  { %384 = vst [vmem:[%s678_s5 + $0x24] sm:$0xff] %v376_v0 }
 0x1b7   :  { %v367_v10 = vpop.f32.mrf.mxu2 }
 0x1b8   :  { %v368_v1 = vadd.f32 %v367_v10, %v181_v40 }
 0x1ba   :  { %v377_v2 = vpack.c.bf16 %v368_v1, %v368_v1 }
 0x1bc   :  { %385 = vst [vmem:[%s678_s5 + $0x2c] sm:$0xf] %v377_v2 }
 0x1bd   :  { %390 = vsyncpa [#allocation3], 1 }

// kernel: conformer_css_forward.16
= control target key start
LH: loop header
LB: loop body
LE: loop exit
PB: predicated region body
PF: predicated region fallthrough
CT: control target
= control target key end

     0   :  { %13 = vsyncpa [#allocation4], 0  ;;  %s713_s27 = smov 0   ;;  %s777_s0 = inlined_call_operand.vmem [shape: f32[2,16,128], index: 0, kind: input, shape index: {}]   ;;  %s778_s1 = inlined_call_operand.vmem [shape: f32[1,128], index: 1, kind: input, shape index: {}]   ;;  %s779_s2 = inlined_call_operand.vmem [shape: f32[1,128], index: 2, kind: input, shape index: {}]   ;;  %s780_s3 = inlined_call_operand.vmem [shape: f32[5,128], index: 3, kind: input, shape index: {}]   ;;  %s781_s4 = inlined_call_operand.vmem [shape: f32[1,128], index: 4, kind: input, shape index: {}]   ;;  %s782_s5 = inlined_call_operand.vmem [shape: f32[1,128], index: 5, kind: input, shape index: {}]   ;;  %s783_s6 = inlined_call_operand.vmem [shape: f32[1,128], index: 6, kind: input, shape index: {}]   ;;  %s784_s7 = inlined_call_operand.vmem [shape: f32[6], index: 7, kind: input, shape index: {}]   ;;  %s785_s8 = inlined_call_operand.vmem [shape: f32[2,16,128], index: 8, kind: output, shape index: {}]  }
   0x1 LB: > { %s576_s28 = sadd.s32 4294967295, %s663_s27   ;;  %p578_p0 = scmp.ge.s32.totalorder %s663_s27, 1  ;;  %s663_s27 = sphi %s713_s27, %s19_s27  }
   0x2   : > { %p223_p1 = scmp.lt.s32.totalorder %s663_s27, 3  ;;  %s253_s9 = sshll.u32 %s784_s7, 4  ;;  %s254_s9 = int_to_ptr.vmem [resolvable:$true] %s253_s9 }
   0x3   : > { %p606_p3 = scmp.eq.s32.totalorder %s576_s28, 0  ;;  %s665_s10 = smov [#allocation3]  }
   0x4   : > { %p224_p2 = pnand %p578_p0, %p223_p1 }
   0x6   : > { %p602_p4 = pneg %p224_p2  ;;  %274 = sbr.rel (%p224_p2) target bundleno = 364 (0x16c), region = 52 }
   0x8   : > { %p603_p5 = pnand %p606_p3, %p602_p4 }
   0xa   : > { %605 = dma.vmem_to_smem (!%p603_p5), %s254_s9, 16, %s665_s10, [#allocation4]  }
   0xb   : > { %658 = dma.done.wait (%p606_p3), [#allocation4], 16  }
   0xc   : > { %660 = vsyncadd (%p606_p3), [#allocation4], 4294967280 }
   0xd   : > { %281 = sfence }
   0xe   : > { %p310_p6 = scmp.lt.s32.totalorder %s576_s28, 1  ;;  %v666_v2 = vmov 128.0   ;;  %v667_v5 = vmov 0.0   ;;  %s740_s15 = sld [smem:[#allocation3 + $0x1]]  ;;  %v619_v32 = vld [vmem:[%s778_s1] ss:$0 sm:$0xff] }
   0xf   : > { %624 = vrcp.f32 %v666_v2  ;;  %439 = vst [vmem:[#allocation2 + $0x6] sm:$0x3] %v667_v5  ;;  %s589_s16 = sld [smem:[#allocation3 + $0x3]]  ;;  %v620_v35 = vld [vmem:[%s779_s2] ss:$0 sm:$0xff] }
  0x10   : > { %s787_s28 = smov (!%p310_p6, %s576_s28), 1  ;;  %440 = vst [vmem:[#allocation2 + $0x18] sm:$0x3] %v667_v5  ;;  %s749_s21 = sld [smem:[#allocation3]] }
  0x11   : > { %s596_s11 = sshll.u32 %s787_s28, 4  ;;  %s751_s22 = sld [smem:[#allocation3 + $0x2]] }
  0x12   : > { %s314_s14 = scalar_lea.vmem %s777_s0, %s596_s11  ;;  %s590_s29 = sld [smem:[#allocation3 + $0x4]] }
  0x13   : > { %v732_v0 = vld [vmem:[%s314_s14] sm:$0xff]  ;;  %v735_v1 = vld [vmem:[%s314_s14 + $0x8] sm:$0xff]  ;;  %s591_s10 = sld [smem:[#allocation3 + $0x5]] }
  0x14   : > { %330 = vadd.xlane.f32.xlu0 %v732_v0  ;;  %v393_v39 = vstv %s740_s15 }
  0x15   : > { %v625_v3 = vpop.eup %624  ;;  %v396_v42 = vstv %s589_s16  ;;  %s319_s16 = scalar_lea.vmem %s785_s8, %s596_s11 }
  0x16   : > { %v335_v4 = vmul.f32 128.0, %v625_v3  ;;  %vm339_vm0 = vweird.f32 %v625_v3  ;;  %v387_v59 = vstv %s749_s21 }
  0x18   : > { %v336_v6 = vsub.f32 1.0, %v335_v4  ;;  %v390_v4 = vstv %s751_s22 }
  0x1a   : > { %v337_v7 = vmul.f32 %v625_v3, %v336_v6 }
  0x1c   : > { %332 = vadd.xlane.f32.xlu0 %v735_v1  ;;  %v338_v8 = vadd.f32 %v625_v3, %v337_v7 }
  0x1e   : > { %v340_v9 = vsel %vm339_vm0, %v625_v3, %v338_v8 }
  0x87   : > { %v331_v10 = vpop.xlane.xlu0 %330 }
  0x88   : > { %v341_v11 = vmul.f32 %v340_v9, %v331_v10 }
  0x8a   : > { %v343_v12 = vsub.f32 %v732_v0, %v341_v11 }
  0x8c   : > { %v345_v13 = vmul.f32 %v343_v12, %v343_v12 }
  0x8e   : > { %347 = vadd.xlane.f32.xlu1 %v345_v13 }
  0x8f   : > { %v333_v14 = vpop.xlane.xlu0 %332 }
  0x90   : > { %v342_v15 = vmul.f32 %v340_v9, %v333_v14 }
  0x92   : > { %v344_v16 = vsub.f32 %v735_v1, %v342_v15 }
  0x94   : > { %v346_v17 = vmul.f32 %v344_v16, %v344_v16 }
  0x96   : > { %349 = vadd.xlane.f32.xlu1 %v346_v17 }
 0x101   : > { %v348_v18 = vpop.xlane.xlu1 %347 }
 0x102   : > { %v351_v19 = vmul.f32 %v348_v18, %v340_v9  ;;  %v443_v18 = vld [vmem:[%s780_s3] sm:$0x1f] }
 0x104   : > { %v353_v20 = vadd.f32 1e-05, %v351_v19 }
 0x106   : > { %626 = vrsqrt.f32 %v353_v20  ;;  %vm361_vm2 = vweird.f32 %v353_v20 }
 0x109   : > { %v350_v21 = vpop.xlane.xlu1 %349 }
 0x10a   : > { %v352_v22 = vmul.f32 %v350_v21, %v340_v9 }
 0x10c   : > { %v627_v23 = vpop.eup %626  ;;  %v354_v24 = vadd.f32 1e-05, %v352_v22  ;;  %v453_v22 = vperm.slane %v443_v18, 1 }
 0x10d   : > { %v356_v25 = vmul.f32 %v627_v23, %v353_v20  ;;  %vm362_vm1 = vweird.f32 %v627_v23  ;;  %v446_v20 = vperm.slane %v443_v18, 0 }
 0x10e   : > { %628 = vrsqrt.f32 %v354_v24  ;;  %vm363_vm3 = vmor %vm361_vm2, %vm362_vm1  ;;  %vm371_vm5 = vweird.f32 %v354_v24 }
 0x10f   : > { %v357_v26 = vmul.f32 %v627_v23, %v356_v25 }
 0x111   : > { %v358_v27 = vmul.f32 0.5, %v357_v26 }
 0x113   : > { %v359_v28 = vsub.f32 1.5, %v358_v27 }
 0x114   : > { %v629_v29 = vpop.eup %628 }
 0x115   : > { %v360_v30 = vmul.f32 %v627_v23, %v359_v28  ;;  %v366_v31 = vmul.f32 %v629_v29, %v354_v24  ;;  %vm372_vm4 = vweird.f32 %v629_v29 }
 0x116   : > { %vm373_vm6 = vmor %vm371_vm5, %vm372_vm4 }
 0x117   : > { %v364_v33 = vsel %vm363_vm3, %v627_v23, %v360_v30  ;;  %v367_v34 = vmul.f32 %v629_v29, %v366_v31  ;;  %v460_v31 = vperm.slane %v443_v18, 2 }
 0x118   : > { %v375_v36 = vmul.f32 %v364_v33, %v343_v12  ;;  %v467_v33 = vperm.slane %v443_v18, 3 }
 0x119   : > { %v368_v37 = vmul.f32 0.5, %v367_v34 }
 0x11a   : > { %v380_v38 = vmul.f32 %v619_v32, %v375_v36 }
 0x11b   : > { %v369_v40 = vsub.f32 1.5, %v368_v37 }
 0x11c   : > { %v385_v41 = vadd.f32 %v620_v35, %v380_v38 }
 0x11d   : > { %v370_v43 = vmul.f32 %v629_v29, %v369_v40 }
 0x11e   : > { %v394_v44 = vmul.f32 %v393_v39, %v385_v41  ;;  %v388_v63 = vmul.f32 %v387_v59, %v385_v41 }
 0x11f   : > { %v374_v45 = vsel %vm373_vm6, %v629_v29, %v370_v43 }
 0x120   : > { %v397_v46 = vadd.f32 %v396_v42, %v394_v44  ;;  %v376_v47 = vmul.f32 %v374_v45, %v344_v16  ;;  %v391_v7 = vadd.f32 %v390_v4, %v388_v63  ;;  %v621_v45 = vld [vmem:[%s781_s4] ss:$0 sm:$0xff]  ;;  %v499_v63 = vstv %s590_s29 }
 0x122   : > { %v592_v48 = vmul.f32 -1.442695, %v397_v46  ;;  %v381_v49 = vmul.f32 %v619_v32, %v376_v47 }
 0x124   : > { %630 = vpow2.f32 %v592_v48  ;;  %v386_v50 = vadd.f32 %v620_v35, %v381_v49  ;;  %v474_v35 = vperm.slane %v443_v18, 4 }
 0x126   : > { %v395_v51 = vmul.f32 %v393_v39, %v386_v50  ;;  %v389_v15 = vmul.f32 %v387_v59, %v386_v50 }
 0x128   : > { %v398_v52 = vadd.f32 %v396_v42, %v395_v51  ;;  %v392_v23 = vadd.f32 %v390_v4, %v389_v15  ;;  %v622_v51 = vld [vmem:[%s782_s5] ss:$0 sm:$0xff]  ;;  %v502_v4 = vstv %s591_s10 }
 0x12a   : > { %v631_v53 = vpop.eup %630  ;;  %v593_v54 = vmul.f32 -1.442695, %v398_v52 }
 0x12b   : > { %v405_v55 = vadd.f32 1.0, %v631_v53 }
 0x12d   : > { %632 = vrcp.f32 %v405_v55  ;;  %v418_v62 = vand.u32 2147483648, %v405_v55  ;;  %v416_v3 = vand.u32 2147483647, %v405_v55  ;;  %vm412_vm8 = vweird.f32 %v405_v55 }
 0x12e   : > { %634 = vpow2.f32 %v593_v54 }
 0x12f   : > { %v419_v6 = vor.u32 1.1754944e-38, %v418_v62  ;;  %vm417_vm10 = vcmp.eq.f32.partialorder %v416_v3, 8.507059e+37 }
 0x133   : > { %v633_v56 = vpop.eup %632 }
 0x134   : > { %v635_v57 = vpop.eup %634  ;;  %v408_v58 = vmul.f32 %v633_v56, %v405_v55  ;;  %vm413_vm7 = vweird.f32 %v633_v56  ;;  %v623_v55 = vld [vmem:[%s783_s6] ss:$0 sm:$0xff] }
 0x135   : > { %v406_v60 = vadd.f32 1.0, %v635_v57  ;;  %vm414_vm9 = vmor %vm412_vm8, %vm413_vm7 }
 0x136   : > { %v409_v61 = vsub.f32 1.0, %v408_v58 }
 0x137   : > { %636 = vrcp.f32 %v406_v60  ;;  %v433_v14 = vand.u32 2147483648, %v406_v60  ;;  %v431_v17 = vand.u32 2147483647, %v406_v60  ;;  %vm427_vm12 = vweird.f32 %v406_v60 }
 0x138   : > { %v410_v2 = vmul.f32 %v633_v56, %v409_v61 }
 0x139   : > { %v434_v21 = vor.u32 1.1754944e-38, %v433_v14  ;;  %vm432_vm14 = vcmp.eq.f32.partialorder %v431_v17, 8.507059e+37 }
 0x13a   : > { %v411_v5 = vadd.f32 %v633_v56, %v410_v2 }
 0x13c   : > { %v415_v8 = vsel %vm414_vm9, %v633_v56, %v411_v5 }
 0x13d   : > { %v637_v9 = vpop.eup %636  ;;  %v420_v10 = vsel %vm417_vm10, %v419_v6, %v415_v8 }
 0x13e   : > { %v437_v11 = vmul.f32 %v420_v10, %v391_v7  ;;  %v423_v12 = vmul.f32 %v637_v9, %v406_v60  ;;  %vm428_vm11 = vweird.f32 %v637_v9 }
 0x13f   : > { %vm429_vm13 = vmor %vm427_vm12, %vm428_vm11 }
 0x140   : > { %441 = vst [vmem:[#allocation2 + $0x8] sm:$0xff] %v437_v11  ;;  %v424_v13 = vsub.f32 1.0, %v423_v12  ;;  %v461_v34 = vmul.f32 %v460_v31, %v437_v11 }
 0x142   : > { %v425_v16 = vmul.f32 %v637_v9, %v424_v13 }
 0x144   : > { %v426_v19 = vadd.f32 %v637_v9, %v425_v16 }
 0x146   : > { %v430_v24 = vsel %vm429_vm13, %v637_v9, %v426_v19 }
 0x147   : > { %v444_v25 = vld [vmem:[#allocation2 + $0x6] sm:$0xff]  ;;  %v435_v27 = vsel %vm432_vm14, %v434_v21, %v430_v24 }
 0x148   : > { %v451_v26 = vld [vmem:[#allocation2 + $0x7] sm:$0xff]  ;;  %v438_v28 = vmul.f32 %v435_v27, %v392_v23  ;;  %v447_v29 = vmul.f32 %v446_v20, %v444_v25 }
 0x149   : > { %v454_v30 = vmul.f32 %v453_v22, %v451_v26 }
 0x14a   : > { %442 = vst [vmem:[#allocation2 + $0x10] sm:$0xff] %v438_v28  ;;  %v462_v47 = vmul.f32 %v460_v31, %v438_v28 }
 0x14b   : > { %v456_v32 = vadd.f32 %v454_v30, %v447_v29 }
 0x14d   : > { %v463_v39 = vadd.f32 %v461_v34, %v456_v32 }
 0x151   : > { %v445_v36 = vld [vmem:[#allocation2 + $0xe] sm:$0xff] }
 0x152   : > { %v452_v37 = vld [vmem:[#allocation2 + $0xf] sm:$0xff]  ;;  %v448_v40 = vmul.f32 %v446_v20, %v445_v36 }
 0x153   : > { %v465_v38 = vld [vmem:[#allocation2 + $0x9] sm:$0xff]  ;;  %v455_v41 = vmul.f32 %v453_v22, %v452_v37  ;;  %v466_v44 = vld [vmem:[#allocation2 + $0x11] sm:$0xff] }
 0x154   : > { %v468_v42 = vmul.f32 %v467_v33, %v465_v38  ;;  %v472_v43 = vld [vmem:[#allocation2 + $0xa] sm:$0xff]  ;;  %v473_v50 = vld [vmem:[#allocation2 + $0x12] sm:$0xff]  ;;  %v469_v53 = vmul.f32 %v467_v33, %v466_v44 }
 0x155   : > { %v457_v46 = vadd.f32 %v455_v41, %v448_v40  ;;  %v475_v49 = vmul.f32 %v474_v35, %v472_v43  ;;  %v476_v57 = vmul.f32 %v474_v35, %v473_v50 }
 0x156   : > { %v470_v48 = vadd.f32 %v468_v42, %v463_v39 }
 0x157   : > { %v464_v52 = vadd.f32 %v462_v47, %v457_v46 }
 0x158   : > { %v477_v54 = vadd.f32 %v475_v49, %v470_v48 }
 0x159   : > { %v471_v56 = vadd.f32 %v469_v53, %v464_v52 }
 0x15a   : > { %v483_v58 = vadd.f32 %v621_v45, %v477_v54 }
 0x15b   : > { %v478_v59 = vadd.f32 %v476_v57, %v471_v56 }
 0x15c   : > { %v489_v60 = vmul.f32 %v622_v51, %v483_v58 }
 0x15d   : > { %v484_v61 = vadd.f32 %v621_v45, %v478_v59 }
 0x15e   : > { %v495_v62 = vadd.f32 %v623_v55, %v489_v60 }
 0x15f   : > { %v490_v2 = vmul.f32 %v622_v51, %v484_v61 }
 0x160   : > { %v497_v3 = vmax.f32 %v495_v62, 0.0 }
 0x161   : > { %v496_v5 = vadd.f32 %v623_v55, %v490_v2 }
 0x162   : > { %v500_v6 = vmul.f32 %v499_v63, %v497_v3 }
 0x163   : > { %v498_v7 = vmax.f32 %v496_v5, 0.0 }
 0x164   : > { %v503_v8 = vadd.f32 %v502_v4, %v500_v6 }
 0x165   : > { %v501_v9 = vmul.f32 %v499_v63, %v498_v7 }
 0x166   : > { %v505_v10 = vadd.f32 %v503_v8, %v732_v0 }
 0x167   : > { %v504_v11 = vadd.f32 %v502_v4, %v501_v9 }
 0x168   : > { %507 = vst [vmem:[%s319_s16] sm:$0xff] %v505_v10 }
 0x169   : > { %v506_v12 = vadd.f32 %v504_v11, %v735_v1 }
 0x16b   : > { %508 = vst [vmem:[%s319_s16 + $0x8] sm:$0xff] %v506_v12 }
 0x16c PF: > { %s19_s27 = sadd.s32 1, %s663_s27  }
 0x16d   : > { %p16_p7 = scmp.ge.s32.totalorder %s19_s27, 4  }
 0x16f   :  { %18 = sbr.rel (!%p16_p7) target bundleno = 1 (0x1), region = 87 }
 0x174   :  { %530 = vsyncpa [#allocation4], 1 }
 0x175   :  { %532 = vsyncpa [#allocation4 + $0x1], 1 }

// kernel: conformer_css_forward.17
= control target key start
LH: loop header
LB: loop body
LE: loop exit
PB: predicated region body
PF: predicated region fallthrough
CT: control target
= control target key end

     0   :  { %v759_v4 = vmov 128.0   ;;  %s1083_s0 = inlined_call_operand.vmem [shape: f32[32,128], index: 0, kind: input, shape index: {}]   ;;  %s1084_s1 = inlined_call_operand.vmem [shape: f32[1,128], index: 1, kind: input, shape index: {}]   ;;  %s1085_s2 = inlined_call_operand.vmem [shape: f32[1,128], index: 2, kind: input, shape index: {}]   ;;  %s1086_s3 = inlined_call_operand.vmem [shape: bf16[128,256], index: 3, kind: input, shape index: {}]   ;;  %s1087_s5 = inlined_call_operand.vmem [shape: bf16[256,128], index: 5, kind: input, shape index: {}]   ;;  %s1088_s6 = inlined_call_operand.vmem [shape: f32[1,128], index: 6, kind: input, shape index: {}]   ;;  %s1089_s4 = inlined_call_operand.vmem [shape: f32[1,256], index: 4, kind: input, shape index: {}]   ;;  %s1090_s7 = inlined_call_operand.vmem [shape: f32[1,128], index: 7, kind: input, shape index: {}]   ;;  %s1091_s8 = inlined_call_operand.vmem [shape: f32[1,128], index: 8, kind: input, shape index: {}]   ;;  %s1092_s9 = inlined_call_operand.vmem [shape: f32[32,128], index: 9, kind: output, shape index: {}]  }
   0x1   :  { %v813_v0 = vld [vmem:[%s1083_s0 + $0x10] sm:$0xff]  ;;  %v818_v1 = vld [vmem:[%s1083_s0] sm:$0xff]  ;;  %v825_v2 = vld [vmem:[%s1083_s0 + $0x18] sm:$0xff]  ;;  %741 = vrcp.f32 %v759_v4 }
   0x2   :  { %42 = vadd.xlane.f32.xlu1 %v813_v0  ;;  %38 = vadd.xlane.f32.xlu0 %v818_v1  ;;  %v830_v3 = vld [vmem:[%s1083_s0 + $0x8] sm:$0xff]  ;;  %v633_v27 = vld [vmem:[%s1086_s3 + $0x70] sm:$0xf]  ;;  %v718_v28 = vld [vmem:[%s1086_s3 + $0x74] sm:$0xf0] }
   0x3   :  { %v717_v29 = vld [vmem:[%s1086_s3 + $0x74] sm:$0xf]  ;;  %v634_v30 = vor.u32 %v718_v28, %v633_v27  ;;  %v635_v31 = vld [vmem:[%s1086_s3 + $0x78] sm:$0xf0]  ;;  %v625_v33 = vld [vmem:[%s1086_s3 + $0x60] sm:$0xf] }
   0x4   :  { %v638_v32 = vor.u32 %v717_v29, %v635_v31  ;;  %v716_v34 = vld [vmem:[%s1086_s3 + $0x64] sm:$0xf0]  ;;  %v715_v35 = vld [vmem:[%s1086_s3 + $0x64] sm:$0xf]  ;;  %v627_v37 = vld [vmem:[%s1086_s3 + $0x68] sm:$0xf0] }
   0x5   :  { %243 = vmatpush.bf16.msra.mxu0 %v634_v30  ;;  %v626_v36 = vor.u32 %v716_v34, %v625_v33  ;;  %v630_v38 = vor.u32 %v715_v35, %v627_v37  ;;  %v617_v39 = vld [vmem:[%s1086_s3 + $0x50] sm:$0xf]  ;;  %v714_v40 = vld [vmem:[%s1086_s3 + $0x54] sm:$0xf0]  ;;  %v713_v41 = vld [vmem:[%s1086_s3 + $0x54] sm:$0xf] }
   0x6   :  { %262 = vmatpush.bf16.msra.mxu1 %v638_v32  ;;  %v618_v42 = vor.u32 %v714_v40, %v617_v39  ;;  %v619_v43 = vld [vmem:[%s1086_s3 + $0x58] sm:$0xf0]  ;;  %v609_v45 = vld [vmem:[%s1086_s3 + $0x40] sm:$0xf]  ;;  %v712_v46 = vld [vmem:[%s1086_s3 + $0x44] sm:$0xf0] }
   0x7   :  { %v742_v5 = vpop.eup %741  ;;  %v622_v44 = vor.u32 %v713_v41, %v619_v43  ;;  %v711_v47 = vld [vmem:[%s1086_s3 + $0x44] sm:$0xf]  ;;  %v610_v48 = vor.u32 %v712_v46, %v609_v45  ;;  %v611_v49 = vld [vmem:[%s1086_s3 + $0x48] sm:$0xf0]  ;;  %v601_v51 = vld [vmem:[%s1086_s3 + $0x30] sm:$0xf] }
   0x8   :  { %v47_v6 = vmul.f32 128.0, %v742_v5  ;;  %vm51_vm0 = vweird.f32 %v742_v5  ;;  %v614_v50 = vor.u32 %v711_v47, %v611_v49  ;;  %v710_v52 = vld [vmem:[%s1086_s3 + $0x34] sm:$0xf0]  ;;  %v709_v53 = vld [vmem:[%s1086_s3 + $0x34] sm:$0xf] }
   0x9   :  { %244 = vmatpush.bf16.msra.mxu0 %v626_v36  ;;  %v602_v54 = vor.u32 %v710_v52, %v601_v51  ;;  %v603_v55 = vld [vmem:[%s1086_s3 + $0x38] sm:$0xf0]  ;;  %v593_v57 = vld [vmem:[%s1086_s3 + $0x20] sm:$0xf]  ;;  %v708_v58 = vld [vmem:[%s1086_s3 + $0x24] sm:$0xf0] }
   0xa   :  { %44 = vadd.xlane.f32.xlu1 %v825_v2  ;;  %40 = vadd.xlane.f32.xlu0 %v830_v3  ;;  %v48_v7 = vsub.f32 1.0, %v47_v6  ;;  %v606_v56 = vor.u32 %v709_v53, %v603_v55  ;;  %v707_v59 = vld [vmem:[%s1086_s3 + $0x24] sm:$0xf]  ;;  %v594_v60 = vor.u32 %v708_v58, %v593_v57  ;;  %v595_v61 = vld [vmem:[%s1086_s3 + $0x28] sm:$0xf0]  ;;  %v726_v46 = vld [vmem:[%s1087_s5 + $0x38] sm:$0xff] }
   0xb   :  { %263 = vmatpush.bf16.msra.mxu1 %v630_v38  ;;  %v598_v62 = vor.u32 %v707_v59, %v595_v61  ;;  %v585_v63 = vld [vmem:[%s1086_s3 + $0x10] sm:$0xf]  ;;  %v706_v4 = vld [vmem:[%s1086_s3 + $0x14] sm:$0xf0]  ;;  %425 = vmatpush.bf16.msra.mxu2 %v726_v46  ;;  %v724_v59 = vld [vmem:[%s1087_s5 + $0x28] sm:$0xff] }
   0xc   :  { %v49_v8 = vmul.f32 %v742_v5, %v48_v7  ;;  %v586_v6 = vor.u32 %v706_v4, %v585_v63  ;;  %v587_v7 = vld [vmem:[%s1086_s3 + $0x18] sm:$0xf0]  ;;  %v725_v51 = vld [vmem:[%s1087_s5 + $0x30] sm:$0xff]  ;;  %v737_v4 = vld [vmem:[%s1085_s2] ss:$0 sm:$0xff] }
   0xd   :  { %245 = vmatpush.bf16.msra.mxu0 %v618_v42  ;;  %v734_v47 = vld [vmem:[%s1087_s5 + $0x78] sm:$0xff]  ;;  %v733_v52 = vld [vmem:[%s1087_s5 + $0x70] sm:$0xff] }
   0xe   :  { %v50_v9 = vadd.f32 %v742_v5, %v49_v8  ;;  %v577_v8 = vld [vmem:[%s1086_s3] sm:$0xf]  ;;  %444 = vmatpush.bf16.msra.mxu3 %v734_v47 }
   0xf   :  { %264 = vmatpush.bf16.msra.mxu1 %v622_v44  ;;  %426 = vmatpush.bf16.msra.mxu2 %v725_v51 }
  0x10   :  { %v834_v10 = vsel %vm51_vm0, %v742_v5, %v50_v9  ;;  %v705_v5 = vld [vmem:[%s1086_s3 + $0x14] sm:$0xf]  ;;  %v704_v9 = vld [vmem:[%s1086_s3 + $0x4] sm:$0xf0] }
  0x11   :  { %246 = vmatpush.bf16.msra.mxu0 %v610_v48 }
  0x12   :  { %445 = vmatpush.bf16.msra.mxu3 %v733_v52 }
  0x13   :  { %265 = vmatpush.bf16.msra.mxu1 %v614_v50  ;;  %427 = vmatpush.bf16.msra.mxu2 %v724_v59 }
  0x15   :  { %247 = vmatpush.bf16.msra.mxu0 %v602_v54 }
  0x17   :  { %266 = vmatpush.bf16.msra.mxu1 %v606_v56  ;;  %v736_v56 = vld [vmem:[%s1084_s1] ss:$0 sm:$0xff] }
  0x19   :  { %248 = vmatpush.bf16.msra.mxu0 %v594_v60  ;;  %v732_v60 = vld [vmem:[%s1087_s5 + $0x68] sm:$0xff] }
  0x1a   :  { %446 = vmatpush.bf16.msra.mxu3 %v732_v60 }
  0x1b   :  { %267 = vmatpush.bf16.msra.mxu1 %v598_v62 }
  0x1d   :  { %249 = vmatpush.bf16.msra.mxu0 %v586_v6 }
  0x75   :  { %v43_v11 = vpop.xlane.xlu1 %42  ;;  %v39_v12 = vpop.xlane.xlu0 %38 }
  0x76   :  { %v55_v13 = vmul.f32 %v834_v10, %v43_v11  ;;  %v53_v14 = vmul.f32 %v834_v10, %v39_v12  ;;  %v590_v11 = vor.u32 %v705_v5, %v587_v7  ;;  %v703_v12 = vld [vmem:[%s1086_s3 + $0x4] sm:$0xf] }
  0x77   :  { %v723_v7 = vld [vmem:[%s1087_s5 + $0x20] sm:$0xff] }
  0x78   :  { %v839_v15 = vsub.f32 %v813_v0, %v55_v13  ;;  %v842_v16 = vsub.f32 %v818_v1, %v53_v14  ;;  %v579_v13 = vld [vmem:[%s1086_s3 + $0x8] sm:$0xf0]  ;;  %268 = vmatpush.bf16.msra.mxu1 %v590_v11  ;;  %428 = vmatpush.bf16.msra.mxu2 %v723_v7 }
  0x7a   :  { %v63_v17 = vmul.f32 %v839_v15, %v839_v15  ;;  %v61_v18 = vmul.f32 %v842_v16, %v842_v16 }
  0x7c   :  { %69 = vadd.xlane.f32.xlu0 %v63_v17  ;;  %65 = vadd.xlane.f32.xlu2 %v61_v18 }
  0x7d   :  { %v45_v19 = vpop.xlane.xlu1 %44  ;;  %v41_v20 = vpop.xlane.xlu0 %40 }
  0x7e   :  { %v56_v21 = vmul.f32 %v834_v10, %v45_v19  ;;  %v54_v22 = vmul.f32 %v834_v10, %v41_v20  ;;  %v578_v19 = vor.u32 %v704_v9, %v577_v8  ;;  %v582_v20 = vor.u32 %v703_v12, %v579_v13 }
  0x80   :  { %v851_v23 = vsub.f32 %v825_v2, %v56_v21  ;;  %v854_v24 = vsub.f32 %v830_v3, %v54_v22  ;;  %250 = vmatpush.bf16.msra.mxu0 %v578_v19  ;;  %269 = vmatpush.bf16.msra.mxu1 %v582_v20 }
  0x82   :  { %v64_v25 = vmul.f32 %v851_v23, %v851_v23  ;;  %v62_v26 = vmul.f32 %v854_v24, %v854_v24 }
  0x84   :  { %71 = vadd.xlane.f32.xlu1 %v64_v25  ;;  %67 = vadd.xlane.f32.xlu2 %v62_v26 }
  0xef   :  { %v66_v14 = vpop.xlane.xlu2 %65  ;;  %v70_v18 = vpop.xlane.xlu0 %69 }
  0xf0   :  { %v73_v17 = vmul.f32 %v66_v14, %v834_v10  ;;  %v75_v22 = vmul.f32 %v70_v18, %v834_v10 }
  0xf2   :  { %v77_v21 = vadd.f32 1e-05, %v73_v17  ;;  %v958_v25 = vadd.f32 1e-05, %v75_v22 }
  0xf4   :  { %743 = vrsqrt.f32 %v77_v21  ;;  %vm87_vm2 = vweird.f32 %v77_v21  ;;  %vm107_vm9 = vweird.f32 %v958_v25 }
  0xf5   :  { %745 = vrsqrt.f32 %v958_v25 }
  0xf7   :  { %v72_v26 = vpop.xlane.xlu1 %71  ;;  %v68_v27 = vpop.xlane.xlu2 %67 }
  0xf8   :  { %v76_v28 = vmul.f32 %v72_v26, %v834_v10  ;;  %v74_v29 = vmul.f32 %v68_v27, %v834_v10  ;;  %v722_v27 = vld [vmem:[%s1087_s5 + $0x18] sm:$0xff] }
  0xf9   :  { %429 = vmatpush.bf16.msra.mxu2 %v722_v27 }
  0xfa   :  { %v744_v30 = vpop.eup %743  ;;  %v80_v31 = vadd.f32 1e-05, %v76_v28  ;;  %v78_v32 = vadd.f32 1e-05, %v74_v29  ;;  %v730_v28 = vld [vmem:[%s1087_s5 + $0x58] sm:$0xff]  ;;  %v720_v29 = vld [vmem:[%s1087_s5 + $0x8] sm:$0xff] }
  0xfb   :  { %v82_v33 = vmul.f32 %v744_v30, %v77_v21  ;;  %v963_v36 = vpop.eup %745  ;;  %vm88_vm1 = vweird.f32 %v744_v30 }
  0xfc   :  { %747 = vrsqrt.f32 %v80_v31  ;;  %v102_v42 = vmul.f32 %v963_v36, %v958_v25  ;;  %vm89_vm3 = vmor %vm87_vm2, %vm88_vm1  ;;  %vm97_vm5 = vweird.f32 %v78_v32  ;;  %vm117_vm7 = vweird.f32 %v80_v31 }
  0xfd   :  { %v83_v34 = vmul.f32 %v744_v30, %v82_v33  ;;  %749 = vrsqrt.f32 %v78_v32  ;;  %vm108_vm10 = vweird.f32 %v963_v36  ;;  %v157_v33 = vld [vmem:[%s1089_s4] sm:$0x3] }
  0xfe   :  { %v103_v48 = vmul.f32 %v963_v36, %v102_v42  ;;  %vm109_vm12 = vmor %vm107_vm9, %vm108_vm10 }
  0xff   :  { %v84_v35 = vmul.f32 0.5, %v83_v34 }
 0x100   :  { %v104_v57 = vmul.f32 0.5, %v103_v48 }
 0x101   :  { %v85_v37 = vsub.f32 1.5, %v84_v35 }
 0x102   :  { %v965_v38 = vpop.eup %747  ;;  %v105_v5 = vsub.f32 1.5, %v104_v57 }
 0x103   :  { %v750_v39 = vpop.eup %749  ;;  %v112_v40 = vmul.f32 %v965_v38, %v80_v31  ;;  %v86_v41 = vmul.f32 %v744_v30, %v85_v37  ;;  %vm118_vm8 = vweird.f32 %v965_v38  ;;  %v719_v31 = vld [vmem:[%s1087_s5] sm:$0xff]  ;;  %v160_v37 = vperm.slane %v157_v33, 1 }
 0x104   :  { %v92_v43 = vmul.f32 %v750_v39, %v78_v32  ;;  %vm98_vm4 = vweird.f32 %v750_v39  ;;  %vm119_vm11 = vmor %vm117_vm7, %vm118_vm8  ;;  %v106_v12 = vmul.f32 %v963_v36, %v105_v5  ;;  %v727_v32 = vld [vmem:[%s1087_s5 + $0x40] sm:$0xff] }
 0x105   :  { %v113_v44 = vmul.f32 %v965_v38, %v112_v40  ;;  %v90_v50 = vsel %vm89_vm3, %v744_v30, %v86_v41  ;;  %vm99_vm6 = vmor %vm97_vm5, %vm98_vm4  ;;  %v728_v30 = vld [vmem:[%s1087_s5 + $0x48] sm:$0xff] }
 0x106   :  { %v93_v45 = vmul.f32 %v750_v39, %v92_v43  ;;  %v121_v55 = vmul.f32 %v90_v50, %v842_v16  ;;  %v110_v17 = vsel %vm109_vm12, %v963_v36, %v106_v12  ;;  %v159_v36 = vperm.slane %v157_v33, 0 }
 0x107   :  { %v114_v53 = vmul.f32 0.5, %v113_v44  ;;  %v123_v19 = vmul.f32 %v110_v17, %v839_v15  ;;  %v721_v15 = vld [vmem:[%s1087_s5 + $0x10] sm:$0xff] }
 0x108   :  { %v94_v49 = vmul.f32 0.5, %v93_v45  ;;  %v128_v63 = vmul.f32 %v736_v56, %v121_v55  ;;  %430 = vmatpush.bf16.msra.mxu2 %v721_v15 }
 0x109   :  { %v115_v61 = vsub.f32 1.5, %v114_v53  ;;  %v130_v21 = vmul.f32 %v736_v56, %v123_v19 }
 0x10a   :  { %v95_v54 = vsub.f32 1.5, %v94_v49  ;;  %v135_v9 = vadd.f32 %v737_v4, %v128_v63  ;;  %v738_v63 = vld [vmem:[%s1088_s6] ss:$0 sm:$0xff] }
 0x10b   :  { %v116_v8 = vmul.f32 %v965_v38, %v115_v61  ;;  %v137_v25 = vadd.f32 %v737_v4, %v130_v21 }
 0x10c   :  { %v96_v58 = vmul.f32 %v750_v39, %v95_v54  ;;  %431 = vmatpush.bf16.msra.mxu2 %v720_v29 }
 0x10d   :  { %v120_v14 = vsel %vm119_vm11, %v965_v38, %v116_v8 }
 0x10e   :  { %v100_v16 = vsel %vm99_vm6, %v750_v39, %v96_v58  ;;  %v124_v18 = vmul.f32 %v120_v14, %v851_v23  ;;  %v729_v23 = vld [vmem:[%s1087_s5 + $0x50] sm:$0xff] }
 0x10f   :  { %v122_v62 = vmul.f32 %v100_v16, %v854_v24  ;;  %v731_v24 = vld [vmem:[%s1087_s5 + $0x60] sm:$0xff] }
 0x110   :  { %447 = vmatpush.bf16.msra.mxu3 %v731_v24  ;;  %v131_v20 = vmul.f32 %v736_v56, %v124_v18  ;;  %432 = vmatpush.bf16.msra.mxu2 %v719_v31 }
 0x111   :  { %v129_v6 = vmul.f32 %v736_v56, %v122_v62 }
 0x112   :  { %v138_v22 = vadd.f32 %v737_v4, %v131_v20 }
 0x113   :  { %v136_v11 = vadd.f32 %v737_v4, %v129_v6 }
 0x114   :  { %v140_v26 = vpack.c.bf16 %v138_v22, %v137_v25  ;;  %448 = vmatpush.bf16.msra.mxu3 %v730_v28 }
 0x115   :  { %v139_v13 = vpack.c.bf16 %v136_v11, %v135_v9 }
 0x117   :  { %251 = vmatmul.bf16.vlgmr.msra.gmra.mxu0 %v139_v13  ;;  %270 = vmatmul.bf16.vlgmr.msra.gmra.mxu1 %v139_v13 }
 0x118   :  { %449 = vmatpush.bf16.msra.mxu3 %v729_v23 }
 0x11c   :  { %450 = vmatpush.bf16.msra.mxu3 %v728_v30 }
 0x120   :  { %451 = vmatpush.bf16.msra.mxu3 %v727_v32 }
 0x127   :  { %256 = vmatmul.bf16.gmra.mxu0 %v140_v26  ;;  %275 = vmatmul.bf16.gmra.mxu1 %v140_v26 }
 0x194   :  { %v252_v34 = vpop.f32.mrf.mxu0  ;;  %v271_v35 = vpop.f32.mrf.mxu1 }
 0x195   :  { %v253_v38 = vadd.f32 %v252_v34, %v159_v36  ;;  %v272_v39 = vadd.f32 %v271_v35, %v160_v37 }
 0x197   :  { %v281_v44 = vmax.f32 %v253_v38, 0.0  ;;  %v282_v45 = vmax.f32 %v272_v39, 0.0 }
 0x19c   :  { %v254_v40 = vpop.f32.mrf.mxu0  ;;  %v273_v41 = vpop.f32.mrf.mxu1 }
 0x19d   :  { %v255_v42 = vadd.f32 %v254_v40, %v159_v36  ;;  %v274_v43 = vadd.f32 %v273_v41, %v160_v37 }
 0x19f   :  { %v283_v46 = vmax.f32 %v255_v42, 0.0  ;;  %v284_v47 = vmax.f32 %v274_v43, 0.0 }
 0x1a1   :  { %v289_v48 = vpack.c.bf16 %v283_v46, %v281_v44  ;;  %v290_v49 = vpack.c.bf16 %v284_v47, %v282_v45 }
 0x1a3   :  { %433 = vmatmul.bf16.vlgmr.msra.gmra.mxu2 %v289_v48  ;;  %452 = vmatmul.bf16.vlgmr.msra.gmra.mxu3 %v290_v49 }
 0x1a4   :  { %v257_v50 = vpop.f32.mrf.mxu0  ;;  %v276_v51 = vpop.f32.mrf.mxu1 }
 0x1a5   :  { %v258_v52 = vadd.f32 %v257_v50, %v159_v36  ;;  %v277_v53 = vadd.f32 %v276_v51, %v160_v37 }
 0x1a7   :  { %v285_v58 = vmax.f32 %v258_v52, 0.0  ;;  %v286_v59 = vmax.f32 %v277_v53, 0.0 }
 0x1ac   :  { %v259_v54 = vpop.f32.mrf.mxu0  ;;  %v278_v55 = vpop.f32.mrf.mxu1 }
 0x1ad   :  { %v260_v56 = vadd.f32 %v259_v54, %v159_v36  ;;  %v279_v57 = vadd.f32 %v278_v55, %v160_v37 }
 0x1af   :  { %v287_v60 = vmax.f32 %v260_v56, 0.0  ;;  %v288_v61 = vmax.f32 %v279_v57, 0.0 }
 0x1b1   :  { %v291_v16 = vpack.c.bf16 %v287_v60, %v285_v58  ;;  %v292_v62 = vpack.c.bf16 %v288_v61, %v286_v59  ;;  %v739_v59 = vld [vmem:[%s1090_s7] ss:$0 sm:$0xff] }
 0x1b3   :  { %438 = vmatmul.bf16.gmra.mxu2 %v291_v16  ;;  %457 = vmatmul.bf16.gmra.mxu3 %v292_v62  ;;  %v740_v16 = vld [vmem:[%s1091_s8] ss:$0 sm:$0xff] }
 0x226   :  { %v434_v4 = vpop.f32.mrf.mxu2  ;;  %v453_v5 = vpop.f32.mrf.mxu3 }
 0x227   :  { %v435_v6 = vadd.f32 %v738_v63, %v434_v4 }
 0x229   :  { %v454_v7 = vadd.f32 %v453_v5, %v435_v6 }
 0x22b   :  { %v463_v24 = vmul.f32 0.5, %v454_v7 }
 0x22d   :  { %v467_v8 = vadd.f32 %v463_v24, %v818_v1 }
 0x22e   :  { %v436_v9 = vpop.f32.mrf.mxu2  ;;  %v455_v11 = vpop.f32.mrf.mxu3 }
 0x22f   :  { %v437_v12 = vadd.f32 %v738_v63, %v436_v9  ;;  %473 = vadd.xlane.f32.xlu2 %v467_v8 }
 0x231   :  { %v456_v13 = vadd.f32 %v455_v11, %v437_v12 }
 0x233   :  { %v464_v14 = vmul.f32 0.5, %v456_v13 }
 0x235   :  { %v468_v17 = vadd.f32 %v464_v14, %v830_v3 }
 0x236   :  { %v439_v18 = vpop.f32.mrf.mxu2  ;;  %v458_v19 = vpop.f32.mrf.mxu3 }
 0x237   :  { %v440_v20 = vadd.f32 %v738_v63, %v439_v18  ;;  %475 = vadd.xlane.f32.xlu0 %v468_v17 }
 0x239   :  { %v459_v21 = vadd.f32 %v458_v19, %v440_v20 }
 0x23b   :  { %v465_v22 = vmul.f32 0.5, %v459_v21 }
 0x23d   :  { %v469_v25 = vadd.f32 %v465_v22, %v813_v0 }
 0x23e   :  { %v441_v26 = vpop.f32.mrf.mxu2  ;;  %v460_v1 = vpop.f32.mrf.mxu3 }
 0x23f   :  { %v442_v27 = vadd.f32 %v738_v63, %v441_v26  ;;  %477 = vadd.xlane.f32.xlu1 %v469_v25 }
 0x241   :  { %v461_v28 = vadd.f32 %v460_v1, %v442_v27 }
 0x243   :  { %v466_v15 = vmul.f32 0.5, %v461_v28 }
 0x245   :  { %v470_v23 = vadd.f32 %v466_v15, %v825_v2 }
 0x247   :  { %479 = vadd.xlane.f32.xlu2 %v470_v23 }
 0x2a2   :  { %v474_v29 = vpop.xlane.xlu2 %473 }
 0x2a3   :  { %v481_v3 = vmul.f32 %v474_v29, %v834_v10 }
 0x2a5   :  { %v485_v30 = vsub.f32 %v467_v8, %v481_v3 }
 0x2a7   :  { %v489_v31 = vmul.f32 %v485_v30, %v485_v30 }
 0x2a9   :  { %493 = vadd.xlane.f32.xlu0 %v489_v31 }
 0x2aa   :  { %v476_v32 = vpop.xlane.xlu0 %475 }
 0x2ab   :  { %v482_v33 = vmul.f32 %v476_v32, %v834_v10 }
 0x2ad   :  { %v486_v34 = vsub.f32 %v468_v17, %v482_v33 }
 0x2af   :  { %v490_v0 = vmul.f32 %v486_v34, %v486_v34 }
 0x2b1   :  { %495 = vadd.xlane.f32.xlu1 %v490_v0 }
 0x2b2   :  { %v478_v35 = vpop.xlane.xlu1 %477 }
 0x2b3   :  { %v483_v36 = vmul.f32 %v478_v35, %v834_v10 }
 0x2b5   :  { %v1050_v37 = vsub.f32 %v469_v25, %v483_v36 }
 0x2b7   :  { %v491_v2 = vmul.f32 %v1050_v37, %v1050_v37 }
 0x2b9   :  { %497 = vadd.xlane.f32.xlu2 %v491_v2 }
 0x2ba   :  { %v480_v38 = vpop.xlane.xlu2 %479 }
 0x2bb   :  { %v484_v39 = vmul.f32 %v480_v38, %v834_v10 }
 0x2bd   :  { %v1055_v40 = vsub.f32 %v470_v23, %v484_v39 }
 0x2bf   :  { %v492_v41 = vmul.f32 %v1055_v40, %v1055_v40 }
 0x2c1   :  { %499 = vadd.xlane.f32.xlu0 %v492_v41 }
 0x31c   :  { %v494_v42 = vpop.xlane.xlu0 %493 }
 0x31d   :  { %v501_v43 = vmul.f32 %v494_v42, %v834_v10 }
 0x31f   :  { %v505_v44 = vadd.f32 1e-05, %v501_v43 }
 0x321   :  { %751 = vrsqrt.f32 %v505_v44  ;;  %vm515_vm14 = vweird.f32 %v505_v44 }
 0x324   :  { %v496_v45 = vpop.xlane.xlu1 %495 }
 0x325   :  { %v502_v46 = vmul.f32 %v496_v45, %v834_v10 }
 0x327   :  { %v752_v47 = vpop.eup %751  ;;  %v506_v48 = vadd.f32 1e-05, %v502_v46 }
 0x328   :  { %v510_v49 = vmul.f32 %v752_v47, %v505_v44  ;;  %vm516_vm13 = vweird.f32 %v752_v47 }
 0x329   :  { %753 = vrsqrt.f32 %v506_v48  ;;  %vm517_vm15 = vmor %vm515_vm14, %vm516_vm13  ;;  %vm525_vm1 = vweird.f32 %v506_v48 }
 0x32a   :  { %v511_v50 = vmul.f32 %v752_v47, %v510_v49 }
 0x32c   :  { %v512_v51 = vmul.f32 0.5, %v511_v50  ;;  %v498_v52 = vpop.xlane.xlu2 %497 }
 0x32d   :  { %v503_v53 = vmul.f32 %v498_v52, %v834_v10 }
 0x32e   :  { %v513_v54 = vsub.f32 1.5, %v512_v51 }
 0x32f   :  { %v754_v55 = vpop.eup %753  ;;  %v507_v56 = vadd.f32 1e-05, %v503_v53 }
 0x330   :  { %v514_v57 = vmul.f32 %v752_v47, %v513_v54  ;;  %v520_v58 = vmul.f32 %v754_v55, %v506_v48  ;;  %vm526_vm0 = vweird.f32 %v754_v55 }
 0x331   :  { %755 = vrsqrt.f32 %v507_v56  ;;  %vm527_vm2 = vmor %vm525_vm1, %vm526_vm0  ;;  %vm535_vm4 = vweird.f32 %v507_v56 }
 0x332   :  { %v518_v60 = vsel %vm517_vm15, %v752_v47, %v514_v57  ;;  %v521_v61 = vmul.f32 %v754_v55, %v520_v58 }
 0x333   :  { %v549_v62 = vmul.f32 %v518_v60, %v485_v30 }
 0x334   :  { %v522_v63 = vmul.f32 0.5, %v521_v61  ;;  %v500_v4 = vpop.xlane.xlu0 %499 }
 0x335   :  { %v556_v5 = vmul.f32 %v739_v59, %v549_v62  ;;  %v504_v6 = vmul.f32 %v500_v4, %v834_v10 }
 0x336   :  { %v523_v7 = vsub.f32 1.5, %v522_v63 }
 0x337   :  { %v756_v24 = vpop.eup %755  ;;  %v563_v8 = vadd.f32 %v740_v16, %v556_v5  ;;  %v508_v9 = vadd.f32 1e-05, %v504_v6 }
 0x338   :  { %v524_v11 = vmul.f32 %v754_v55, %v523_v7  ;;  %v530_v12 = vmul.f32 %v756_v24, %v507_v56  ;;  %vm536_vm3 = vweird.f32 %v756_v24 }
 0x339   :  { %567 = vst [vmem:[%s1092_s9] sm:$0xff] %v563_v8  ;;  %757 = vrsqrt.f32 %v508_v9  ;;  %vm537_vm5 = vmor %vm535_vm4, %vm536_vm3  ;;  %vm545_vm7 = vweird.f32 %v508_v9 }
 0x33a   :  { %v528_v13 = vsel %vm527_vm2, %v754_v55, %v524_v11  ;;  %v531_v14 = vmul.f32 %v756_v24, %v530_v12 }
 0x33b   :  { %v550_v17 = vmul.f32 %v528_v13, %v486_v34 }
 0x33c   :  { %v532_v18 = vmul.f32 0.5, %v531_v14 }
 0x33d   :  { %v557_v19 = vmul.f32 %v739_v59, %v550_v17 }
 0x33e   :  { %v533_v10 = vsub.f32 1.5, %v532_v18 }
 0x33f   :  { %v758_v20 = vpop.eup %757  ;;  %v564_v21 = vadd.f32 %v740_v16, %v557_v19 }
 0x340   :  { %v534_v22 = vmul.f32 %v756_v24, %v533_v10  ;;  %v540_v25 = vmul.f32 %v758_v20, %v508_v9  ;;  %vm546_vm6 = vweird.f32 %v758_v20 }
 0x341   :  { %568 = vst [vmem:[%s1092_s9 + $0x8] sm:$0xff] %v564_v21  ;;  %vm547_vm8 = vmor %vm545_vm7, %vm546_vm6 }
 0x342   :  { %v538_v26 = vsel %vm537_vm5, %v756_v24, %v534_v22  ;;  %v541_v27 = vmul.f32 %v758_v20, %v540_v25 }
 0x343   :  { %v551_v1 = vmul.f32 %v538_v26, %v1050_v37 }
 0x344   :  { %v542_v28 = vmul.f32 0.5, %v541_v27 }
 0x345   :  { %v558_v15 = vmul.f32 %v739_v59, %v551_v1 }
 0x346   :  { %v543_v23 = vsub.f32 1.5, %v542_v28 }
 0x347   :  { %v565_v29 = vadd.f32 %v740_v16, %v558_v15 }
 0x348   :  { %v544_v3 = vmul.f32 %v758_v20, %v543_v23 }
 0x349   :  { %569 = vst [vmem:[%s1092_s9 + $0x10] sm:$0xff] %v565_v29 }
 0x34a   :  { %v548_v30 = vsel %vm547_vm8, %v758_v20, %v544_v3 }
 0x34b   :  { %v552_v31 = vmul.f32 %v548_v30, %v1055_v40 }
 0x34d   :  { %v559_v32 = vmul.f32 %v739_v59, %v552_v31 }
 0x34f   :  { %v566_v33 = vadd.f32 %v740_v16, %v559_v32 }
 0x351   :  { %570 = vst [vmem:[%s1092_s9 + $0x18] sm:$0xff] %v566_v33 }

// kernel: conformer_css_forward.15
= control target key start
LH: loop header
LB: loop body
LE: loop exit
PB: predicated region body
PF: predicated region fallthrough
CT: control target
= control target key end

     0   :  { %s1554_s24 = smov 0   ;;  %s1556_s25 = smov 0   ;;  %s1793_s0 = inlined_call_operand.vmem [shape: bf16[2,16,384], index: 0, kind: input, shape index: {}, may-alias: {0,1,2}]   ;;  %s1794_s1 = inlined_call_operand.vmem [shape: bf16[2,16,384], index: 1, kind: input, shape index: {}, may-alias: {0,1,2}]   ;;  %s1795_s2 = inlined_call_operand.vmem [shape: bf16[2,16,384], index: 2, kind: input, shape index: {}, may-alias: {0,1,2}]   ;;  %s1796_s3 = inlined_call_operand.vmem [shape: bf16[2,4,16,16], index: 3, kind: input, shape index: {}]   ;;  %s1797_s4 = inlined_call_operand.vmem [shape: f32[2,16,128], index: 4, kind: input, shape index: {}]   ;;  %s1798_s5 = inlined_call_operand.vmem [shape: bf16[128,128], index: 5, kind: input, shape index: {}]   ;;  %s1799_s6 = inlined_call_operand.vmem [shape: f32[1,128], index: 6, kind: input, shape index: {}]   ;;  %s1800_s7 = inlined_call_operand.vmem [shape: f32[2,16,128], index: 7, kind: output, shape index: {}]  }
   0x1   :  { %s1558_s26 = smov 0   ;;  %s1560_s27 = smov 0  }
   0x2   :  { %s1562_s28 = smov 0  }
   0x3 LB: > { %s29_s29 = sadd.s32 1, %s1505_s27  ;;  %p45_p1 = scmp.ne.s32.totalorder %s1497_s25, %s1493_s24  ;;  %s1509_s28 = sphi %s1562_s28, %s17_s28   ;;  %s1505_s27 = sphi %s1560_s27, %s1807_s27   ;;  %s1501_s26 = sphi %s1558_s26, %s1806_s26   ;;  %s1497_s25 = sphi %s1556_s25, %s1805_s25   ;;  %s1493_s24 = sphi %s1554_s24, %s1804_s24  }
   0x4   : > { %p31_p0 = scmp.ge.s32.totalorder %s29_s29, 2  ;;  %p46_p2 = scmp.eq.s32.totalorder %s1509_s28, 0 }
   0x5   : > { %s38_s9 = sadd.s32 1, %s1497_s25  ;;  %p1280_p5 = scmp.ge.s32.totalorder %s1509_s28, 2 }
   0x6   : > { %s1809_s29 = smov (%p31_p0, %s29_s29), 0  ;;  %p1585_p3 = por %p46_p2, %p45_p1 }
   0x7   : > { %s33_s8 = ssub.s32 %s1505_s27, %s1809_s29  ;;  %255 = sbr.rel (%p1280_p5) target bundleno = 33 (0x21), region = 24 }
   0x8   : > { %p36_p4 = scmp.eq.s32.totalorder %s33_s8, 0 }
   0xa   : > { %s1593_s10 = scalar_select %p36_p4, %s1497_s25, %s38_s9  }
   0xc   : > { %258 = sbr.rel (!%p1585_p3) target bundleno = 19 (0x13), region = 28  ;;  %s260_s11 = sand.u32 (%p1585_p3), 1, %s1497_s25  }
   0xd   : > { %s1394_s12 = smul.u32 (%p1585_p3), 24, %s1505_s27  ;;  %s1281_s13 = sshll.u32 (%p1585_p3), %s260_s11, 3 }
   0xe   : > { %s262_s17 = scalar_lea.vmem (%p1585_p3), [#allocation3], %s1281_s13 }
   0xf   : > { %s268_s16 = scalar_lea.vmem (%p1585_p3), %s1793_s0, %s1394_s12 }
  0x10   : > { %v285_v0 = vld [vmem:[%s268_s16] sm:$0xf] (%p1585_p3)  ;;  %v287_v1 = vld [vmem:[%s268_s16 + $0xc] sm:$0xf] (%p1585_p3) }
  0x11   : > { %286 = vst [vmem:[%s262_s17] sm:$0xf] %v285_v0 }
  0x12   : > { %288 = vst [vmem:[%s262_s17 + $0x4] sm:$0xf] %v287_v1 }
  0x13 PF: > { %316 = sbr.rel (!%p1585_p3) target bundleno = 26 (0x1a), region = 69  ;;  %s318_s18 = sand.u32 (%p1585_p3), 1, %s1497_s25  }
  0x14   : > { %s1284_s19 = smul.u32 (%p1585_p3), 24, %s1505_s27  ;;  %s1283_s20 = sshll.u32 (%p1585_p3), %s318_s18, 3 }
  0x15   : > { %s320_s8 = scalar_lea.vmem (%p1585_p3), [#allocation4], %s1283_s20 }
  0x16   : > { %s1152_s23 = scalar_lea.vmem (%p1585_p3), %s1794_s1, %s1284_s19 }
  0x17   : > { %v1285_v2 = vld [vmem:[%s1152_s23 + $0x4] sm:$0xf] (%p1585_p3)  ;;  %v1286_v3 = vld [vmem:[%s1152_s23 + $0x10] sm:$0xf] (%p1585_p3) }
  0x18   : > { %342 = vst [vmem:[%s320_s8] sm:$0xf] %v1285_v2 }
  0x19   : > { %344 = vst [vmem:[%s320_s8 + $0x4] sm:$0xf] %v1286_v3 }
  0x1a PF: > { %372 = sbr.rel (!%p1585_p3) target bundleno = 33 (0x21), region = 110  ;;  %s374_s9 = sand.u32 (%p1585_p3), 1, %s1497_s25  }
  0x1b   : > { %s1288_s11 = smul.u32 (%p1585_p3), 24, %s1505_s27  ;;  %s1287_s12 = sshll.u32 (%p1585_p3), %s374_s9, 3 }
  0x1c   : > { %s376_s16 = scalar_lea.vmem (%p1585_p3), [#allocation5], %s1287_s12 }
  0x1d   : > { %s1158_s15 = scalar_lea.vmem (%p1585_p3), %s1795_s2, %s1288_s11 }
  0x1e   : > { %v1289_v4 = vld [vmem:[%s1158_s15 + $0x8] sm:$0xf] (%p1585_p3)  ;;  %v1290_v5 = vld [vmem:[%s1158_s15 + $0x14] sm:$0xf] (%p1585_p3) }
  0x1f   : > { %398 = vst [vmem:[%s376_s16] sm:$0xf] %v1289_v4 }
  0x20   : > { %400 = vst [vmem:[%s376_s16 + $0x4] sm:$0xf] %v1290_v5 }
  0x21 PF: > { %p1291_p6 = scmp.ge.s32.totalorder %s1509_s28, 1  ;;  %p453_p7 = scmp.lt.s32.totalorder %s1509_s28, 3 }
  0x23   : > { %p454_p8 = pnand %p1291_p6, %p453_p7 }
  0x24   : > { %s460_s30 = sand.u32 (!%p454_p8), 1, %s1493_s24   ;;  %s1511_s19 = smov (!%p454_p8), 96  }
  0x25   : > { %457 = sbr.rel (%p454_p8) target bundleno = 1415 (0x587), region = 159  ;;  %s1620_s17 = sshll.u32 (!%p454_p8), %s460_s30, 3 }
  0x26   : > { %s469_s18 = scalar_lea.vmem (!%p454_p8), [#allocation4], %s1620_s17  ;;  %s462_s20 = scalar_lea.vmem (!%p454_p8), [#allocation3], %s1620_s17 }
  0x27   : > { %p537_p9 = scmp.lt.s32.totalorder (!%p454_p8), %s1501_s26, 1  ;;  %s1512_s8 = smov (!%p454_p8), 64  }
  0x28   : > { %s476_s9 = scalar_lea.vmem (!%p454_p8), [#allocation5], %s1620_s17  ;;  %s1513_s11 = smov (!%p454_p8), 32  }
  0x2a   : > { %v1365_v6 = vld [vmem:[%s469_s18] sm:$0xff]  ;;  %v1364_v7 = vld [vmem:[%s462_s20] sm:$0xff]  ;;  %vm587_vm0 = vcmask 261120   ;;  %s1811_s26 = smov (!%p537_p9, %s1501_s26), 1  ;;  %vm610_vm1 = vcmask 130048  }
  0x2b   : > { %692 = vrot.lane.b32.xlu0 %v1365_v6, %s1511_s19  ;;  %s1361_s24 = sshll.u32 %s1811_s26, 5  ;;  %v1643_v22 = vld [vmem:[%s476_s9] sm:$0xff]  ;;  %v592_v33 = vsel %vm587_vm0, %v1365_v6, 0 }
  0x2c   : > { %s1636_s23 = scalar_lea.vmem %s1796_s3, %s1361_s24  ;;  %676 = vmatpush.bf16.msra.mxu1 %v1643_v22  ;;  %601 = vmatpush.bf16.xpose.msra.mxu0 %v592_v33 }
  0x2d   : > { %v1391_v11 = vld [vmem:[%s1636_s23 + $0x8] sm:$0xff]   ;;  %v1393_v4 = vld [vmem:[%s1636_s23 + $0x18] sm:$0xff]   ;;  %v1376_v5 = vld [vmem:[%s1636_s23] sm:$0xff]  }
  0x2e   : > { %v1381_v12 = vunpack.c.l.bf16 %v1391_v11  ;;  %v1382_v17 = vunpack.c.h.bf16 %v1391_v11 }
  0x33   : > { %690 = vrot.lane.b32.xlu0 %v1364_v7, %s1511_s19  ;;  %1309 = vmatmul.msk.bf16.vlgmr.msra.gmra.mxu0 %vm587_vm0, %v1364_v7 }
  0x3b   : > { %765 = vrot.lane.b32.xlu0 %v1643_v22, %s1511_s19 }
  0x43   : > { %801 = vrot.lane.b32.xlu0 %v1364_v7, %s1512_s8 }
  0x4b   : > { %912 = vrot.lane.b32.xlu0 %v1364_v7, %s1513_s11  ;;  %v1378_v7 = vunpack.c.h.bf16 %v1376_v5 }
  0x9d   : > { %v693_v8 = vpop.permute.xlu0 %692 }
  0x9e   : > { %v698_v9 = vsel %vm587_vm0, %v693_v8, 0 }
  0x9f   : > { %707 = vmatpush.bf16.xpose.msra.mxu2 %v698_v9 }
  0xa5   : > { %v691_v10 = vpop.permute.xlu0 %690 }
  0xa6   : > { %1317 = vmatmul.msk.bf16.vlgmr.msra.gmra.mxu2 %vm587_vm0, %v691_v10 }
  0xad   : > { %v766_v34 = vpop.permute.xlu0 %765 }
  0xae   : > { %778 = vmatpush.bf16.msra.mxu3 %v766_v34 }
  0xb0   : > { %v603_v2 = vpop.f32.mrf.mxu0 }
  0xb5   : > { %v802_v43 = vpop.permute.xlu0 %801 }
  0xb8   : > { %v605_v3 = vpop.f32.mrf.mxu0 }
  0xb9   : > { %v606_v10 = vadd.f32 %v1378_v7, %v605_v3 }
  0xbd   : > { %v913_v58 = vpop.permute.xlu0 %912 }
 0x129   : > { %v709_v13 = vpop.f32.mrf.mxu2 }
 0x12a   : > { %v710_v14 = vadd.f32 %v1381_v12, %v709_v13  ;;  %v1663_v13 = vmul.f32 0.17677669, %v606_v10 }
 0x12c   : > { %v714_v15 = vmul.f32 0.17677669, %v710_v14 }
 0x12e   : > { %v716_v16 = vsel %vm610_vm1, %v714_v15, -inf }
 0x12f   : > { %717 = vmax.xlane.f32.xlu1 %v716_v16 }
 0x131   : > { %v711_v18 = vpop.f32.mrf.mxu2 }
 0x132   : > { %v712_v19 = vadd.f32 %v1382_v17, %v711_v18  ;;  %v1392_v17 = vld [vmem:[%s1636_s23 + $0x10] sm:$0xff]  }
 0x133   : > { %v1385_v18 = vunpack.c.l.bf16 %v1392_v17 }
 0x134   : > { %v715_v20 = vmul.f32 0.17677669, %v712_v19 }
 0x136   : > { %v719_v21 = vsel %vm610_vm1, %v715_v20, -inf }
 0x137   : > { %720 = vmax.xlane.f32.xlu1 %v719_v21 }
 0x150   : > { %803 = vrot.lane.b32.xlu1 %v1365_v6, %s1512_s8 }
 0x1a2   : > { %v718_v23 = vpop.xlane.xlu1 %717 }
 0x1a3   : > { %v722_v24 = vsub.f32 %v714_v15, %v718_v23  ;;  %v614_v15 = vsel %vm610_vm1, %v1663_v13, -inf }
 0x1a5   : > { %v724_v25 = vmul.f32 1.442695, %v722_v24 }
 0x1a7   : > { %1439 = vpow2.f32 %v724_v25 }
 0x1aa   : > { %v721_v26 = vpop.xlane.xlu1 %720 }
 0x1ab   : > { %v723_v27 = vsub.f32 %v715_v20, %v721_v26  ;;  %v1377_v20 = vunpack.c.l.bf16 %v1376_v5  ;;  %v1386_v26 = vunpack.c.h.bf16 %v1392_v17 }
 0x1ad   : > { %v1440_v28 = vpop.eup %1439  ;;  %v726_v29 = vmul.f32 1.442695, %v723_v27  ;;  %v604_v24 = vadd.f32 %v1377_v20, %v603_v2 }
 0x1ae   : > { %v728_v30 = vsel %vm610_vm1, %v1440_v28, 0.0 }
 0x1af   : > { %1441 = vpow2.f32 %v726_v29  ;;  %729 = vadd.xlane.f32.xlu2 %v728_v30  ;;  %v1390_v30 = vunpack.c.h.bf16 %v1393_v4 }
 0x1b5   : > { %v1442_v31 = vpop.eup %1441 }
 0x1b6   : > { %v731_v32 = vsel %vm610_vm1, %v1442_v31, 0.0 }
 0x1b7   : > { %732 = vadd.xlane.f32.xlu2 %v731_v32 }
 0x1c2   : > { %v804_v35 = vpop.permute.xlu1 %803 }
 0x1c3   : > { %v809_v36 = vsel %vm587_vm0, %v804_v35, 0 }
 0x1c4   : > { %818 = vmatpush.bf16.xpose.msrb.mxu3 %v809_v36 }
 0x1cf   : > { %914 = vrot.lane.b32.xlu2 %v1365_v6, %s1513_s11  ;;  %v1389_v6 = vunpack.c.l.bf16 %v1393_v4 }
 0x222   : > { %v730_v37 = vpop.xlane.xlu2 %729 }
 0x223   : > { %1443 = vrcp.f32 %v730_v37  ;;  %v745_v48 = vand.u32 2147483648, %v730_v37  ;;  %vm739_vm3 = vweird.f32 %v730_v37  ;;  %v743_v50 = vand.u32 2147483647, %v730_v37 }
 0x225   : > { %v746_v56 = vor.u32 1.1754944e-38, %v745_v48  ;;  %vm744_vm6 = vcmp.eq.f32.partialorder %v743_v50, 8.507059e+37 }
 0x229   : > { %v1444_v38 = vpop.eup %1443 }
 0x22a   : > { %v735_v39 = vmul.f32 %v1444_v38, %v730_v37  ;;  %v733_v40 = vpop.xlane.xlu2 %732  ;;  %vm740_vm2 = vweird.f32 %v1444_v38 }
 0x22b   : > { %1445 = vrcp.f32 %v733_v40  ;;  %vm741_vm4 = vmor %vm739_vm3, %vm740_vm2  ;;  %v760_v52 = vand.u32 2147483648, %v733_v40  ;;  %v758_v54 = vand.u32 2147483647, %v733_v40  ;;  %vm754_vm7 = vweird.f32 %v733_v40 }
 0x22c   : > { %v736_v41 = vsub.f32 1.0, %v735_v39 }
 0x22d   : > { %v761_v59 = vor.u32 1.1754944e-38, %v760_v52  ;;  %vm759_vm9 = vcmp.eq.f32.partialorder %v758_v54, 8.507059e+37 }
 0x22e   : > { %v737_v42 = vmul.f32 %v1444_v38, %v736_v41 }
 0x230   : > { %v738_v45 = vadd.f32 %v1444_v38, %v737_v42 }
 0x231   : > { %v1446_v44 = vpop.eup %1445 }
 0x232   : > { %v750_v46 = vmul.f32 %v1446_v44, %v733_v40  ;;  %v915_v47 = vpop.permute.xlu2 %914  ;;  %vm755_vm5 = vweird.f32 %v1446_v44  ;;  %v742_v55 = vsel %vm741_vm4, %v1444_v38, %v738_v45 }
 0x233   : > { %v920_v49 = vsel %vm587_vm0, %v915_v47, 0  ;;  %vm756_vm8 = vmor %vm754_vm7, %vm755_vm5  ;;  %v747_v60 = vsel %vm744_vm6, %v746_v56, %v742_v55 }
 0x234   : > { %v751_v51 = vsub.f32 1.0, %v750_v46  ;;  %929 = vmatpush.bf16.xpose.msrb.mxu0 %v920_v49  ;;  %v748_v63 = vmul.f32 %v1440_v28, %v747_v60  ;;  %v608_v28 = vmul.f32 0.17677669, %v604_v24 }
 0x236   : > { %v752_v53 = vmul.f32 %v1446_v44, %v751_v51  ;;  %v611_v35 = vsel %vm610_vm1, %v608_v28, -inf }
 0x238   : > { %v753_v57 = vadd.f32 %v1446_v44, %v752_v53 }
 0x23a   : > { %v757_v61 = vsel %vm756_vm8, %v1446_v44, %v753_v57 }
 0x23b   : > { %1325 = vmatmul.msk.bf16.vlgmr.msrb.gmra.mxu0 %vm587_vm0, %v913_v58  ;;  %v762_v62 = vsel %vm759_vm9, %v761_v59, %v757_v61 }
 0x23c   : > { %v763_v0 = vmul.f32 %v1442_v31, %v762_v62 }
 0x23e   : > { %v764_v1 = vpack.c.bf16 %v763_v0, %v748_v63 }
 0x240   : > { %1318 = vmatmul.msk.bf16.vlgmr.msra.gmra.mxu3 %vm610_vm1, %v764_v1 }
 0x250   : > { %1321 = vmatmul.msk.bf16.vlgmr.msrb.gmra.mxu3 %vm587_vm0, %v802_v43 }
 0x2b8   : > { %v931_v8 = vpop.f32.mrf.mxu0 }
 0x2b9   : > { %v932_v9 = vadd.f32 %v1389_v6, %v931_v8 }
 0x2bb   : > { %v936_v11 = vmul.f32 0.17677669, %v932_v9 }
 0x2bd   : > { %v938_v12 = vsel %vm610_vm1, %v936_v11, -inf }
 0x2be   : > { %939 = vmax.xlane.f32.xlu1 %v938_v12 }
 0x2c0   : > { %v933_v31 = vpop.f32.mrf.mxu0 }
 0x2c1   : > { %v934_v33 = vadd.f32 %v1390_v30, %v933_v31 }
 0x2c3   : > { %v1665_v14 = vpop.f32.mrf.mxu3  ;;  %v937_v36 = vmul.f32 0.17677669, %v934_v33 }
 0x2c5   : > { %v941_v37 = vsel %vm610_vm1, %v937_v36, -inf }
 0x2c6   : > { %615 = vmax.xlane.f32.xlu1 %v614_v15 }
 0x2cb   : > { %v1669_v16 = vpop.f32.mrf.mxu3 }
 0x2d3   : > { %v820_v19 = vpop.f32.mrf.mxu3 }
 0x2d4   : > { %v821_v21 = vadd.f32 %v1385_v18, %v820_v19 }
 0x2d6   : > { %v825_v23 = vmul.f32 0.17677669, %v821_v21 }
 0x2d8   : > { %v827_v25 = vsel %vm610_vm1, %v825_v23, -inf }
 0x2d9   : > { %828 = vmax.xlane.f32.xlu0 %v827_v25 }
 0x2db   : > { %v822_v27 = vpop.f32.mrf.mxu3 }
 0x2dc   : > { %v823_v29 = vadd.f32 %v1386_v26, %v822_v27 }
 0x2de   : > { %v826_v32 = vmul.f32 0.17677669, %v823_v29 }
 0x2e0   : > { %v830_v34 = vsel %vm610_vm1, %v826_v32, -inf }
 0x2e1   : > { %831 = vmax.xlane.f32.xlu2 %v830_v34  ;;  %612 = vmax.xlane.f32.xlu0 %v611_v35 }
 0x2e9   : > { %942 = vmax.xlane.f32.xlu2 %v941_v37 }
 0x331   : > { %v940_v38 = vpop.xlane.xlu1 %939 }
 0x332   : > { %v944_v39 = vsub.f32 %v936_v11, %v940_v38 }
 0x334   : > { %v946_v40 = vmul.f32 1.442695, %v944_v39 }
 0x336   : > { %1447 = vpow2.f32 %v946_v40 }
 0x339   : > { %v616_v59 = vpop.xlane.xlu1 %615 }
 0x33a   : > { %v618_v61 = vsub.f32 %v1663_v13, %v616_v59 }
 0x33c   : > { %v1676_v41 = vpop.eup %1447  ;;  %v621_v63 = vmul.f32 1.442695, %v618_v61 }
 0x33d   : > { %v950_v42 = vsel %vm610_vm1, %v1676_v41, 0.0 }
 0x33e   : > { %951 = vadd.xlane.f32.xlu1 %v950_v42 }
 0x34c   : > { %v829_v43 = vpop.xlane.xlu0 %828 }
 0x34d   : > { %v833_v44 = vsub.f32 %v825_v23, %v829_v43 }
 0x34f   : > { %v835_v45 = vmul.f32 1.442695, %v833_v44 }
 0x351   : > { %1449 = vpow2.f32 %v835_v45 }
 0x354   : > { %v832_v46 = vpop.xlane.xlu2 %831  ;;  %v613_v51 = vpop.xlane.xlu0 %612 }
 0x355   : > { %v834_v47 = vsub.f32 %v826_v32, %v832_v46  ;;  %v617_v55 = vsub.f32 %v608_v28, %v613_v51 }
 0x357   : > { %v1680_v48 = vpop.eup %1449  ;;  %v837_v49 = vmul.f32 1.442695, %v834_v47  ;;  %987 = vrot.lane.b32.xlu1 %v1643_v22, %s1513_s11  ;;  %v619_v58 = vmul.f32 1.442695, %v617_v55 }
 0x358   : > { %v839_v50 = vsel %vm610_vm1, %v1680_v48, 0.0 }
 0x359   : > { %1451 = vpow2.f32 %v837_v49  ;;  %840 = vadd.xlane.f32.xlu2 %v839_v50 }
 0x35c   : > { %v943_v52 = vpop.xlane.xlu2 %942 }
 0x35d   : > { %v945_v53 = vsub.f32 %v937_v36, %v943_v52 }
 0x35f   : > { %v1686_v54 = vpop.eup %1451  ;;  %v948_v56 = vmul.f32 1.442695, %v945_v53 }
 0x360   : > { %v842_v57 = vsel %vm610_vm1, %v1686_v54, 0.0 }
 0x361   : > { %1453 = vpow2.f32 %v948_v56  ;;  %843 = vadd.xlane.f32.xlu0 %v842_v57 }
 0x362   : > { %1455 = vpow2.f32 %v619_v58 }
 0x363   : > { %1457 = vpow2.f32 %v621_v63 }
 0x367   : > { %v1690_v60 = vpop.eup %1453 }
 0x368   : > { %v953_v62 = vsel %vm610_vm1, %v1690_v60, 0.0  ;;  %v1695_v0 = vpop.eup %1455 }
 0x369   : > { %954 = vadd.xlane.f32.xlu2 %v953_v62  ;;  %v623_v1 = vsel %vm610_vm1, %v1695_v0, 0.0  ;;  %v1699_v2 = vpop.eup %1457 }
 0x36a   : > { %v626_v3 = vsel %vm610_vm1, %v1699_v2, 0.0 }
 0x371   : > { %624 = vadd.xlane.f32.xlu2 %v623_v1 }
 0x375   : > { %876 = vrot.lane.b32.xlu0 %v1643_v22, %s1512_s8 }
 0x379   : > { %627 = vadd.xlane.f32.xlu2 %v626_v3 }
 0x37d   : > { %787 = vrot.lane.b32.xlu0 %v1665_v14, %s1513_s11 }
 0x391   : > { %789 = vrot.lane.b32.xlu2 %v1669_v16, %s1513_s11  ;;  %s1362_s11 = sshll.u32 %s1811_s26, 4 }
 0x392   : > { %s554_s14 = scalar_lea.vmem %s1797_s4, %s1362_s11  ;;  %s564_s18 = scalar_lea.vmem %s1800_s7, %s1362_s11 }
 0x3b1   : > { %v1709_v4 = vpop.xlane.xlu1 %951 }
 0x3b2   : > { %v967_v37 = vand.u32 2147483648, %v1709_v4  ;;  %vm961_vm5 = vweird.f32 %v1709_v4  ;;  %v965_v42 = vand.u32 2147483647, %v1709_v4 }
 0x3b4   : > { %v968_v50 = vor.u32 1.1754944e-38, %v967_v37  ;;  %vm966_vm9 = vcmp.eq.f32.partialorder %v965_v42, 8.507059e+37  ;;  %v1099_v42 = vld [vmem:[%s554_s14] sm:$0xff] }
 0x3c9   : > { %v988_v6 = vpop.permute.xlu1 %987 }
 0x3ca   : > { %1000 = vmatpush.bf16.msrb.mxu2 %v988_v6 }
 0x3cc   : > { %v841_v5 = vpop.xlane.xlu2 %840 }
 0x3cd   : > { %1459 = vrcp.f32 %v841_v5  ;;  %v856_v18 = vand.u32 2147483648, %v841_v5  ;;  %vm850_vm11 = vweird.f32 %v841_v5  ;;  %v854_v19 = vand.u32 2147483647, %v841_v5 }
 0x3ce   : > { %1461 = vrcp.f32 %v1709_v4 }
 0x3cf   : > { %v857_v27 = vor.u32 1.1754944e-38, %v856_v18  ;;  %vm855_vm14 = vcmp.eq.f32.partialorder %v854_v19, 8.507059e+37  ;;  %v1374_v19 = vld [vmem:[%s1798_s5 + $0x38] sm:$0xff] }
 0x3d0   : > { %1085 = vmatpush.bf16.msrb.mxu1 %v1374_v19 }
 0x3d3   : > { %v1460_v7 = vpop.eup %1459 }
 0x3d4   : > { %v846_v22 = vmul.f32 %v1460_v7, %v841_v5  ;;  %v844_v8 = vpop.xlane.xlu0 %843  ;;  %v1712_v9 = vpop.eup %1461  ;;  %vm851_vm10 = vweird.f32 %v1460_v7 }
 0x3d5   : > { %1463 = vrcp.f32 %v844_v8  ;;  %v957_v12 = vmul.f32 %v1712_v9, %v1709_v4  ;;  %vm852_vm12 = vmor %vm850_vm11, %vm851_vm10  ;;  %v871_v21 = vand.u32 2147483648, %v844_v8  ;;  %v869_v25 = vand.u32 2147483647, %v844_v8 }
 0x3d6   : > { %v847_v10 = vsub.f32 1.0, %v846_v22  ;;  %vm865_vm15 = vweird.f32 %v844_v8  ;;  %vm962_vm4 = vweird.f32 %v1712_v9 }
 0x3d7   : > { %v958_v17 = vsub.f32 1.0, %v957_v12  ;;  %v872_v31 = vor.u32 1.1754944e-38, %v871_v21  ;;  %vm870_vm3 = vcmp.eq.f32.partialorder %v869_v25, 8.507059e+37  ;;  %vm1724_vm6 = vmor %vm961_vm5, %vm962_vm4 }
 0x3d8   : > { %v848_v11 = vmul.f32 %v1460_v7, %v847_v10 }
 0x3d9   : > { %v959_v26 = vmul.f32 %v1712_v9, %v958_v17 }
 0x3da   : > { %v849_v14 = vadd.f32 %v1460_v7, %v848_v11 }
 0x3db   : > { %v1464_v13 = vpop.eup %1463  ;;  %v960_v35 = vadd.f32 %v1712_v9, %v959_v26 }
 0x3dc   : > { %v861_v15 = vmul.f32 %v1464_v13, %v844_v8  ;;  %v955_v16 = vpop.xlane.xlu2 %954  ;;  %v853_v23 = vsel %vm852_vm12, %v1460_v7, %v849_v14  ;;  %vm866_vm13 = vweird.f32 %v1464_v13 }
 0x3dd   : > { %1465 = vrcp.f32 %v955_v16  ;;  %v858_v30 = vsel %vm855_vm14, %v857_v27, %v853_v23  ;;  %vm867_vm2 = vmor %vm865_vm15, %vm866_vm13  ;;  %v982_v46 = vand.u32 2147483648, %v955_v16  ;;  %v980_v49 = vand.u32 2147483647, %v955_v16 }
 0x3de   : > { %v862_v20 = vsub.f32 1.0, %v861_v15  ;;  %v859_v38 = vmul.f32 %v1680_v48, %v858_v30  ;;  %v964_v48 = vsel %vm1724_vm6, %v1712_v9, %v960_v35  ;;  %vm976_vm8 = vweird.f32 %v955_v16  ;;  %v1370_v30 = vld [vmem:[%s1798_s5 + $0x18] sm:$0xff] }
 0x3df   : > { %v969_v57 = vsel %vm966_vm9, %v968_v50, %v964_v48  ;;  %vm981_vm11 = vcmp.eq.f32.partialorder %v980_v49, 8.507059e+37  ;;  %vm1015_vm6 = vcmask 1048320  }
 0x3e0   : > { %v863_v24 = vmul.f32 %v1464_v13, %v862_v20  ;;  %v970_v61 = vmul.f32 %v1676_v41, %v969_v57  ;;  %v1373_v20 = vld [vmem:[%s1798_s5 + $0x30] sm:$0xff] }
 0x3e1   : > { %1086 = vmatpush.bf16.msrb.mxu1 %v1373_v20 }
 0x3e2   : > { %v864_v28 = vadd.f32 %v1464_v13, %v863_v24 }
 0x3e3   : > { %v1466_v29 = vpop.eup %1465 }
 0x3e4   : > { %v868_v32 = vsel %vm867_vm2, %v1464_v13, %v864_v28  ;;  %v972_v33 = vmul.f32 %v1466_v29, %v955_v16  ;;  %v625_v34 = vpop.xlane.xlu2 %624  ;;  %vm977_vm7 = vweird.f32 %v1466_v29  ;;  %v1372_v28 = vld [vmem:[%s1798_s5 + $0x28] sm:$0xff] }
 0x3e5   : > { %v873_v36 = vsel %vm870_vm3, %v872_v31, %v868_v32  ;;  %1467 = vrcp.f32 %v625_v34  ;;  %vm978_vm10 = vmor %vm976_vm8, %vm977_vm7  ;;  %v640_v6 = vand.u32 2147483648, %v625_v34  ;;  %vm634_vm13 = vweird.f32 %v625_v34  ;;  %1087 = vmatpush.bf16.msrb.mxu1 %v1372_v28  ;;  %v1369_v31 = vld [vmem:[%s1798_s5 + $0x10] sm:$0xff]  ;;  %v1368_v32 = vld [vmem:[%s1798_s5 + $0x8] sm:$0xff] }
 0x3e6   : > { %v874_v39 = vmul.f32 %v1686_v54, %v873_v36  ;;  %v973_v40 = vsub.f32 1.0, %v972_v33  ;;  %v983_v54 = vor.u32 1.1754944e-38, %v982_v46  ;;  %v638_v7 = vand.u32 2147483647, %v625_v34  ;;  %v1367_v33 = vld [vmem:[%s1798_s5] sm:$0xff] }
 0x3e7   : > { %v877_v43 = vpop.permute.xlu0 %876  ;;  %v641_v11 = vor.u32 1.1754944e-38, %v640_v6 }
 0x3e8   : > { %v974_v45 = vmul.f32 %v1466_v29, %v973_v40  ;;  %889 = vmatpush.bf16.msra.mxu3 %v877_v43  ;;  %v875_v47 = vpack.c.bf16 %v874_v39, %v859_v38  ;;  %vm639_vm2 = vcmp.eq.f32.partialorder %v638_v7, 8.507059e+37  ;;  %v1438_v43 = vld [vmem:[%s1799_s6] ss:$0 sm:$0xff] }
 0x3ea   : > { %v975_v51 = vadd.f32 %v1466_v29, %v974_v45 }
 0x3eb   : > { %v1468_v52 = vpop.eup %1467  ;;  %1322 = vmatmul.msk.bf16.vlgmr.msra.gmra.mxu3 %vm610_vm1, %v875_v47  ;;  %v1100_v47 = vld [vmem:[%s554_s14 + $0x8] sm:$0xff] }
 0x3ec   : > { %v979_v53 = vsel %vm978_vm10, %v1466_v29, %v975_v51  ;;  %v630_v55 = vmul.f32 %v1468_v52, %v625_v34  ;;  %v628_v56 = vpop.xlane.xlu2 %627  ;;  %vm635_vm12 = vweird.f32 %v1468_v52  ;;  %v1371_v29 = vld [vmem:[%s1798_s5 + $0x20] sm:$0xff] }
 0x3ed   : > { %1469 = vrcp.f32 %v628_v56  ;;  %v984_v59 = vsel %vm981_vm11, %v983_v54, %v979_v53  ;;  %vm636_vm14 = vmor %vm634_vm13, %vm635_vm12  ;;  %v655_v8 = vand.u32 2147483648, %v628_v56  ;;  %v653_v10 = vand.u32 2147483647, %v628_v56  ;;  %1088 = vmatpush.bf16.msrb.mxu1 %v1371_v29 }
 0x3ee   : > { %v631_v58 = vsub.f32 1.0, %v630_v55  ;;  %v985_v62 = vmul.f32 %v1690_v60, %v984_v59  ;;  %vm649_vm3 = vweird.f32 %v628_v56 }
 0x3ef   : > { %v656_v12 = vor.u32 1.1754944e-38, %v655_v8  ;;  %vm654_vm5 = vcmp.eq.f32.partialorder %v653_v10, 8.507059e+37  ;;  %v788_v25 = vpop.permute.xlu0 %787 }
 0x3f0   : > { %v632_v63 = vmul.f32 %v1468_v52, %v631_v58  ;;  %v986_v1 = vpack.c.bf16 %v985_v62, %v970_v61 }
 0x3f1   : > { %1089 = vmatpush.bf16.msrb.mxu1 %v1370_v30 }
 0x3f2   : > { %1326 = vmatmul.msk.bf16.vlgmr.msrb.gmra.mxu2 %vm610_vm1, %v986_v1  ;;  %v633_v4 = vadd.f32 %v1468_v52, %v632_v63 }
 0x3f3   : > { %v1470_v3 = vpop.eup %1469 }
 0x3f4   : > { %v645_v5 = vmul.f32 %v1470_v3, %v628_v56  ;;  %vm650_vm15 = vweird.f32 %v1470_v3  ;;  %v637_v41 = vsel %vm636_vm14, %v1468_v52, %v633_v4  ;;  %v790_v27 = vpop.permute.xlu2 %789 }
 0x3f5   : > { %vm651_vm4 = vmor %vm649_vm3, %vm650_vm15  ;;  %v642_v13 = vsel %vm639_vm2, %v641_v11, %v637_v41  ;;  %1090 = vmatpush.bf16.msrb.mxu1 %v1369_v31 }
 0x3f6   : > { %v646_v22 = vsub.f32 1.0, %v645_v5  ;;  %v643_v16 = vmul.f32 %v1695_v0, %v642_v13 }
 0x3f8   : > { %v647_v9 = vmul.f32 %v1470_v3, %v646_v22 }
 0x3f9   : > { %1091 = vmatpush.bf16.msrb.mxu1 %v1368_v32 }
 0x3fa   : > { %v648_v60 = vadd.f32 %v1470_v3, %v647_v9 }
 0x3fc   : > { %v652_v14 = vsel %vm651_vm4, %v1470_v3, %v648_v60 }
 0x3fd   : > { %v657_v15 = vsel %vm654_vm5, %v656_v12, %v652_v14  ;;  %1092 = vmatpush.bf16.msrb.mxu1 %v1367_v33 }
 0x3fe   : > { %v658_v17 = vmul.f32 %v1699_v2, %v657_v15 }
 0x400   : > { %v659_v18 = vpack.c.bf16 %v658_v17, %v643_v16 }
 0x402   : > { %1314 = vmatmul.msk.bf16.vlgmr.msra.gmra.mxu1 %vm610_vm1, %v659_v18  ;;  %vm793_vm1 = vcmask 523520  }
 0x46e   : > { %v891_v21 = vpop.f32.mrf.mxu3 }
 0x46f   : > { %898 = vrot.lane.b32.xlu1 %v891_v21, %s1512_s8 }
 0x475   : > { %v1002_v23 = vpop.f32.mrf.mxu2 }
 0x476   : > { %v893_v0 = vpop.f32.mrf.mxu3 }
 0x477   : > { %1009 = vrot.lane.b32.xlu1 %v1002_v23, %s1511_s19  ;;  %900 = vrot.lane.b32.xlu0 %v893_v0, %s1512_s8 }
 0x47d   : > { %v1004_v2 = vpop.f32.mrf.mxu2 }
 0x47f   : > { %v678_v24 = vpop.f32.mrf.mxu1  ;;  %1011 = vrot.lane.b32.xlu0 %v1004_v2, %s1511_s19 }
 0x480   : > { %683 = vst.msk [vmem:[#allocation2] sm:$0xff] %vm587_vm0, %v678_v24 }
 0x481   : > { %794 = vst.msk [vmem:[#allocation2] sm:$0xff] %vm793_vm1, %v788_v25 }
 0x487   : > { %v680_v26 = vpop.f32.mrf.mxu1 }
 0x488   : > { %684 = vst.msk [vmem:[#allocation2 + $0x8] sm:$0xff] %vm587_vm0, %v680_v26  ;;  %vm904_vm0 = vcmask 785920  }
 0x489   : > { %795 = vst.msk [vmem:[#allocation2 + $0x8] sm:$0xff] %vm793_vm1, %v790_v27 }
 0x4e1   : > { %v899_v34 = vpop.permute.xlu1 %898 }
 0x4e2   : > { %905 = vst.msk [vmem:[#allocation2] sm:$0xff] %vm904_vm0, %v899_v34 }
 0x4e9   : > { %v1010_v35 = vpop.permute.xlu1 %1009  ;;  %v901_v36 = vpop.permute.xlu0 %900 }
 0x4ea   : > { %1016 = vst.msk [vmem:[#allocation2] sm:$0xff] %vm1015_vm6, %v1010_v35 }
 0x4eb   : > { %906 = vst.msk [vmem:[#allocation2 + $0x8] sm:$0xff] %vm904_vm0, %v901_v36 }
 0x4f1   : > { %v1012_v37 = vpop.permute.xlu0 %1011  ;;  %v1018_v38 = vld [vmem:[#allocation2] sm:$0xff] }
 0x4f2   : > { %1017 = vst.msk [vmem:[#allocation2 + $0x8] sm:$0xff] %vm1015_vm6, %v1012_v37 }
 0x4f9   : > { %v1019_v39 = vld [vmem:[#allocation2 + $0x8] sm:$0xff] }
 0x4fa   : > { %v1020_v40 = vpack.c.bf16 %v1019_v39, %v1018_v38 }
 0x4fc   : > { %1093 = vmatmul.bf16.vlgmr.msrb.gmra.mxu1 %v1020_v40 }
 0x579   : > { %v1094_v44 = vpop.f32.mrf.mxu1 }
 0x57a   : > { %v1101_v45 = vadd.f32 %v1099_v42, %v1094_v44 }
 0x57c   : > { %v1107_v46 = vadd.f32 %v1438_v43, %v1101_v45 }
 0x57e   : > { %1109 = vst [vmem:[%s564_s18] sm:$0xff] %v1107_v46 }
 0x581   : > { %v1096_v48 = vpop.f32.mrf.mxu1 }
 0x582   : > { %v1102_v49 = vadd.f32 %v1100_v47, %v1096_v48 }
 0x584   : > { %v1108_v50 = vadd.f32 %v1438_v43, %v1102_v49 }
 0x586   : > { %1110 = vst [vmem:[%s564_s18 + $0x8] sm:$0xff] %v1108_v50 }
 0x587 PF: > { %s17_s28 = sadd.s32 1, %s1509_s28   ;;  %s1804_s24 = smov %s1497_s25 }
 0x588   : > { %p14_p10 = scmp.ge.s32.totalorder %s17_s28, 4   ;;  %s1805_s25 = smov %s1593_s10 }
 0x589   : > { %s1806_s26 = smov %s1505_s27  ;;  %s1807_s27 = smov %s1809_s29 }
 0x58a   :  { %16 = sbr.rel (!%p14_p10) target bundleno = 3 (0x3), region = 231 }

// kernel: conformer_css_forward.18
= control target key start
LH: loop header
LB: loop body
LE: loop exit
PB: predicated region body
PF: predicated region fallthrough
CT: control target
= control target key end

     0   :  { %v653_v4 = vmov 128.0   ;;  %s953_s0 = inlined_call_operand.vmem [shape: f32[32,128], index: 0, kind: input, shape index: {}]   ;;  %s954_s7 = inlined_call_operand.vmem [shape: f32[1,128], index: 7, kind: input, shape index: {}]   ;;  %s955_s8 = inlined_call_operand.vmem [shape: f32[1,128], index: 8, kind: input, shape index: {}]   ;;  %s956_s1 = inlined_call_operand.vmem [shape: f32[1,128], index: 1, kind: input, shape index: {}]   ;;  %s957_s2 = inlined_call_operand.vmem [shape: f32[1,128], index: 2, kind: input, shape index: {}]   ;;  %s958_s3 = inlined_call_operand.vmem [shape: bf16[128,256], index: 3, kind: input, shape index: {}]   ;;  %s959_s5 = inlined_call_operand.vmem [shape: bf16[256,128], index: 5, kind: input, shape index: {}]   ;;  %s960_s6 = inlined_call_operand.vmem [shape: f32[1,128], index: 6, kind: input, shape index: {}]   ;;  %s961_s4 = inlined_call_operand.vmem [shape: f32[1,256], index: 4, kind: input, shape index: {}]   ;;  %s962_s9 = inlined_call_operand.vmem [shape: f32[32,128], index: 9, kind: output, shape index: {}]  }
   0x1   :  { %v707_v0 = vld [vmem:[%s953_s0 + $0x10] sm:$0xff]  ;;  %v712_v1 = vld [vmem:[%s953_s0] sm:$0xff]  ;;  %v719_v2 = vld [vmem:[%s953_s0 + $0x18] sm:$0xff]  ;;  %643 = vrcp.f32 %v653_v4 }
   0x2   :  { %42 = vadd.xlane.f32.xlu1 %v707_v0  ;;  %38 = vadd.xlane.f32.xlu0 %v712_v1  ;;  %v724_v3 = vld [vmem:[%s953_s0 + $0x8] sm:$0xff]  ;;  %v537_v27 = vld [vmem:[%s958_s3 + $0x70] sm:$0xf]  ;;  %v622_v28 = vld [vmem:[%s958_s3 + $0x74] sm:$0xf0] }
   0x3   :  { %v621_v29 = vld [vmem:[%s958_s3 + $0x74] sm:$0xf]  ;;  %v538_v30 = vor.u32 %v622_v28, %v537_v27  ;;  %v539_v31 = vld [vmem:[%s958_s3 + $0x78] sm:$0xf0]  ;;  %v529_v33 = vld [vmem:[%s958_s3 + $0x60] sm:$0xf] }
   0x4   :  { %v542_v32 = vor.u32 %v621_v29, %v539_v31  ;;  %v620_v34 = vld [vmem:[%s958_s3 + $0x64] sm:$0xf0]  ;;  %v619_v35 = vld [vmem:[%s958_s3 + $0x64] sm:$0xf]  ;;  %v531_v37 = vld [vmem:[%s958_s3 + $0x68] sm:$0xf0] }
   0x5   :  { %243 = vmatpush.bf16.msra.mxu0 %v538_v30  ;;  %v530_v36 = vor.u32 %v620_v34, %v529_v33  ;;  %v534_v38 = vor.u32 %v619_v35, %v531_v37  ;;  %v521_v39 = vld [vmem:[%s958_s3 + $0x50] sm:$0xf]  ;;  %v618_v40 = vld [vmem:[%s958_s3 + $0x54] sm:$0xf0]  ;;  %v617_v41 = vld [vmem:[%s958_s3 + $0x54] sm:$0xf] }
   0x6   :  { %262 = vmatpush.bf16.msra.mxu1 %v542_v32  ;;  %v522_v42 = vor.u32 %v618_v40, %v521_v39  ;;  %v523_v43 = vld [vmem:[%s958_s3 + $0x58] sm:$0xf0]  ;;  %v513_v45 = vld [vmem:[%s958_s3 + $0x40] sm:$0xf]  ;;  %v616_v46 = vld [vmem:[%s958_s3 + $0x44] sm:$0xf0] }
   0x7   :  { %v644_v5 = vpop.eup %643  ;;  %v526_v44 = vor.u32 %v617_v41, %v523_v43  ;;  %v615_v47 = vld [vmem:[%s958_s3 + $0x44] sm:$0xf]  ;;  %v514_v48 = vor.u32 %v616_v46, %v513_v45  ;;  %v515_v49 = vld [vmem:[%s958_s3 + $0x48] sm:$0xf0]  ;;  %v505_v51 = vld [vmem:[%s958_s3 + $0x30] sm:$0xf] }
   0x8   :  { %v47_v6 = vmul.f32 128.0, %v644_v5  ;;  %vm51_vm0 = vweird.f32 %v644_v5  ;;  %v518_v50 = vor.u32 %v615_v47, %v515_v49  ;;  %v614_v52 = vld [vmem:[%s958_s3 + $0x34] sm:$0xf0]  ;;  %v613_v53 = vld [vmem:[%s958_s3 + $0x34] sm:$0xf] }
   0x9   :  { %244 = vmatpush.bf16.msra.mxu0 %v530_v36  ;;  %v506_v54 = vor.u32 %v614_v52, %v505_v51  ;;  %v507_v55 = vld [vmem:[%s958_s3 + $0x38] sm:$0xf0]  ;;  %v497_v57 = vld [vmem:[%s958_s3 + $0x20] sm:$0xf]  ;;  %v612_v58 = vld [vmem:[%s958_s3 + $0x24] sm:$0xf0] }
   0xa   :  { %44 = vadd.xlane.f32.xlu1 %v719_v2  ;;  %40 = vadd.xlane.f32.xlu0 %v724_v3  ;;  %v48_v7 = vsub.f32 1.0, %v47_v6  ;;  %v510_v56 = vor.u32 %v613_v53, %v507_v55  ;;  %v611_v59 = vld [vmem:[%s958_s3 + $0x24] sm:$0xf]  ;;  %v498_v60 = vor.u32 %v612_v58, %v497_v57  ;;  %v499_v61 = vld [vmem:[%s958_s3 + $0x28] sm:$0xf0]  ;;  %v630_v45 = vld [vmem:[%s959_s5 + $0x38] sm:$0xff] }
   0xb   :  { %263 = vmatpush.bf16.msra.mxu1 %v534_v38  ;;  %v502_v62 = vor.u32 %v611_v59, %v499_v61  ;;  %v489_v63 = vld [vmem:[%s958_s3 + $0x10] sm:$0xf]  ;;  %v610_v4 = vld [vmem:[%s958_s3 + $0x14] sm:$0xf0]  ;;  %425 = vmatpush.bf16.msra.mxu2 %v630_v45  ;;  %v640_v55 = vld [vmem:[%s956_s1] ss:$0 sm:$0xff] }
   0xc   :  { %v49_v8 = vmul.f32 %v644_v5, %v48_v7  ;;  %v490_v6 = vor.u32 %v610_v4, %v489_v63  ;;  %v491_v7 = vld [vmem:[%s958_s3 + $0x18] sm:$0xf0]  ;;  %v637_v51 = vld [vmem:[%s959_s5 + $0x70] sm:$0xff]  ;;  %v628_v58 = vld [vmem:[%s959_s5 + $0x28] sm:$0xff] }
   0xd   :  { %245 = vmatpush.bf16.msra.mxu0 %v522_v42  ;;  %v638_v46 = vld [vmem:[%s959_s5 + $0x78] sm:$0xff]  ;;  %v636_v59 = vld [vmem:[%s959_s5 + $0x68] sm:$0xff]  ;;  %v641_v63 = vld [vmem:[%s957_s2] ss:$0 sm:$0xff] }
   0xe   :  { %v50_v9 = vadd.f32 %v644_v5, %v49_v8  ;;  %v481_v8 = vld [vmem:[%s958_s3] sm:$0xf]  ;;  %444 = vmatpush.bf16.msra.mxu3 %v638_v46 }
   0xf   :  { %264 = vmatpush.bf16.msra.mxu1 %v526_v44 }
  0x10   :  { %v728_v10 = vsel %vm51_vm0, %v644_v5, %v50_v9  ;;  %v609_v5 = vld [vmem:[%s958_s3 + $0x14] sm:$0xf]  ;;  %v608_v9 = vld [vmem:[%s958_s3 + $0x4] sm:$0xf0] }
  0x11   :  { %246 = vmatpush.bf16.msra.mxu0 %v514_v48 }
  0x12   :  { %445 = vmatpush.bf16.msra.mxu3 %v637_v51 }
  0x13   :  { %265 = vmatpush.bf16.msra.mxu1 %v518_v50  ;;  %v629_v50 = vld [vmem:[%s959_s5 + $0x30] sm:$0xff] }
  0x14   :  { %426 = vmatpush.bf16.msra.mxu2 %v629_v50 }
  0x15   :  { %247 = vmatpush.bf16.msra.mxu0 %v506_v54 }
  0x16   :  { %446 = vmatpush.bf16.msra.mxu3 %v636_v59 }
  0x17   :  { %266 = vmatpush.bf16.msra.mxu1 %v510_v56 }
  0x18   :  { %427 = vmatpush.bf16.msra.mxu2 %v628_v58 }
  0x19   :  { %248 = vmatpush.bf16.msra.mxu0 %v498_v60 }
  0x1b   :  { %267 = vmatpush.bf16.msra.mxu1 %v502_v62 }
  0x1d   :  { %249 = vmatpush.bf16.msra.mxu0 %v490_v6  ;;  %v627_v6 = vld [vmem:[%s959_s5 + $0x20] sm:$0xff] }
  0x1e   :  { %428 = vmatpush.bf16.msra.mxu2 %v627_v6 }
  0x75   :  { %v43_v11 = vpop.xlane.xlu1 %42  ;;  %v39_v12 = vpop.xlane.xlu0 %38 }
  0x76   :  { %v55_v13 = vmul.f32 %v728_v10, %v43_v11  ;;  %v53_v14 = vmul.f32 %v728_v10, %v39_v12  ;;  %v494_v11 = vor.u32 %v609_v5, %v491_v7  ;;  %v607_v12 = vld [vmem:[%s958_s3 + $0x4] sm:$0xf] }
  0x78   :  { %v733_v15 = vsub.f32 %v707_v0, %v55_v13  ;;  %v736_v16 = vsub.f32 %v712_v1, %v53_v14  ;;  %v483_v13 = vld [vmem:[%s958_s3 + $0x8] sm:$0xf0]  ;;  %268 = vmatpush.bf16.msra.mxu1 %v494_v11 }
  0x7a   :  { %v63_v17 = vmul.f32 %v733_v15, %v733_v15  ;;  %v61_v18 = vmul.f32 %v736_v16, %v736_v16 }
  0x7c   :  { %69 = vadd.xlane.f32.xlu0 %v63_v17  ;;  %65 = vadd.xlane.f32.xlu2 %v61_v18 }
  0x7d   :  { %v45_v19 = vpop.xlane.xlu1 %44  ;;  %v41_v20 = vpop.xlane.xlu0 %40 }
  0x7e   :  { %v56_v21 = vmul.f32 %v728_v10, %v45_v19  ;;  %v54_v22 = vmul.f32 %v728_v10, %v41_v20  ;;  %v482_v19 = vor.u32 %v608_v9, %v481_v8  ;;  %v486_v20 = vor.u32 %v607_v12, %v483_v13 }
  0x80   :  { %v745_v23 = vsub.f32 %v719_v2, %v56_v21  ;;  %v748_v24 = vsub.f32 %v724_v3, %v54_v22  ;;  %250 = vmatpush.bf16.msra.mxu0 %v482_v19  ;;  %269 = vmatpush.bf16.msra.mxu1 %v486_v20 }
  0x82   :  { %v64_v25 = vmul.f32 %v745_v23, %v745_v23  ;;  %v62_v26 = vmul.f32 %v748_v24, %v748_v24 }
  0x84   :  { %71 = vadd.xlane.f32.xlu1 %v64_v25  ;;  %67 = vadd.xlane.f32.xlu2 %v62_v26 }
  0xef   :  { %v66_v14 = vpop.xlane.xlu2 %65  ;;  %v70_v18 = vpop.xlane.xlu0 %69 }
  0xf0   :  { %v73_v17 = vmul.f32 %v66_v14, %v728_v10  ;;  %v75_v22 = vmul.f32 %v70_v18, %v728_v10 }
  0xf2   :  { %v77_v21 = vadd.f32 1e-05, %v73_v17  ;;  %v852_v25 = vadd.f32 1e-05, %v75_v22 }
  0xf4   :  { %645 = vrsqrt.f32 %v77_v21  ;;  %vm87_vm2 = vweird.f32 %v77_v21  ;;  %vm107_vm9 = vweird.f32 %v852_v25 }
  0xf5   :  { %647 = vrsqrt.f32 %v852_v25 }
  0xf7   :  { %v72_v26 = vpop.xlane.xlu1 %71  ;;  %v68_v27 = vpop.xlane.xlu2 %67 }
  0xf8   :  { %v76_v28 = vmul.f32 %v72_v26, %v728_v10  ;;  %v74_v29 = vmul.f32 %v68_v27, %v728_v10  ;;  %v626_v26 = vld [vmem:[%s959_s5 + $0x18] sm:$0xff] }
  0xf9   :  { %v634_v27 = vld [vmem:[%s959_s5 + $0x58] sm:$0xff]  ;;  %429 = vmatpush.bf16.msra.mxu2 %v626_v26 }
  0xfa   :  { %v646_v30 = vpop.eup %645  ;;  %v80_v31 = vadd.f32 1e-05, %v76_v28  ;;  %v78_v32 = vadd.f32 1e-05, %v74_v29  ;;  %v624_v28 = vld [vmem:[%s959_s5 + $0x8] sm:$0xff] }
  0xfb   :  { %v82_v33 = vmul.f32 %v646_v30, %v77_v21  ;;  %v857_v36 = vpop.eup %647  ;;  %vm88_vm1 = vweird.f32 %v646_v30  ;;  %v632_v29 = vld [vmem:[%s959_s5 + $0x48] sm:$0xff] }
  0xfc   :  { %649 = vrsqrt.f32 %v80_v31  ;;  %v102_v10 = vmul.f32 %v857_v36, %v852_v25  ;;  %vm89_vm3 = vmor %vm87_vm2, %vm88_vm1  ;;  %vm97_vm5 = vweird.f32 %v78_v32  ;;  %vm117_vm7 = vweird.f32 %v80_v31 }
  0xfd   :  { %v83_v34 = vmul.f32 %v646_v30, %v82_v33  ;;  %651 = vrsqrt.f32 %v78_v32  ;;  %vm108_vm10 = vweird.f32 %v857_v36 }
  0xfe   :  { %v103_v47 = vmul.f32 %v857_v36, %v102_v10  ;;  %vm109_vm12 = vmor %vm107_vm9, %vm108_vm10 }
  0xff   :  { %v84_v35 = vmul.f32 0.5, %v83_v34 }
 0x100   :  { %v104_v56 = vmul.f32 0.5, %v103_v47 }
 0x101   :  { %v85_v37 = vsub.f32 1.5, %v84_v35 }
 0x102   :  { %v859_v38 = vpop.eup %649  ;;  %v105_v4 = vsub.f32 1.5, %v104_v56 }
 0x103   :  { %v652_v39 = vpop.eup %651  ;;  %v112_v40 = vmul.f32 %v859_v38, %v80_v31  ;;  %v86_v41 = vmul.f32 %v646_v30, %v85_v37  ;;  %vm118_vm8 = vweird.f32 %v859_v38  ;;  %v631_v31 = vld [vmem:[%s959_s5 + $0x40] sm:$0xff] }
 0x104   :  { %v92_v42 = vmul.f32 %v652_v39, %v78_v32  ;;  %vm98_vm4 = vweird.f32 %v652_v39  ;;  %vm119_vm11 = vmor %vm117_vm7, %vm118_vm8  ;;  %v106_v11 = vmul.f32 %v857_v36, %v105_v4  ;;  %v157_v32 = vld [vmem:[%s961_s4] sm:$0x3] }
 0x105   :  { %v113_v43 = vmul.f32 %v859_v38, %v112_v40  ;;  %v90_v49 = vsel %vm89_vm3, %v646_v30, %v86_v41  ;;  %vm99_vm6 = vmor %vm97_vm5, %vm98_vm4  ;;  %v623_v30 = vld [vmem:[%s959_s5] sm:$0xff]  ;;  %v159_v35 = vperm.slane %v157_v32, 0 }
 0x106   :  { %v93_v44 = vmul.f32 %v652_v39, %v92_v42  ;;  %v121_v54 = vmul.f32 %v90_v49, %v736_v16  ;;  %v110_v14 = vsel %vm109_vm12, %v857_v36, %v106_v11  ;;  %v160_v36 = vperm.slane %v157_v32, 1 }
 0x107   :  { %v114_v52 = vmul.f32 0.5, %v113_v43  ;;  %v123_v18 = vmul.f32 %v110_v14, %v733_v15  ;;  %v625_v15 = vld [vmem:[%s959_s5 + $0x10] sm:$0xff] }
 0x108   :  { %v94_v48 = vmul.f32 0.5, %v93_v44  ;;  %v128_v62 = vmul.f32 %v640_v55, %v121_v54  ;;  %430 = vmatpush.bf16.msra.mxu2 %v625_v15 }
 0x109   :  { %v115_v60 = vsub.f32 1.5, %v114_v52  ;;  %v130_v20 = vmul.f32 %v640_v55, %v123_v18 }
 0x10a   :  { %v95_v53 = vsub.f32 1.5, %v94_v48  ;;  %v135_v8 = vadd.f32 %v641_v63, %v128_v62 }
 0x10b   :  { %v116_v7 = vmul.f32 %v859_v38, %v115_v60  ;;  %v137_v22 = vadd.f32 %v641_v63, %v130_v20 }
 0x10c   :  { %v96_v57 = vmul.f32 %v652_v39, %v95_v53  ;;  %431 = vmatpush.bf16.msra.mxu2 %v624_v28 }
 0x10d   :  { %v120_v13 = vsel %vm119_vm11, %v859_v38, %v116_v7 }
 0x10e   :  { %v100_v16 = vsel %vm99_vm6, %v652_v39, %v96_v57  ;;  %v124_v17 = vmul.f32 %v120_v13, %v745_v23  ;;  %v633_v23 = vld [vmem:[%s959_s5 + $0x50] sm:$0xff] }
 0x10f   :  { %v122_v61 = vmul.f32 %v100_v16, %v748_v24  ;;  %v635_v24 = vld [vmem:[%s959_s5 + $0x60] sm:$0xff] }
 0x110   :  { %447 = vmatpush.bf16.msra.mxu3 %v635_v24  ;;  %v131_v19 = vmul.f32 %v640_v55, %v124_v17  ;;  %432 = vmatpush.bf16.msra.mxu2 %v623_v30 }
 0x111   :  { %v129_v5 = vmul.f32 %v640_v55, %v122_v61  ;;  %v642_v61 = vld [vmem:[%s960_s6] ss:$0 sm:$0xff] }
 0x112   :  { %v138_v21 = vadd.f32 %v641_v63, %v131_v19 }
 0x113   :  { %v136_v9 = vadd.f32 %v641_v63, %v129_v5 }
 0x114   :  { %v140_v25 = vpack.c.bf16 %v138_v21, %v137_v22  ;;  %448 = vmatpush.bf16.msra.mxu3 %v634_v27 }
 0x115   :  { %v139_v12 = vpack.c.bf16 %v136_v9, %v135_v8 }
 0x117   :  { %251 = vmatmul.bf16.vlgmr.msra.gmra.mxu0 %v139_v12  ;;  %270 = vmatmul.bf16.vlgmr.msra.gmra.mxu1 %v139_v12 }
 0x118   :  { %449 = vmatpush.bf16.msra.mxu3 %v633_v23 }
 0x11c   :  { %450 = vmatpush.bf16.msra.mxu3 %v632_v29 }
 0x120   :  { %451 = vmatpush.bf16.msra.mxu3 %v631_v31 }
 0x127   :  { %256 = vmatmul.bf16.gmra.mxu0 %v140_v25  ;;  %275 = vmatmul.bf16.gmra.mxu1 %v140_v25 }
 0x194   :  { %v252_v33 = vpop.f32.mrf.mxu0  ;;  %v271_v34 = vpop.f32.mrf.mxu1 }
 0x195   :  { %v253_v37 = vadd.f32 %v252_v33, %v159_v35  ;;  %v272_v38 = vadd.f32 %v271_v34, %v160_v36 }
 0x197   :  { %v281_v42 = vmax.f32 %v253_v37, 0.0  ;;  %v282_v43 = vmax.f32 %v272_v38, 0.0 }
 0x19c   :  { %v254_v39 = vpop.f32.mrf.mxu0  ;;  %v273_v40 = vpop.f32.mrf.mxu1 }
 0x19d   :  { %v255_v41 = vadd.f32 %v254_v39, %v159_v35  ;;  %v274_v10 = vadd.f32 %v273_v40, %v160_v36 }
 0x19f   :  { %v283_v44 = vmax.f32 %v255_v41, 0.0  ;;  %v284_v45 = vmax.f32 %v274_v10, 0.0 }
 0x1a1   :  { %v289_v46 = vpack.c.bf16 %v283_v44, %v281_v42  ;;  %v290_v47 = vpack.c.bf16 %v284_v45, %v282_v43 }
 0x1a3   :  { %433 = vmatmul.bf16.vlgmr.msra.gmra.mxu2 %v289_v46  ;;  %452 = vmatmul.bf16.vlgmr.msra.gmra.mxu3 %v290_v47 }
 0x1a4   :  { %v257_v48 = vpop.f32.mrf.mxu0  ;;  %v276_v49 = vpop.f32.mrf.mxu1 }
 0x1a5   :  { %v258_v50 = vadd.f32 %v257_v48, %v159_v35  ;;  %v277_v51 = vadd.f32 %v276_v49, %v160_v36 }
 0x1a7   :  { %v285_v56 = vmax.f32 %v258_v50, 0.0  ;;  %v286_v57 = vmax.f32 %v277_v51, 0.0 }
 0x1ac   :  { %v259_v52 = vpop.f32.mrf.mxu0  ;;  %v278_v53 = vpop.f32.mrf.mxu1 }
 0x1ad   :  { %v260_v54 = vadd.f32 %v259_v52, %v159_v35  ;;  %v279_v55 = vadd.f32 %v278_v53, %v160_v36 }
 0x1af   :  { %v287_v58 = vmax.f32 %v260_v54, 0.0  ;;  %v288_v59 = vmax.f32 %v279_v55, 0.0 }
 0x1b1   :  { %v291_v60 = vpack.c.bf16 %v287_v58, %v285_v56  ;;  %v292_v16 = vpack.c.bf16 %v288_v59, %v286_v57 }
 0x1b3   :  { %438 = vmatmul.bf16.gmra.mxu2 %v291_v60  ;;  %457 = vmatmul.bf16.gmra.mxu3 %v292_v16 }
 0x226   :  { %v434_v62 = vpop.f32.mrf.mxu2  ;;  %v453_v63 = vpop.f32.mrf.mxu3 }
 0x227   :  { %v435_v4 = vadd.f32 %v642_v61, %v434_v62 }
 0x229   :  { %v454_v5 = vadd.f32 %v453_v63, %v435_v4 }
 0x22b   :  { %v463_v6 = vmul.f32 0.5, %v454_v5 }
 0x22d   :  { %v467_v24 = vadd.f32 %v463_v6, %v712_v1 }
 0x22e   :  { %v436_v7 = vpop.f32.mrf.mxu2  ;;  %v455_v8 = vpop.f32.mrf.mxu3 }
 0x22f   :  { %471 = vst [vmem:[%s962_s9] sm:$0xff] %v467_v24  ;;  %v437_v9 = vadd.f32 %v642_v61, %v436_v7 }
 0x231   :  { %v456_v11 = vadd.f32 %v455_v8, %v437_v9 }
 0x233   :  { %v464_v12 = vmul.f32 0.5, %v456_v11 }
 0x235   :  { %v468_v13 = vadd.f32 %v464_v12, %v724_v3 }
 0x236   :  { %v439_v14 = vpop.f32.mrf.mxu2  ;;  %v458_v17 = vpop.f32.mrf.mxu3 }
 0x237   :  { %472 = vst [vmem:[%s962_s9 + $0x8] sm:$0xff] %v468_v13  ;;  %v440_v18 = vadd.f32 %v642_v61, %v439_v14 }
 0x239   :  { %v459_v19 = vadd.f32 %v458_v17, %v440_v18 }
 0x23b   :  { %v465_v1 = vmul.f32 0.5, %v459_v19 }
 0x23d   :  { %v469_v20 = vadd.f32 %v465_v1, %v707_v0 }
 0x23e   :  { %v441_v21 = vpop.f32.mrf.mxu2  ;;  %v460_v25 = vpop.f32.mrf.mxu3 }
 0x23f   :  { %473 = vst [vmem:[%s962_s9 + $0x10] sm:$0xff] %v469_v20  ;;  %v442_v22 = vadd.f32 %v642_v61, %v441_v21 }
 0x241   :  { %v461_v26 = vadd.f32 %v460_v25, %v442_v22 }
 0x243   :  { %v466_v3 = vmul.f32 0.5, %v461_v26 }
 0x245   :  { %v470_v27 = vadd.f32 %v466_v3, %v719_v2 }
 0x247   :  { %474 = vst [vmem:[%s962_s9 + $0x18] sm:$0xff] %v470_v27 }

// kernel: conformer_css_forward.23
= control target key start
LH: loop header
LB: loop body
LE: loop exit
PB: predicated region body
PF: predicated region fallthrough
CT: control target
= control target key end

     0   :  { %s331_s1 = inlined_call_operand.vmem [shape: bf16[128,128], index: 1, kind: input, shape index: {}]   ;;  %s332_s2 = inlined_call_operand.vmem [shape: f32[1,128], index: 2, kind: input, shape index: {}]   ;;  %s333_s0 = inlined_call_operand.vmem [shape: f32[32,128], index: 0, kind: input, shape index: {}]   ;;  %s334_s3 = inlined_call_operand.vmem [shape: f32[32,128], index: 3, kind: output, shape index: {}]  }
   0x1   :  { %v234_v0 = vld [vmem:[%s331_s1 + $0x38] sm:$0xff]  ;;  %v233_v1 = vld [vmem:[%s331_s1 + $0x30] sm:$0xff]  ;;  %v232_v2 = vld [vmem:[%s331_s1 + $0x28] sm:$0xff] }
   0x2   :  { %88 = vmatpush.bf16.msra.mxu0 %v234_v0  ;;  %235 = vmatpush.bf16.msra.mxu1 %v234_v0  ;;  %v231_v3 = vld [vmem:[%s331_s1 + $0x20] sm:$0xff]  ;;  %v230_v4 = vld [vmem:[%s331_s1 + $0x18] sm:$0xff]  ;;  %v229_v5 = vld [vmem:[%s331_s1 + $0x10] sm:$0xff] }
   0x3   :  { %v228_v6 = vld [vmem:[%s331_s1 + $0x8] sm:$0xff]  ;;  %v227_v7 = vld [vmem:[%s331_s1] sm:$0xff]  ;;  %v16_v10 = vld [vmem:[%s333_s0 + $0x10] sm:$0xff] }
   0x4   :  { %v14_v8 = vld [vmem:[%s333_s0] sm:$0xff]  ;;  %v15_v9 = vld [vmem:[%s333_s0 + $0x8] sm:$0xff]  ;;  %v17_v11 = vld [vmem:[%s333_s0 + $0x18] sm:$0xff] }
   0x5   :  { %v18_v12 = vpack.c.bf16 %v15_v9, %v14_v8  ;;  %v19_v13 = vpack.c.bf16 %v17_v11, %v16_v10  ;;  %v243_v14 = vld [vmem:[%s332_s2] ss:$0 sm:$0xff] }
   0x6   :  { %89 = vmatpush.bf16.msra.mxu0 %v233_v1  ;;  %236 = vmatpush.bf16.msra.mxu1 %v233_v1 }
   0xa   :  { %90 = vmatpush.bf16.msra.mxu0 %v232_v2  ;;  %237 = vmatpush.bf16.msra.mxu1 %v232_v2 }
   0xe   :  { %91 = vmatpush.bf16.msra.mxu0 %v231_v3  ;;  %238 = vmatpush.bf16.msra.mxu1 %v231_v3 }
  0x12   :  { %92 = vmatpush.bf16.msra.mxu0 %v230_v4  ;;  %239 = vmatpush.bf16.msra.mxu1 %v230_v4 }
  0x16   :  { %93 = vmatpush.bf16.msra.mxu0 %v229_v5  ;;  %240 = vmatpush.bf16.msra.mxu1 %v229_v5 }
  0x1a   :  { %94 = vmatpush.bf16.msra.mxu0 %v228_v6  ;;  %241 = vmatpush.bf16.msra.mxu1 %v228_v6 }
  0x1e   :  { %95 = vmatpush.bf16.msra.mxu0 %v227_v7  ;;  %242 = vmatpush.bf16.msra.mxu1 %v227_v7 }
  0x21   :  { %96 = vmatmul.bf16.vlgmr.msra.gmra.mxu0 %v18_v12  ;;  %101 = vmatmul.bf16.vlgmr.msra.gmra.mxu1 %v19_v13 }
  0x9e   :  { %v97_v15 = vpop.f32.mrf.mxu0  ;;  %v102_v16 = vpop.f32.mrf.mxu1 }
  0x9f   :  { %v98_v17 = vadd.f32 %v243_v14, %v97_v15  ;;  %v103_v18 = vadd.f32 %v243_v14, %v102_v16 }
  0xa1   :  { %v223_v19 = vmul.f32 -1.442695, %v98_v17  ;;  %v225_v20 = vmul.f32 -1.442695, %v103_v18 }
  0xa3   :  { %244 = vpow2.f32 %v223_v19 }
  0xa4   :  { %246 = vpow2.f32 %v225_v20 }
  0xa6   :  { %v99_v21 = vpop.f32.mrf.mxu0  ;;  %v104_v22 = vpop.f32.mrf.mxu1 }
  0xa7   :  { %v100_v23 = vadd.f32 %v243_v14, %v99_v21  ;;  %v105_v24 = vadd.f32 %v243_v14, %v104_v22 }
  0xa9   :  { %v245_v25 = vpop.eup %244  ;;  %v224_v26 = vmul.f32 -1.442695, %v100_v23  ;;  %v226_v29 = vmul.f32 -1.442695, %v105_v24 }
  0xaa   :  { %v247_v27 = vpop.eup %246  ;;  %v119_v28 = vadd.f32 1.0, %v245_v25 }
  0xab   :  { %v121_v30 = vadd.f32 1.0, %v247_v27  ;;  %248 = vpow2.f32 %v224_v26 }
  0xac   :  { %250 = vrcp.f32 %v119_v28  ;;  %v132_v40 = vand.u32 2147483647, %v119_v28  ;;  %v134_v41 = vand.u32 2147483648, %v119_v28  ;;  %vm128_vm2 = vweird.f32 %v119_v28 }
  0xad   :  { %252 = vrcp.f32 %v121_v30  ;;  %v164_v44 = vand.u32 2147483648, %v121_v30  ;;  %v162_v46 = vand.u32 2147483647, %v121_v30  ;;  %vm158_vm4 = vweird.f32 %v121_v30 }
  0xae   :  { %254 = vpow2.f32 %v226_v29  ;;  %v135_v49 = vor.u32 1.1754944e-38, %v134_v41  ;;  %vm133_vm5 = vcmp.eq.f32.partialorder %v132_v40, 8.507059e+37 }
  0xaf   :  { %v165_v52 = vor.u32 1.1754944e-38, %v164_v44  ;;  %vm163_vm7 = vcmp.eq.f32.partialorder %v162_v46, 8.507059e+37 }
  0xb1   :  { %v249_v31 = vpop.eup %248 }
  0xb2   :  { %v251_v32 = vpop.eup %250  ;;  %v120_v33 = vadd.f32 1.0, %v249_v31 }
  0xb3   :  { %v253_v34 = vpop.eup %252  ;;  %v124_v35 = vmul.f32 %v251_v32, %v119_v28  ;;  %vm129_vm0 = vweird.f32 %v251_v32 }
  0xb4   :  { %v255_v36 = vpop.eup %254  ;;  %v154_v37 = vmul.f32 %v253_v34, %v121_v30  ;;  %256 = vrcp.f32 %v120_v33  ;;  %vm159_vm1 = vweird.f32 %v253_v34  ;;  %vm130_vm3 = vmor %vm128_vm2, %vm129_vm0  ;;  %v149_v59 = vand.u32 2147483648, %v120_v33 }
  0xb5   :  { %v125_v38 = vsub.f32 1.0, %v124_v35  ;;  %v122_v39 = vadd.f32 1.0, %v255_v36  ;;  %vm160_vm6 = vmor %vm158_vm4, %vm159_vm1  ;;  %v147_v62 = vand.u32 2147483647, %v120_v33  ;;  %vm143_vm9 = vweird.f32 %v120_v33 }
  0xb6   :  { %v155_v42 = vsub.f32 1.0, %v154_v37  ;;  %v150_v2 = vor.u32 1.1754944e-38, %v149_v59 }
  0xb7   :  { %v126_v43 = vmul.f32 %v251_v32, %v125_v38  ;;  %258 = vrcp.f32 %v122_v39  ;;  %v179_v1 = vand.u32 2147483648, %v122_v39  ;;  %v177_v4 = vand.u32 2147483647, %v122_v39 }
  0xb8   :  { %v156_v45 = vmul.f32 %v253_v34, %v155_v42  ;;  %vm148_vm12 = vcmp.eq.f32.partialorder %v147_v62, 8.507059e+37  ;;  %vm173_vm13 = vweird.f32 %v122_v39 }
  0xb9   :  { %v127_v47 = vadd.f32 %v251_v32, %v126_v43  ;;  %v180_v8 = vor.u32 1.1754944e-38, %v179_v1  ;;  %vm178_vm15 = vcmp.eq.f32.partialorder %v177_v4, 8.507059e+37 }
  0xba   :  { %v257_v48 = vpop.eup %256  ;;  %v157_v50 = vadd.f32 %v253_v34, %v156_v45 }
  0xbb   :  { %v131_v51 = vsel %vm130_vm3, %v251_v32, %v127_v47  ;;  %v139_v53 = vmul.f32 %v257_v48, %v120_v33  ;;  %vm144_vm8 = vweird.f32 %v257_v48 }
  0xbc   :  { %v136_v54 = vsel %vm133_vm5, %v135_v49, %v131_v51  ;;  %v161_v55 = vsel %vm160_vm6, %v253_v34, %v157_v50  ;;  %vm145_vm10 = vmor %vm143_vm9, %vm144_vm8 }
  0xbd   :  { %v259_v56 = vpop.eup %258  ;;  %183 = vst [vmem:[%s334_s3] sm:$0xff] %v136_v54  ;;  %v166_v57 = vsel %vm163_vm7, %v165_v52, %v161_v55  ;;  %v140_v58 = vsub.f32 1.0, %v139_v53 }
  0xbe   :  { %185 = vst [vmem:[%s334_s3 + $0x10] sm:$0xff] %v166_v57  ;;  %v169_v60 = vmul.f32 %v259_v56, %v122_v39  ;;  %vm174_vm11 = vweird.f32 %v259_v56 }
  0xbf   :  { %v141_v61 = vmul.f32 %v257_v48, %v140_v58  ;;  %vm175_vm14 = vmor %vm173_vm13, %vm174_vm11 }
  0xc0   :  { %v170_v63 = vsub.f32 1.0, %v169_v60 }
  0xc1   :  { %v142_v0 = vadd.f32 %v257_v48, %v141_v61 }
  0xc2   :  { %v171_v3 = vmul.f32 %v259_v56, %v170_v63 }
  0xc3   :  { %v146_v5 = vsel %vm145_vm10, %v257_v48, %v142_v0 }
  0xc4   :  { %v151_v6 = vsel %vm148_vm12, %v150_v2, %v146_v5  ;;  %v172_v7 = vadd.f32 %v259_v56, %v171_v3 }
  0xc5   :  { %184 = vst [vmem:[%s334_s3 + $0x8] sm:$0xff] %v151_v6 }
  0xc6   :  { %v176_v9 = vsel %vm175_vm14, %v259_v56, %v172_v7 }
  0xc7   :  { %v181_v10 = vsel %vm178_vm15, %v180_v8, %v176_v9 }
  0xc8   :  { %186 = vst [vmem:[%s334_s3 + $0x18] sm:$0xff] %v181_v10 }

// kernel: conformer_css_forward.19
= control target key start
LH: loop header
LB: loop body
LE: loop exit
PB: predicated region body
PF: predicated region fallthrough
CT: control target
= control target key end

     0   :  { %v515_v4 = vmov 128.0   ;;  %s765_s0 = inlined_call_operand.vmem [shape: f32[32,128], index: 0, kind: input, shape index: {}]   ;;  %s766_s1 = inlined_call_operand.vmem [shape: f32[1,128], index: 1, kind: input, shape index: {}]   ;;  %s767_s2 = inlined_call_operand.vmem [shape: f32[1,128], index: 2, kind: input, shape index: {}]   ;;  %s768_s3 = inlined_call_operand.vmem [shape: bf16[128,384], index: 3, kind: input, shape index: {}]   ;;  %s769_s4 = inlined_call_operand.vmem [shape: f32[1,384], index: 4, kind: input, shape index: {}]   ;;  %s770_s5 = inlined_call_operand.vmem [shape: bf16[32,384], index: 5, kind: output, shape index: {}]  }
   0x1   :  { %v22_v0 = vld [vmem:[%s765_s0 + $0x10] sm:$0xff]  ;;  %v20_v1 = vld [vmem:[%s765_s0] sm:$0xff]  ;;  %v23_v2 = vld [vmem:[%s765_s0 + $0x18] sm:$0xff]  ;;  %505 = vrcp.f32 %v515_v4 }
   0x2   :  { %30 = vadd.xlane.f32.xlu1 %v22_v0  ;;  %26 = vadd.xlane.f32.xlu0 %v20_v1  ;;  %v21_v3 = vld [vmem:[%s765_s0 + $0x8] sm:$0xff]  ;;  %v492_v28 = vld [vmem:[%s768_s3 + $0xb0] sm:$0xf0]  ;;  %v462_v31 = vld [vmem:[%s768_s3 + $0xb4] sm:$0xf0] }
   0x3   :  { %v460_v27 = vld [vmem:[%s768_s3 + $0xa8] sm:$0xf]  ;;  %v491_v29 = vld [vmem:[%s768_s3 + $0xac] sm:$0xf]  ;;  %v468_v32 = vld [vmem:[%s768_s3 + $0xb0] sm:$0xf] }
   0x4   :  { %v461_v30 = vor.u32 %v492_v28, %v460_v27  ;;  %v493_v33 = vld [vmem:[%s768_s3 + $0xb8] sm:$0xf0]  ;;  %v465_v34 = vor.u32 %v491_v29, %v462_v31  ;;  %v448_v36 = vld [vmem:[%s768_s3 + $0x90] sm:$0xf]  ;;  %v488_v38 = vld [vmem:[%s768_s3 + $0x94] sm:$0xf] }
   0x5   :  { %v469_v35 = vor.u32 %v493_v33, %v468_v32  ;;  %v489_v37 = vld [vmem:[%s768_s3 + $0x98] sm:$0xf0]  ;;  %v450_v40 = vld [vmem:[%s768_s3 + $0x9c] sm:$0xf0]  ;;  %v456_v41 = vld [vmem:[%s768_s3 + $0x98] sm:$0xf] }
   0x6   :  { %297 = vmatpush.bf16.msra.mxu0 %v461_v30  ;;  %494 = vmatpush.bf16.msra.mxu3 %v461_v30  ;;  %v449_v39 = vor.u32 %v489_v37, %v448_v36  ;;  %v490_v42 = vld [vmem:[%s768_s3 + $0xa0] sm:$0xf0]  ;;  %v453_v43 = vor.u32 %v488_v38, %v450_v40  ;;  %v436_v45 = vld [vmem:[%s768_s3 + $0x78] sm:$0xf]  ;;  %v485_v47 = vld [vmem:[%s768_s3 + $0x7c] sm:$0xf] }
   0x7   :  { %v506_v5 = vpop.eup %505  ;;  %316 = vmatpush.bf16.msra.mxu1 %v465_v34  ;;  %335 = vmatpush.bf16.msra.mxu2 %v469_v35  ;;  %v457_v44 = vor.u32 %v490_v42, %v456_v41  ;;  %v486_v46 = vld [vmem:[%s768_s3 + $0x80] sm:$0xf0]  ;;  %v438_v49 = vld [vmem:[%s768_s3 + $0x84] sm:$0xf0]  ;;  %v444_v50 = vld [vmem:[%s768_s3 + $0x80] sm:$0xf] }
   0x8   :  { %v35_v6 = vmul.f32 128.0, %v506_v5  ;;  %vm39_vm0 = vweird.f32 %v506_v5  ;;  %v437_v48 = vor.u32 %v486_v46, %v436_v45  ;;  %v487_v51 = vld [vmem:[%s768_s3 + $0x88] sm:$0xf0]  ;;  %v441_v52 = vor.u32 %v485_v47, %v438_v49  ;;  %v424_v54 = vld [vmem:[%s768_s3 + $0x60] sm:$0xf] }
   0x9   :  { %v445_v53 = vor.u32 %v487_v51, %v444_v50  ;;  %v483_v55 = vld [vmem:[%s768_s3 + $0x68] sm:$0xf0]  ;;  %v482_v56 = vld [vmem:[%s768_s3 + $0x64] sm:$0xf]  ;;  %v426_v58 = vld [vmem:[%s768_s3 + $0x6c] sm:$0xf0] }
   0xa   :  { %32 = vadd.xlane.f32.xlu1 %v23_v2  ;;  %28 = vadd.xlane.f32.xlu0 %v21_v3  ;;  %v36_v7 = vsub.f32 1.0, %v35_v6  ;;  %v425_v57 = vor.u32 %v483_v55, %v424_v54  ;;  %v432_v59 = vld [vmem:[%s768_s3 + $0x68] sm:$0xf]  ;;  %v484_v60 = vld [vmem:[%s768_s3 + $0x70] sm:$0xf0]  ;;  %v429_v61 = vor.u32 %v482_v56, %v426_v58 }
   0xb   :  { %298 = vmatpush.bf16.msra.mxu0 %v449_v39  ;;  %495 = vmatpush.bf16.msra.mxu3 %v449_v39  ;;  %v433_v62 = vor.u32 %v484_v60, %v432_v59  ;;  %v412_v63 = vld [vmem:[%s768_s3 + $0x48] sm:$0xf]  ;;  %v420_v4 = vld [vmem:[%s768_s3 + $0x50] sm:$0xf]  ;;  %v396_v27 = vld [vmem:[%s768_s3 + $0x20] sm:$0xf] }
   0xc   :  { %v37_v8 = vmul.f32 %v506_v5, %v36_v7  ;;  %317 = vmatpush.bf16.msra.mxu1 %v453_v43  ;;  %336 = vmatpush.bf16.msra.mxu2 %v457_v44  ;;  %v475_v28 = vld [vmem:[%s768_s3 + $0x28] sm:$0xf0]  ;;  %v376_v33 = vld [vmem:[%s768_s3] sm:$0xf]  ;;  %v470_v35 = vld [vmem:[%s768_s3 + $0x4] sm:$0xf] }
   0xd   :  { %v397_v32 = vor.u32 %v475_v28, %v396_v27  ;;  %v471_v34 = vld [vmem:[%s768_s3 + $0x8] sm:$0xf0]  ;;  %v378_v39 = vld [vmem:[%s768_s3 + $0xc] sm:$0xf0]  ;;  %v384_v40 = vld [vmem:[%s768_s3 + $0x8] sm:$0xf] }
   0xe   :  { %v38_v9 = vadd.f32 %v506_v5, %v37_v8  ;;  %v400_v8 = vld [vmem:[%s768_s3 + $0x30] sm:$0xf]  ;;  %v377_v38 = vor.u32 %v471_v34, %v376_v33  ;;  %v472_v41 = vld [vmem:[%s768_s3 + $0x10] sm:$0xf0]  ;;  %v381_v42 = vor.u32 %v470_v35, %v378_v39 }
   0xf   :  { %299 = vmatpush.bf16.msra.mxu0 %v437_v48  ;;  %496 = vmatpush.bf16.msra.mxu3 %v437_v48  ;;  %v385_v43 = vor.u32 %v472_v41, %v384_v40 }
  0x10   :  { %v558_v10 = vsel %vm39_vm0, %v506_v5, %v38_v9  ;;  %318 = vmatpush.bf16.msra.mxu1 %v441_v52  ;;  %337 = vmatpush.bf16.msra.mxu2 %v445_v53  ;;  %v481_v5 = vld [vmem:[%s768_s3 + $0x58] sm:$0xf0] }
  0x11   :  { %v421_v7 = vor.u32 %v481_v5, %v420_v4  ;;  %v477_v9 = vld [vmem:[%s768_s3 + $0x38] sm:$0xf0] }
  0x13   :  { %300 = vmatpush.bf16.msra.mxu0 %v425_v57  ;;  %497 = vmatpush.bf16.msra.mxu3 %v425_v57 }
  0x14   :  { %319 = vmatpush.bf16.msra.mxu1 %v429_v61  ;;  %338 = vmatpush.bf16.msra.mxu2 %v433_v62 }
  0x18   :  { %339 = vmatpush.bf16.msra.mxu2 %v421_v7 }
  0x75   :  { %v31_v11 = vpop.xlane.xlu1 %30  ;;  %v27_v12 = vpop.xlane.xlu0 %26 }
  0x76   :  { %v43_v13 = vmul.f32 %v558_v10, %v31_v11  ;;  %v41_v14 = vmul.f32 %v558_v10, %v27_v12  ;;  %v476_v11 = vld [vmem:[%s768_s3 + $0x34] sm:$0xf]  ;;  %v401_v12 = vor.u32 %v477_v9, %v400_v8 }
  0x78   :  { %v562_v15 = vsub.f32 %v22_v0, %v43_v13  ;;  %v564_v16 = vsub.f32 %v20_v1, %v41_v14  ;;  %v480_v0 = vld [vmem:[%s768_s3 + $0x50] sm:$0xf0]  ;;  %v479_v1 = vld [vmem:[%s768_s3 + $0x4c] sm:$0xf]  ;;  %v402_v13 = vld [vmem:[%s768_s3 + $0x3c] sm:$0xf0] }
  0x79   :  { %v408_v14 = vld [vmem:[%s768_s3 + $0x38] sm:$0xf] }
  0x7a   :  { %v51_v17 = vmul.f32 %v562_v15, %v562_v15  ;;  %v49_v18 = vmul.f32 %v564_v16, %v564_v16 }
  0x7c   :  { %57 = vadd.xlane.f32.xlu0 %v51_v17  ;;  %53 = vadd.xlane.f32.xlu2 %v49_v18  ;;  %v478_v17 = vld [vmem:[%s768_s3 + $0x40] sm:$0xf0]  ;;  %v405_v18 = vor.u32 %v476_v11, %v402_v13  ;;  %v503_v13 = vld [vmem:[%s766_s1] ss:$0 sm:$0xff] }
  0x7d   :  { %v33_v19 = vpop.xlane.xlu1 %32  ;;  %v29_v20 = vpop.xlane.xlu0 %28 }
  0x7e   :  { %v44_v21 = vmul.f32 %v558_v10, %v33_v19  ;;  %v42_v22 = vmul.f32 %v558_v10, %v29_v20  ;;  %v409_v19 = vor.u32 %v478_v17, %v408_v14  ;;  %v388_v20 = vld [vmem:[%s768_s3 + $0x18] sm:$0xf] }
  0x80   :  { %v572_v23 = vsub.f32 %v23_v2, %v44_v21  ;;  %v574_v24 = vsub.f32 %v21_v3, %v42_v22  ;;  %v413_v2 = vor.u32 %v480_v0, %v412_v63  ;;  %v414_v3 = vld [vmem:[%s768_s3 + $0x54] sm:$0xf0]  ;;  %340 = vmatpush.bf16.msra.mxu2 %v409_v19  ;;  %v474_v21 = vld [vmem:[%s768_s3 + $0x20] sm:$0xf0]  ;;  %v473_v22 = vld [vmem:[%s768_s3 + $0x1c] sm:$0xf] }
  0x81   :  { %v417_v6 = vor.u32 %v479_v1, %v414_v3 }
  0x82   :  { %v52_v25 = vmul.f32 %v572_v23, %v572_v23  ;;  %v50_v26 = vmul.f32 %v574_v24, %v574_v24  ;;  %301 = vmatpush.bf16.msra.mxu0 %v413_v2  ;;  %498 = vmatpush.bf16.msra.mxu3 %v413_v2 }
  0x83   :  { %320 = vmatpush.bf16.msra.mxu1 %v417_v6 }
  0x84   :  { %59 = vadd.xlane.f32.xlu1 %v52_v25  ;;  %55 = vadd.xlane.f32.xlu2 %v50_v26  ;;  %v389_v25 = vor.u32 %v474_v21, %v388_v20  ;;  %v390_v26 = vld [vmem:[%s768_s3 + $0x24] sm:$0xf0] }
  0x85   :  { %v393_v31 = vor.u32 %v473_v22, %v390_v26  ;;  %341 = vmatpush.bf16.msra.mxu2 %v397_v32 }
  0x86   :  { %302 = vmatpush.bf16.msra.mxu0 %v401_v12  ;;  %499 = vmatpush.bf16.msra.mxu3 %v401_v12 }
  0x87   :  { %321 = vmatpush.bf16.msra.mxu1 %v405_v18 }
  0x89   :  { %342 = vmatpush.bf16.msra.mxu2 %v385_v43 }
  0x8a   :  { %303 = vmatpush.bf16.msra.mxu0 %v389_v25  ;;  %500 = vmatpush.bf16.msra.mxu3 %v389_v25 }
  0x8b   :  { %322 = vmatpush.bf16.msra.mxu1 %v393_v31 }
  0x8e   :  { %304 = vmatpush.bf16.msra.mxu0 %v377_v38  ;;  %501 = vmatpush.bf16.msra.mxu3 %v377_v38 }
  0x8f   :  { %323 = vmatpush.bf16.msra.mxu1 %v381_v42 }
  0xef   :  { %v54_v29 = vpop.xlane.xlu2 %53  ;;  %v58_v30 = vpop.xlane.xlu0 %57 }
  0xf0   :  { %v61_v36 = vmul.f32 %v54_v29, %v558_v10  ;;  %v63_v37 = vmul.f32 %v58_v30, %v558_v10 }
  0xf2   :  { %v65_v44 = vadd.f32 1e-05, %v61_v36  ;;  %v67_v45 = vadd.f32 1e-05, %v63_v37 }
  0xf4   :  { %507 = vrsqrt.f32 %v65_v44  ;;  %vm95_vm1 = vweird.f32 %v67_v45  ;;  %vm75_vm5 = vweird.f32 %v65_v44 }
  0xf5   :  { %509 = vrsqrt.f32 %v67_v45 }
  0xf7   :  { %v60_v46 = vpop.xlane.xlu1 %59  ;;  %v56_v47 = vpop.xlane.xlu2 %55 }
  0xf8   :  { %v64_v48 = vmul.f32 %v60_v46, %v558_v10  ;;  %v62_v49 = vmul.f32 %v56_v47, %v558_v10 }
  0xfa   :  { %v508_v50 = vpop.eup %507  ;;  %v68_v51 = vadd.f32 1e-05, %v64_v48  ;;  %v66_v52 = vadd.f32 1e-05, %v62_v49 }
  0xfb   :  { %v510_v53 = vpop.eup %509  ;;  %v70_v54 = vmul.f32 %v508_v50, %v65_v44  ;;  %vm76_vm3 = vweird.f32 %v508_v50 }
  0xfc   :  { %v90_v55 = vmul.f32 %v510_v53, %v67_v45  ;;  %511 = vrsqrt.f32 %v68_v51  ;;  %vm96_vm2 = vweird.f32 %v510_v53  ;;  %vm77_vm6 = vmor %vm75_vm5, %vm76_vm3  ;;  %vm105_vm7 = vweird.f32 %v68_v51 }
  0xfd   :  { %v71_v56 = vmul.f32 %v508_v50, %v70_v54  ;;  %513 = vrsqrt.f32 %v66_v52  ;;  %vm97_vm4 = vmor %vm95_vm1, %vm96_vm2  ;;  %vm85_vm11 = vweird.f32 %v66_v52 }
  0xfe   :  { %v91_v57 = vmul.f32 %v510_v53, %v90_v55 }
  0xff   :  { %v72_v58 = vmul.f32 0.5, %v71_v56 }
 0x100   :  { %v92_v59 = vmul.f32 0.5, %v91_v57 }
 0x101   :  { %v73_v60 = vsub.f32 1.5, %v72_v58 }
 0x102   :  { %v512_v61 = vpop.eup %511  ;;  %v93_v62 = vsub.f32 1.5, %v92_v59 }
 0x103   :  { %v514_v63 = vpop.eup %513  ;;  %v100_v0 = vmul.f32 %v512_v61, %v68_v51  ;;  %v74_v10 = vmul.f32 %v508_v50, %v73_v60  ;;  %vm106_vm8 = vweird.f32 %v512_v61 }
 0x104   :  { %v94_v1 = vmul.f32 %v510_v53, %v93_v62  ;;  %v80_v2 = vmul.f32 %v514_v63, %v66_v52  ;;  %vm107_vm9 = vmor %vm105_vm7, %vm106_vm8  ;;  %vm86_vm10 = vweird.f32 %v514_v63 }
 0x105   :  { %v101_v3 = vmul.f32 %v512_v61, %v100_v0  ;;  %v78_v7 = vsel %vm77_vm6, %v508_v50, %v74_v10  ;;  %vm87_vm12 = vmor %vm85_vm11, %vm86_vm10 }
 0x106   :  { %v81_v4 = vmul.f32 %v514_v63, %v80_v2  ;;  %v98_v5 = vsel %vm97_vm4, %v510_v53, %v94_v1  ;;  %v109_v14 = vmul.f32 %v78_v7, %v564_v16 }
 0x107   :  { %v102_v6 = vmul.f32 0.5, %v101_v3  ;;  %v111_v11 = vmul.f32 %v98_v5, %v562_v15  ;;  %v504_v15 = vld [vmem:[%s767_s2] ss:$0 sm:$0xff] }
 0x108   :  { %v82_v8 = vmul.f32 0.5, %v81_v4  ;;  %v116_v26 = vmul.f32 %v503_v13, %v109_v14 }
 0x109   :  { %v103_v9 = vsub.f32 1.5, %v102_v6  ;;  %v118_v22 = vmul.f32 %v503_v13, %v111_v11 }
 0x10a   :  { %v83_v12 = vsub.f32 1.5, %v82_v8  ;;  %v123_v30 = vadd.f32 %v504_v15, %v116_v26 }
 0x10b   :  { %v104_v17 = vmul.f32 %v512_v61, %v103_v9  ;;  %v125_v29 = vadd.f32 %v504_v15, %v118_v22 }
 0x10c   :  { %v84_v18 = vmul.f32 %v514_v63, %v83_v12 }
 0x10d   :  { %v108_v19 = vsel %vm107_vm9, %v512_v61, %v104_v17 }
 0x10e   :  { %v112_v20 = vmul.f32 %v108_v19, %v572_v23  ;;  %v88_v21 = vsel %vm87_vm12, %v514_v63, %v84_v18  ;;  %v161_v23 = vld [vmem:[%s769_s4] sm:$0x7] }
 0x10f   :  { %v110_v25 = vmul.f32 %v88_v21, %v574_v24  ;;  %v163_v24 = vperm.slane %v161_v23, 0  ;;  %v164_v34 = vperm.slane %v161_v23, 1  ;;  %v165_v40 = vperm.slane %v161_v23, 2 }
 0x110   :  { %v119_v27 = vmul.f32 %v503_v13, %v112_v20 }
 0x111   :  { %v117_v28 = vmul.f32 %v503_v13, %v110_v25 }
 0x112   :  { %v126_v16 = vadd.f32 %v504_v15, %v119_v27 }
 0x113   :  { %v124_v31 = vadd.f32 %v504_v15, %v117_v28 }
 0x114   :  { %v128_v32 = vpack.c.bf16 %v126_v16, %v125_v29 }
 0x115   :  { %v127_v33 = vpack.c.bf16 %v124_v31, %v123_v30 }
 0x116   :  { %310 = vmatmul.bf16.vlgmr.msra.gmra.mxu3 %v128_v32 }
 0x117   :  { %305 = vmatmul.bf16.vlgmr.msra.gmra.mxu0 %v127_v33  ;;  %324 = vmatmul.bf16.vlgmr.msra.gmra.mxu1 %v127_v33 }
 0x118   :  { %343 = vmatmul.bf16.vlgmr.msra.gmra.mxu2 %v127_v33 }
 0x127   :  { %329 = vmatmul.bf16.gmra.mxu1 %v128_v32 }
 0x128   :  { %348 = vmatmul.bf16.gmra.mxu2 %v128_v32 }
 0x194   :  { %v306_v35 = vpop.f32.mrf.mxu0  ;;  %v325_v36 = vpop.f32.mrf.mxu1 }
 0x195   :  { %v307_v37 = vadd.f32 %v306_v35, %v163_v24  ;;  %v326_v38 = vadd.f32 %v325_v36, %v164_v34 }
 0x197   :  { %v354_v39 = vpack.c.bf16 %v326_v38, %v307_v37 }
 0x199   :  { %362 = vst [vmem:[%s770_s5] sm:$0xff] %v354_v39  ;;  %v311_v49 = vpop.f32.mrf.mxu3 }
 0x19a   :  { %v312_v53 = vadd.f32 %v311_v49, %v163_v24 }
 0x19b   :  { %v344_v41 = vpop.f32.mrf.mxu2 }
 0x19c   :  { %v345_v42 = vadd.f32 %v344_v41, %v165_v40  ;;  %v308_v43 = vpop.f32.mrf.mxu0  ;;  %v327_v44 = vpop.f32.mrf.mxu1 }
 0x19d   :  { %v309_v45 = vadd.f32 %v308_v43, %v163_v24  ;;  %v328_v46 = vadd.f32 %v327_v44, %v164_v34 }
 0x19e   :  { %v355_v47 = vpack.c.bf16 %v345_v42, %v345_v42 }
 0x19f   :  { %v356_v48 = vpack.c.bf16 %v328_v46, %v309_v45 }
 0x1a0   :  { %363 = vst [vmem:[%s770_s5 + $0x8] sm:$0xf] %v355_v47 }
 0x1a1   :  { %364 = vst [vmem:[%s770_s5 + $0xc] sm:$0xff] %v356_v48  ;;  %v313_v57 = vpop.f32.mrf.mxu3 }
 0x1a2   :  { %v314_v61 = vadd.f32 %v313_v57, %v163_v24 }
 0x1a3   :  { %v346_v50 = vpop.f32.mrf.mxu2 }
 0x1a4   :  { %v347_v51 = vadd.f32 %v346_v50, %v165_v40  ;;  %v330_v52 = vpop.f32.mrf.mxu1 }
 0x1a5   :  { %v331_v54 = vadd.f32 %v330_v52, %v164_v34 }
 0x1a6   :  { %v357_v55 = vpack.c.bf16 %v347_v51, %v347_v51 }
 0x1a7   :  { %v358_v56 = vpack.c.bf16 %v331_v54, %v312_v53 }
 0x1a8   :  { %365 = vst [vmem:[%s770_s5 + $0x14] sm:$0xf] %v357_v55 }
 0x1a9   :  { %366 = vst [vmem:[%s770_s5 + $0x18] sm:$0xff] %v358_v56 }
 0x1ab   :  { %v349_v58 = vpop.f32.mrf.mxu2 }
 0x1ac   :  { %v350_v59 = vadd.f32 %v349_v58, %v165_v40  ;;  %v332_v60 = vpop.f32.mrf.mxu1 }
 0x1ad   :  { %v333_v62 = vadd.f32 %v332_v60, %v164_v34 }
 0x1ae   :  { %v359_v63 = vpack.c.bf16 %v350_v59, %v350_v59 }
 0x1af   :  { %v360_v0 = vpack.c.bf16 %v333_v62, %v314_v61 }
 0x1b0   :  { %367 = vst [vmem:[%s770_s5 + $0x20] sm:$0xf] %v359_v63 }
 0x1b1   :  { %368 = vst [vmem:[%s770_s5 + $0x24] sm:$0xff] %v360_v0 }
 0x1b3   :  { %v351_v10 = vpop.f32.mrf.mxu2 }
 0x1b4   :  { %v352_v1 = vadd.f32 %v351_v10, %v165_v40 }
 0x1b6   :  { %v361_v2 = vpack.c.bf16 %v352_v1, %v352_v1 }
 0x1b8   :  { %369 = vst [vmem:[%s770_s5 + $0x2c] sm:$0xf] %v361_v2 }

</bundles_post_ra>
